<compile_context>
chip_gen: v6e
topology: v6e:2x2x1
jax: 0.10.0
libtpu: 0.0.40
codegen_flags: <defaults>
</compile_context>

<pallas_src>
import functools

import jax
import jax.numpy as jnp
from jax.experimental import pallas as pl
from jax.experimental.pallas import tpu as pltpu

LANE = 128     # f32 lane width of a vreg
SUBLANE = 8    # f32 sublane width


def _round_up(v, m):
    return (v + m - 1) // m * m


def _sigmoid(z):
    # tanh form: one EUP op, no exp overflow for large |z|.
    return 0.5 * jnp.tanh(0.5 * z) + 0.5


def _prognet_kernel(
    # inputs -------------------------------------------------------------
    x_ref,
    # frozen pretrained column fc1..fc4
    pw1_ref, pb1_ref, pw2_ref, pb2_ref, pw3_ref, pb3_ref, pw4_ref, pb4_ref,
    # progressive column: fc1_w, fused lateral layers [W;U], fused output
    w1_ref, b1_ref, w2_ref, b2_ref, w3_ref, b3_ref, w4_ref, b4_ref,
    wo_ref, bo_ref,
    # output -------------------------------------------------------------
    out_ref,
    *, nout,
):
    x = x_ref[...]

    def lin(h, w_ref, b_ref):
        # Matmul inputs may be bf16; accumulate + bias-add in f32.
        return (
            jnp.dot(h.astype(w_ref.dtype), w_ref[...],
                    preferred_element_type=jnp.float32)
            + b_ref[...]
        )

    # frozen pretrained column
    fz1 = _sigmoid(lin(x, pw1_ref, pb1_ref))
    fz2 = _sigmoid(lin(fz1, pw2_ref, pb2_ref))
    fz3 = _sigmoid(lin(fz2, pw3_ref, pb3_ref))
    fz4 = _sigmoid(lin(fz3, pw4_ref, pb4_ref))

    # progressive column; each lateral pair is one matmul on the
    # lane-concatenated [ly_{k-1}, fz_{k-1}] activations.
    # TODO(synk): dropout (training-mode, p=0.5) treated as identity.
    ly1 = _sigmoid(lin(x, w1_ref, b1_ref))
    ly2 = _sigmoid(lin(jnp.concatenate([ly1, fz1], axis=-1), w2_ref, b2_ref))
    ly3 = _sigmoid(lin(jnp.concatenate([ly2, fz2], axis=-1), w3_ref, b3_ref))
    ly4 = _sigmoid(lin(jnp.concatenate([ly3, fz3], axis=-1), w4_ref, b4_ref))
    logits = lin(jnp.concatenate([ly4, fz4], axis=-1), wo_ref, bo_ref)

    # Mask padded class lanes so they don't contribute to the softmax.
    lane = jax.lax.broadcasted_iota(jnp.int32, logits.shape, 1)
    logits = jnp.where(lane < nout, logits, -1e30)

    # numerically stable softmax over the class (lane) axis
    m = jnp.max(logits, axis=-1, keepdims=True)
    e = jnp.exp(logits - m)
    s = jnp.sum(e, axis=-1, keepdims=True)
    inv = pl.reciprocal(s, approx=True)       # EUP vrcp (free slot)
    inv = inv * (2.0 - s * inv)               # one Newton step -> ~f32 exact
    out_ref[...] = e * inv


def _prepare_params(params, matmul_dtype):
    """Pad feature dims to 128 lanes, fuse lateral W/U pairs and their biases."""
    (pw1, pb1, pw2, pb2, pw3, pb3, pw4, pb4,
     w1w, b1w, w2w, b2w, w2u, b2u, w3w, b3w, w3u, b3u,
     w4w, b4w, w4u, b4u, wow, bow, wou, bou) = params
    nin, nhid = pw1.shape
    nout = wow.shape[1]
    nin_p = _round_up(nin, LANE)
    nhid_p = _round_up(nhid, LANE)
    nout_p = _round_up(nout, LANE)

    def pad2(a, rows, cols):
        r, c = a.shape
        return jnp.pad(a, ((0, rows - r), (0, cols - c)))

    def w(a, rows, cols):
        return pad2(a, rows, cols).astype(matmul_dtype)

    def b(a, cols):
        return pad2(a.reshape(1, -1).astype(jnp.float32), 1, cols)

    def fuse_w(wa, wb, rows, cols):
        # Rows must line up with the lane-concatenated (padded) activations,
        # so pad each half to `rows` before stacking along the input axis.
        return jnp.concatenate(
            [pad2(wa, rows, cols), pad2(wb, rows, cols)], axis=0
        ).astype(matmul_dtype)

    prepared = (
        # pretrained column
        w(pw1, nin_p, nhid_p), b(pb1, nhid_p),
        w(pw2, nhid_p, nhid_p), b(pb2, nhid_p),
        w(pw3, nhid_p, nhid_p), b(pb3, nhid_p),
        w(pw4, nhid_p, nhid_p), b(pb4, nhid_p),
        # progressive column
        w(w1w, nin_p, nhid_p), b(b1w, nhid_p),
        fuse_w(w2w, w2u, nhid_p, nhid_p), b(b2w + b2u, nhid_p),
        fuse_w(w3w, w3u, nhid_p, nhid_p), b(b3w + b3u, nhid_p),
        fuse_w(w4w, w4u, nhid_p, nhid_p), b(b4w + b4u, nhid_p),
        fuse_w(wow, wou, nhid_p, nout_p), b(bow + bou, nout_p),
    )
    return prepared, (nin, nhid, nout, nin_p, nhid_p, nout_p)


@functools.partial(jax.jit, static_argnames=("tile_b", "matmul_dtype"))
def prognet_forward(x, params, *, tile_b=256, matmul_dtype=jnp.float32):
    """params: flat tuple of logical (unpadded) (weight, bias) arrays."""
    prepared, (nin, nhid, nout, nin_p, nhid_p, nout_p) = _prepare_params(
        params, matmul_dtype)

    bsz = x.shape[0]
    tile_b = max(SUBLANE,
                 _round_up(min(tile_b, _round_up(bsz, SUBLANE)), SUBLANE))
    b_pad = _round_up(bsz, tile_b)
    x_p = jnp.pad(x.astype(matmul_dtype),
                  ((0, b_pad - bsz), (0, nin_p - x.shape[1])))

    grid = (b_pad // tile_b,)

    # x / out are tiled over batch (auto double-buffered); weights & biases use
    # a constant index_map so a single copy stays resident in VMEM across steps.
    const2 = lambda i: (0, 0)
    weight_specs = [pl.BlockSpec(p.shape, const2) for p in prepared]
    in_specs = [pl.BlockSpec((tile_b, nin_p), lambda i: (i, 0))] + weight_specs
    out_specs = pl.BlockSpec((tile_b, nout_p), lambda i: (i, 0))

    nbytes = lambda a: a.size * a.dtype.itemsize
    flops = 2 * b_pad * (2 * nin_p * nhid_p          # pretrained fc1 + fc1_w
                         + 3 * nhid_p * nhid_p       # pretrained fc2..fc4
                         + 3 * 2 * nhid_p * nhid_p   # fused laterals 2..4
                         + 2 * nhid_p * nout_p)      # fused output layer
    transcendentals = b_pad * (8 * nhid_p + nout_p + 1)
    bytes_accessed = (nbytes(x_p) + sum(nbytes(p) for p in prepared)
                      + b_pad * nout_p * 4)

    out_p = pl.pallas_call(
        functools.partial(_prognet_kernel, nout=nout),
        out_shape=jax.ShapeDtypeStruct((b_pad, nout_p), jnp.float32),
        grid=grid,
        in_specs=in_specs,
        out_specs=out_specs,
        compiler_params=pltpu.CompilerParams(
            # batch tiles are independent -> shard across v7x's 2 TensorCores
            dimension_semantics=("parallel",),
        ),
        cost_estimate=pl.CostEstimate(
            flops=flops,
            transcendentals=transcendentals,
            bytes_accessed=bytes_accessed,
        ),
    )(x_p, *prepared)

    return out_p[:bsz, :nout]


def _xavier_normal(key, fan_in, fan_out):
    std = (2.0 / (fan_in + fan_out)) ** 0.5
    return std * jax.random.normal(key, (fan_in, fan_out), dtype=jnp.float32)


def make_params(key, nin, nhid, nout):
    """Deterministic synthetic init (pretrained: small normals; progressive:
    xavier_normal weights, zero biases, matching init_linear)."""
    keys = jax.random.split(key, 16)
    k = iter(keys)

    def pre_lin(kk, fi, fo):
        w = 0.1 * jax.random.normal(kk, (fi, fo), dtype=jnp.float32)
        b = jnp.zeros((1, fo), dtype=jnp.float32)
        return w, b

    def prog_lin(kk, fi, fo):
        w = _xavier_normal(kk, fi, fo)
        b = jnp.zeros((1, fo), dtype=jnp.float32)  # init.constant(bias, 0)
        return w, b

    params = []
    # pretrained fc1..fc4
    params += pre_lin(next(k), nin, nhid)
    params += pre_lin(next(k), nhid, nhid)
    params += pre_lin(next(k), nhid, nhid)
    params += pre_lin(next(k), nhid, nhid)
    # progressive column
    params += prog_lin(next(k), nin, nhid)    # fc1_w
    params += prog_lin(next(k), nhid, nhid)   # fc2_w
    params += prog_lin(next(k), nhid, nhid)   # fc2_u
    params += prog_lin(next(k), nhid, nhid)   # fc3_w
    params += prog_lin(next(k), nhid, nhid)   # fc3_u
    params += prog_lin(next(k), nhid, nhid)   # fc4_w
    params += prog_lin(next(k), nhid, nhid)   # fc4_u
    params += prog_lin(next(k), nhid, nout)   # fc_out_w
    params += prog_lin(next(k), nhid, nout)   # fc_out_u
    return tuple(params)


def prognet_reference(x, params):
    """Pure-JAX reference for a correctness check (unpadded, f32)."""
    (pw1, pb1, pw2, pb2, pw3, pb3, pw4, pb4,
     w1w, b1w, w2w, b2w, w2u, b2u, w3w, b3w, w3u, b3u,
     w4w, b4w, w4u, b4u, wow, bow, wou, bou) = params
    sig = jax.nn.sigmoid
    lin = lambda h, w, bb: h @ w + bb
    fz1 = sig(lin(x, pw1, pb1))
    fz2 = sig(lin(fz1, pw2, pb2))
    fz3 = sig(lin(fz2, pw3, pb3))
    fz4 = sig(lin(fz3, pw4, pb4))
    ly1 = sig(lin(x, w1w, b1w))
    ly2 = sig(lin(ly1, w2w, b2w) + lin(fz1, w2u, b2u))
    ly3 = sig(lin(ly2, w3w, b3w) + lin(fz2, w3u, b3u))
    ly4 = sig(lin(ly3, w4w, b4w) + lin(fz3, w4u, b4u))
    logits = lin(ly4, wow, bow) + lin(fz4, wou, bou)
    return jax.nn.softmax(logits, axis=-1)


if __name__ == "__main__":
    B, NIN, NHID, NOUT = 512, 16, 32, 8
    TILE_B = 256   # grid = (2,) batch tiles

    key = jax.random.PRNGKey(0)
    kx, kp = jax.random.split(key)
    x = jax.random.normal(kx, (B, NIN), dtype=jnp.float32)
    params = make_params(kp, NIN, NHID, NOUT)

    ref = prognet_reference(x, params)

    # f32 matmul path (tight check)
    out = jax.block_until_ready(prognet_forward(x, params, tile_b=TILE_B))
    assert out.shape == (B, NOUT)
    assert jnp.allclose(out, ref, atol=2e-4, rtol=2e-4)
    assert jnp.allclose(jnp.sum(out, axis=-1), 1.0, atol=1e-3)

    # bf16 matmul-input path (v6e/v7x MXU fast path; looser tolerance)
    out_bf16 = jax.block_until_ready(
        prognet_forward(x, params, tile_b=TILE_B, matmul_dtype=jnp.bfloat16))
    assert out_bf16.shape == (B, NOUT)
    assert jnp.allclose(out_bf16, ref, atol=1e-1)
    assert jnp.allclose(jnp.sum(out_bf16, axis=-1), 1.0, atol=1e-2)

    print("KERNEL_OK")
</pallas_src>

<mosaic_0001>
module attributes {stable_mosaic.version = 11 : i64} {
  func.func @_prognet_kernel(%arg0: i32, %arg1: memref<256x128xf32, #tpu.memory_space<vmem>>, %arg2: memref<128x128xf32, #tpu.memory_space<vmem>>, %arg3: memref<1x128xf32, #tpu.memory_space<vmem>>, %arg4: memref<128x128xf32, #tpu.memory_space<vmem>>, %arg5: memref<1x128xf32, #tpu.memory_space<vmem>>, %arg6: memref<128x128xf32, #tpu.memory_space<vmem>>, %arg7: memref<1x128xf32, #tpu.memory_space<vmem>>, %arg8: memref<128x128xf32, #tpu.memory_space<vmem>>, %arg9: memref<1x128xf32, #tpu.memory_space<vmem>>, %arg10: memref<128x128xf32, #tpu.memory_space<vmem>>, %arg11: memref<1x128xf32, #tpu.memory_space<vmem>>, %arg12: memref<256x128xf32, #tpu.memory_space<vmem>>, %arg13: memref<1x128xf32, #tpu.memory_space<vmem>>, %arg14: memref<256x128xf32, #tpu.memory_space<vmem>>, %arg15: memref<1x128xf32, #tpu.memory_space<vmem>>, %arg16: memref<256x128xf32, #tpu.memory_space<vmem>>, %arg17: memref<1x128xf32, #tpu.memory_space<vmem>>, %arg18: memref<256x128xf32, #tpu.memory_space<vmem>>, %arg19: memref<1x128xf32, #tpu.memory_space<vmem>>, %arg20: memref<256x128xf32, #tpu.memory_space<vmem>>) attributes {dimension_semantics = [#tpu.dimension_semantics<parallel>], iteration_bounds = array<i64: 2>, scalar_prefetch = 0 : i64, scratch_operands = 0 : i64, tpu.core_type = #tpu.core_type<tc>, window_params = [{transform_indices = @transform_0, window_bounds = array<i64: 256, 128>}, {pipeline_mode = #tpu.pipeline_mode<synchronous>, transform_indices = @transform_1, window_bounds = array<i64: 128, 128>}, {pipeline_mode = #tpu.pipeline_mode<synchronous>, transform_indices = @transform_2, window_bounds = array<i64: 1, 128>}, {pipeline_mode = #tpu.pipeline_mode<synchronous>, transform_indices = @transform_3, window_bounds = array<i64: 128, 128>}, {pipeline_mode = #tpu.pipeline_mode<synchronous>, transform_indices = @transform_4, window_bounds = array<i64: 1, 128>}, {pipeline_mode = #tpu.pipeline_mode<synchronous>, transform_indices = @transform_5, window_bounds = array<i64: 128, 128>}, {pipeline_mode = #tpu.pipeline_mode<synchronous>, transform_indices = @transform_6, window_bounds = array<i64: 1, 128>}, {pipeline_mode = #tpu.pipeline_mode<synchronous>, transform_indices = @transform_7, window_bounds = array<i64: 128, 128>}, {pipeline_mode = #tpu.pipeline_mode<synchronous>, transform_indices = @transform_8, window_bounds = array<i64: 1, 128>}, {pipeline_mode = #tpu.pipeline_mode<synchronous>, transform_indices = @transform_9, window_bounds = array<i64: 128, 128>}, {pipeline_mode = #tpu.pipeline_mode<synchronous>, transform_indices = @transform_10, window_bounds = array<i64: 1, 128>}, {pipeline_mode = #tpu.pipeline_mode<synchronous>, transform_indices = @transform_11, window_bounds = array<i64: 256, 128>}, {pipeline_mode = #tpu.pipeline_mode<synchronous>, transform_indices = @transform_12, window_bounds = array<i64: 1, 128>}, {pipeline_mode = #tpu.pipeline_mode<synchronous>, transform_indices = @transform_13, window_bounds = array<i64: 256, 128>}, {pipeline_mode = #tpu.pipeline_mode<synchronous>, transform_indices = @transform_14, window_bounds = array<i64: 1, 128>}, {pipeline_mode = #tpu.pipeline_mode<synchronous>, transform_indices = @transform_15, window_bounds = array<i64: 256, 128>}, {pipeline_mode = #tpu.pipeline_mode<synchronous>, transform_indices = @transform_16, window_bounds = array<i64: 1, 128>}, {pipeline_mode = #tpu.pipeline_mode<synchronous>, transform_indices = @transform_17, window_bounds = array<i64: 256, 128>}, {pipeline_mode = #tpu.pipeline_mode<synchronous>, transform_indices = @transform_18, window_bounds = array<i64: 1, 128>}, {transform_indices = @transform_19, window_bounds = array<i64: 256, 128>}]} {
    %c0 = arith.constant 0 : index
    %c0_0 = arith.constant 0 : index
    %0 = vector.load %arg1[%c0, %c0_0] : memref<256x128xf32, #tpu.memory_space<vmem>>, vector<256x128xf32>
    %c0_1 = arith.constant 0 : index
    %c0_2 = arith.constant 0 : index
    %1 = vector.load %arg2[%c0_1, %c0_2] : memref<128x128xf32, #tpu.memory_space<vmem>>, vector<128x128xf32>
    %cst = arith.constant dense<0.000000e+00> : vector<256x128xf32>
    %2 = tpu.matmul %0, %1, %cst {dimension_numbers = #tpu.dot_dimension_numbers<[1], [0], [0], [1], [0, 0, 1, 1], [], []>} : vector<256x128xf32>, vector<128x128xf32>, vector<256x128xf32> -> vector<256x128xf32>
    %c0_3 = arith.constant 0 : index
    %c0_4 = arith.constant 0 : index
    %3 = vector.load %arg3[%c0_3, %c0_4] : memref<1x128xf32, #tpu.memory_space<vmem>>, vector<1x128xf32>
    %4 = vector.broadcast %3 : vector<1x128xf32> to vector<256x128xf32>
    %5 = arith.addf %2, %4 : vector<256x128xf32>
    %cst_5 = arith.constant 5.000000e-01 : f32
    %6 = vector.broadcast %cst_5 : f32 to vector<256x128xf32>
    %7 = arith.mulf %6, %5 : vector<256x128xf32>
    %8 = math.tanh %7 : vector<256x128xf32>
    %cst_6 = arith.constant 5.000000e-01 : f32
    %9 = vector.broadcast %cst_6 : f32 to vector<256x128xf32>
    %10 = arith.mulf %9, %8 : vector<256x128xf32>
    %cst_7 = arith.constant 5.000000e-01 : f32
    %11 = vector.broadcast %cst_7 : f32 to vector<256x128xf32>
    %12 = arith.addf %10, %11 : vector<256x128xf32>
    %c0_8 = arith.constant 0 : index
    %c0_9 = arith.constant 0 : index
    %13 = vector.load %arg4[%c0_8, %c0_9] : memref<128x128xf32, #tpu.memory_space<vmem>>, vector<128x128xf32>
    %cst_10 = arith.constant dense<0.000000e+00> : vector<256x128xf32>
    %14 = tpu.matmul %12, %13, %cst_10 {dimension_numbers = #tpu.dot_dimension_numbers<[1], [0], [0], [1], [0, 0, 1, 1], [], []>} : vector<256x128xf32>, vector<128x128xf32>, vector<256x128xf32> -> vector<256x128xf32>
    %c0_11 = arith.constant 0 : index
    %c0_12 = arith.constant 0 : index
    %15 = vector.load %arg5[%c0_11, %c0_12] : memref<1x128xf32, #tpu.memory_space<vmem>>, vector<1x128xf32>
    %16 = vector.broadcast %15 : vector<1x128xf32> to vector<256x128xf32>
    %17 = arith.addf %14, %16 : vector<256x128xf32>
    %cst_13 = arith.constant 5.000000e-01 : f32
    %18 = vector.broadcast %cst_13 : f32 to vector<256x128xf32>
    %19 = arith.mulf %18, %17 : vector<256x128xf32>
    %20 = math.tanh %19 : vector<256x128xf32>
    %cst_14 = arith.constant 5.000000e-01 : f32
    %21 = vector.broadcast %cst_14 : f32 to vector<256x128xf32>
    %22 = arith.mulf %21, %20 : vector<256x128xf32>
    %cst_15 = arith.constant 5.000000e-01 : f32
    %23 = vector.broadcast %cst_15 : f32 to vector<256x128xf32>
    %24 = arith.addf %22, %23 : vector<256x128xf32>
    %c0_16 = arith.constant 0 : index
    %c0_17 = arith.constant 0 : index
    %25 = vector.load %arg6[%c0_16, %c0_17] : memref<128x128xf32, #tpu.memory_space<vmem>>, vector<128x128xf32>
    %cst_18 = arith.constant dense<0.000000e+00> : vector<256x128xf32>
    %26 = tpu.matmul %24, %25, %cst_18 {dimension_numbers = #tpu.dot_dimension_numbers<[1], [0], [0], [1], [0, 0, 1, 1], [], []>} : vector<256x128xf32>, vector<128x128xf32>, vector<256x128xf32> -> vector<256x128xf32>
    %c0_19 = arith.constant 0 : index
    %c0_20 = arith.constant 0 : index
    %27 = vector.load %arg7[%c0_19, %c0_20] : memref<1x128xf32, #tpu.memory_space<vmem>>, vector<1x128xf32>
    %28 = vector.broadcast %27 : vector<1x128xf32> to vector<256x128xf32>
    %29 = arith.addf %26, %28 : vector<256x128xf32>
    %cst_21 = arith.constant 5.000000e-01 : f32
    %30 = vector.broadcast %cst_21 : f32 to vector<256x128xf32>
    %31 = arith.mulf %30, %29 : vector<256x128xf32>
    %32 = math.tanh %31 : vector<256x128xf32>
    %cst_22 = arith.constant 5.000000e-01 : f32
    %33 = vector.broadcast %cst_22 : f32 to vector<256x128xf32>
    %34 = arith.mulf %33, %32 : vector<256x128xf32>
    %cst_23 = arith.constant 5.000000e-01 : f32
    %35 = vector.broadcast %cst_23 : f32 to vector<256x128xf32>
    %36 = arith.addf %34, %35 : vector<256x128xf32>
    %c0_24 = arith.constant 0 : index
    %c0_25 = arith.constant 0 : index
    %37 = vector.load %arg8[%c0_24, %c0_25] : memref<128x128xf32, #tpu.memory_space<vmem>>, vector<128x128xf32>
    %cst_26 = arith.constant dense<0.000000e+00> : vector<256x128xf32>
    %38 = tpu.matmul %36, %37, %cst_26 {dimension_numbers = #tpu.dot_dimension_numbers<[1], [0], [0], [1], [0, 0, 1, 1], [], []>} : vector<256x128xf32>, vector<128x128xf32>, vector<256x128xf32> -> vector<256x128xf32>
    %c0_27 = arith.constant 0 : index
    %c0_28 = arith.constant 0 : index
    %39 = vector.load %arg9[%c0_27, %c0_28] : memref<1x128xf32, #tpu.memory_space<vmem>>, vector<1x128xf32>
    %40 = vector.broadcast %39 : vector<1x128xf32> to vector<256x128xf32>
    %41 = arith.addf %38, %40 : vector<256x128xf32>
    %cst_29 = arith.constant 5.000000e-01 : f32
    %42 = vector.broadcast %cst_29 : f32 to vector<256x128xf32>
    %43 = arith.mulf %42, %41 : vector<256x128xf32>
    %44 = math.tanh %43 : vector<256x128xf32>
    %cst_30 = arith.constant 5.000000e-01 : f32
    %45 = vector.broadcast %cst_30 : f32 to vector<256x128xf32>
    %46 = arith.mulf %45, %44 : vector<256x128xf32>
    %cst_31 = arith.constant 5.000000e-01 : f32
    %47 = vector.broadcast %cst_31 : f32 to vector<256x128xf32>
    %48 = arith.addf %46, %47 : vector<256x128xf32>
    %c0_32 = arith.constant 0 : index
    %c0_33 = arith.constant 0 : index
    %49 = vector.load %arg10[%c0_32, %c0_33] : memref<128x128xf32, #tpu.memory_space<vmem>>, vector<128x128xf32>
    %cst_34 = arith.constant dense<0.000000e+00> : vector<256x128xf32>
    %50 = tpu.matmul %0, %49, %cst_34 {dimension_numbers = #tpu.dot_dimension_numbers<[1], [0], [0], [1], [0, 0, 1, 1], [], []>} : vector<256x128xf32>, vector<128x128xf32>, vector<256x128xf32> -> vector<256x128xf32>
    %c0_35 = arith.constant 0 : index
    %c0_36 = arith.constant 0 : index
    %51 = vector.load %arg11[%c0_35, %c0_36] : memref<1x128xf32, #tpu.memory_space<vmem>>, vector<1x128xf32>
    %52 = vector.broadcast %51 : vector<1x128xf32> to vector<256x128xf32>
    %53 = arith.addf %50, %52 : vector<256x128xf32>
    %cst_37 = arith.constant 5.000000e-01 : f32
    %54 = vector.broadcast %cst_37 : f32 to vector<256x128xf32>
    %55 = arith.mulf %54, %53 : vector<256x128xf32>
    %56 = math.tanh %55 : vector<256x128xf32>
    %cst_38 = arith.constant 5.000000e-01 : f32
    %57 = vector.broadcast %cst_38 : f32 to vector<256x128xf32>
    %58 = arith.mulf %57, %56 : vector<256x128xf32>
    %cst_39 = arith.constant 5.000000e-01 : f32
    %59 = vector.broadcast %cst_39 : f32 to vector<256x128xf32>
    %60 = arith.addf %58, %59 : vector<256x128xf32>
    %61 = tpu.concatenate %60, %12 in 1 : vector<256x128xf32>, vector<256x128xf32> -> vector<256x256xf32>
    %c0_40 = arith.constant 0 : index
    %c0_41 = arith.constant 0 : index
    %62 = vector.load %arg12[%c0_40, %c0_41] : memref<256x128xf32, #tpu.memory_space<vmem>>, vector<256x128xf32>
    %cst_42 = arith.constant dense<0.000000e+00> : vector<256x128xf32>
    %63 = tpu.matmul %61, %62, %cst_42 {dimension_numbers = #tpu.dot_dimension_numbers<[1], [0], [0], [1], [0, 0, 1, 1], [], []>} : vector<256x256xf32>, vector<256x128xf32>, vector<256x128xf32> -> vector<256x128xf32>
    %c0_43 = arith.constant 0 : index
    %c0_44 = arith.constant 0 : index
    %64 = vector.load %arg13[%c0_43, %c0_44] : memref<1x128xf32, #tpu.memory_space<vmem>>, vector<1x128xf32>
    %65 = vector.broadcast %64 : vector<1x128xf32> to vector<256x128xf32>
    %66 = arith.addf %63, %65 : vector<256x128xf32>
    %cst_45 = arith.constant 5.000000e-01 : f32
    %67 = vector.broadcast %cst_45 : f32 to vector<256x128xf32>
    %68 = arith.mulf %67, %66 : vector<256x128xf32>
    %69 = math.tanh %68 : vector<256x128xf32>
    %cst_46 = arith.constant 5.000000e-01 : f32
    %70 = vector.broadcast %cst_46 : f32 to vector<256x128xf32>
    %71 = arith.mulf %70, %69 : vector<256x128xf32>
    %cst_47 = arith.constant 5.000000e-01 : f32
    %72 = vector.broadcast %cst_47 : f32 to vector<256x128xf32>
    %73 = arith.addf %71, %72 : vector<256x128xf32>
    %74 = tpu.concatenate %73, %24 in 1 : vector<256x128xf32>, vector<256x128xf32> -> vector<256x256xf32>
    %c0_48 = arith.constant 0 : index
    %c0_49 = arith.constant 0 : index
    %75 = vector.load %arg14[%c0_48, %c0_49] : memref<256x128xf32, #tpu.memory_space<vmem>>, vector<256x128xf32>
    %cst_50 = arith.constant dense<0.000000e+00> : vector<256x128xf32>
    %76 = tpu.matmul %74, %75, %cst_50 {dimension_numbers = #tpu.dot_dimension_numbers<[1], [0], [0], [1], [0, 0, 1, 1], [], []>} : vector<256x256xf32>, vector<256x128xf32>, vector<256x128xf32> -> vector<256x128xf32>
    %c0_51 = arith.constant 0 : index
    %c0_52 = arith.constant 0 : index
    %77 = vector.load %arg15[%c0_51, %c0_52] : memref<1x128xf32, #tpu.memory_space<vmem>>, vector<1x128xf32>
    %78 = vector.broadcast %77 : vector<1x128xf32> to vector<256x128xf32>
    %79 = arith.addf %76, %78 : vector<256x128xf32>
    %cst_53 = arith.constant 5.000000e-01 : f32
    %80 = vector.broadcast %cst_53 : f32 to vector<256x128xf32>
    %81 = arith.mulf %80, %79 : vector<256x128xf32>
    %82 = math.tanh %81 : vector<256x128xf32>
    %cst_54 = arith.constant 5.000000e-01 : f32
    %83 = vector.broadcast %cst_54 : f32 to vector<256x128xf32>
    %84 = arith.mulf %83, %82 : vector<256x128xf32>
    %cst_55 = arith.constant 5.000000e-01 : f32
    %85 = vector.broadcast %cst_55 : f32 to vector<256x128xf32>
    %86 = arith.addf %84, %85 : vector<256x128xf32>
    %87 = tpu.concatenate %86, %36 in 1 : vector<256x128xf32>, vector<256x128xf32> -> vector<256x256xf32>
    %c0_56 = arith.constant 0 : index
    %c0_57 = arith.constant 0 : index
    %88 = vector.load %arg16[%c0_56, %c0_57] : memref<256x128xf32, #tpu.memory_space<vmem>>, vector<256x128xf32>
    %cst_58 = arith.constant dense<0.000000e+00> : vector<256x128xf32>
    %89 = tpu.matmul %87, %88, %cst_58 {dimension_numbers = #tpu.dot_dimension_numbers<[1], [0], [0], [1], [0, 0, 1, 1], [], []>} : vector<256x256xf32>, vector<256x128xf32>, vector<256x128xf32> -> vector<256x128xf32>
    %c0_59 = arith.constant 0 : index
    %c0_60 = arith.constant 0 : index
    %90 = vector.load %arg17[%c0_59, %c0_60] : memref<1x128xf32, #tpu.memory_space<vmem>>, vector<1x128xf32>
    %91 = vector.broadcast %90 : vector<1x128xf32> to vector<256x128xf32>
    %92 = arith.addf %89, %91 : vector<256x128xf32>
    %cst_61 = arith.constant 5.000000e-01 : f32
    %93 = vector.broadcast %cst_61 : f32 to vector<256x128xf32>
    %94 = arith.mulf %93, %92 : vector<256x128xf32>
    %95 = math.tanh %94 : vector<256x128xf32>
    %cst_62 = arith.constant 5.000000e-01 : f32
    %96 = vector.broadcast %cst_62 : f32 to vector<256x128xf32>
    %97 = arith.mulf %96, %95 : vector<256x128xf32>
    %cst_63 = arith.constant 5.000000e-01 : f32
    %98 = vector.broadcast %cst_63 : f32 to vector<256x128xf32>
    %99 = arith.addf %97, %98 : vector<256x128xf32>
    %100 = tpu.concatenate %99, %48 in 1 : vector<256x128xf32>, vector<256x128xf32> -> vector<256x256xf32>
    %c0_64 = arith.constant 0 : index
    %c0_65 = arith.constant 0 : index
    %101 = vector.load %arg18[%c0_64, %c0_65] : memref<256x128xf32, #tpu.memory_space<vmem>>, vector<256x128xf32>
    %cst_66 = arith.constant dense<0.000000e+00> : vector<256x128xf32>
    %102 = tpu.matmul %100, %101, %cst_66 {dimension_numbers = #tpu.dot_dimension_numbers<[1], [0], [0], [1], [0, 0, 1, 1], [], []>} : vector<256x256xf32>, vector<256x128xf32>, vector<256x128xf32> -> vector<256x128xf32>
    %c0_67 = arith.constant 0 : index
    %c0_68 = arith.constant 0 : index
    %103 = vector.load %arg19[%c0_67, %c0_68] : memref<1x128xf32, #tpu.memory_space<vmem>>, vector<1x128xf32>
    %104 = vector.broadcast %103 : vector<1x128xf32> to vector<256x128xf32>
    %105 = arith.addf %102, %104 : vector<256x128xf32>
    %106 = tpu.iota {dimensions = array<i32: 1>} : vector<256x128xi32>
    %c8_i32 = arith.constant 8 : i32
    %107 = vector.broadcast %c8_i32 : i32 to vector<256x128xi32>
    %108 = arith.cmpi slt, %106, %107 : vector<256x128xi32>
    %cst_69 = arith.constant -1.000000e+30 : f32
    %109 = vector.broadcast %cst_69 : f32 to vector<256x128xf32>
    %110 = arith.select %108, %105, %109 : vector<256x128xi1>, vector<256x128xf32>
    %cst_70 = arith.constant dense<0xFF800000> : vector<256xf32>
    %111 = vector.multi_reduction <maximumf>, %110, %cst_70 [1] : vector<256x128xf32> to vector<256xf32>
    %112 = vector.shape_cast %111 : vector<256xf32> to vector<256x1xf32>
    %113 = vector.broadcast %112 : vector<256x1xf32> to vector<256x128xf32>
    %114 = arith.subf %110, %113 : vector<256x128xf32>
    %115 = math.exp %114 : vector<256x128xf32>
    %cst_71 = arith.constant dense<0.000000e+00> : vector<256xf32>
    %116 = vector.multi_reduction <add>, %115, %cst_71 [1] : vector<256x128xf32> to vector<256xf32>
    %117 = vector.shape_cast %116 : vector<256xf32> to vector<256x1xf32>
    %118 = tpu.reciprocal %117 {approx = true} : vector<256x1xf32> -> vector<256x1xf32>
    %119 = arith.mulf %117, %118 : vector<256x1xf32>
    %cst_72 = arith.constant 2.000000e+00 : f32
    %120 = vector.broadcast %cst_72 : f32 to vector<256x1xf32>
    %121 = arith.subf %120, %119 : vector<256x1xf32>
    %122 = arith.mulf %118, %121 : vector<256x1xf32>
    %123 = vector.broadcast %122 : vector<256x1xf32> to vector<256x128xf32>
    %124 = arith.mulf %115, %123 : vector<256x128xf32>
    %c0_73 = arith.constant 0 : index
    %c0_74 = arith.constant 0 : index
    %125 = vector.load %arg20[%c0_73, %c0_74] : memref<256x128xf32, #tpu.memory_space<vmem>>, vector<256x128xf32>
    tpu.vector_store %arg20[%c0_73, %c0_74], %124 {strides = array<i32>} : memref<256x128xf32, #tpu.memory_space<vmem>>, vector<256x128xf32>,
    return
  }
  func.func @transform_0(%arg0: i32) -> (i32, i32) {
    %c0_i32 = arith.constant 0 : i32
    %c0_i32_0 = arith.constant 0 : i32
    return %arg0, %c0_i32 : i32, i32
  }
  func.func @transform_1(%arg0: i32) -> (i32, i32) {
    %c0_i32 = arith.constant 0 : i32
    %c0_i32_0 = arith.constant 0 : i32
    %c0_i32_1 = arith.constant 0 : i32
    return %c0_i32, %c0_i32_0 : i32, i32
  }
  func.func @transform_2(%arg0: i32) -> (i32, i32) {
    %c0_i32 = arith.constant 0 : i32
    %c0_i32_0 = arith.constant 0 : i32
    %c0_i32_1 = arith.constant 0 : i32
    return %c0_i32, %c0_i32_0 : i32, i32
  }
  func.func @transform_3(%arg0: i32) -> (i32, i32) {
    %c0_i32 = arith.constant 0 : i32
    %c0_i32_0 = arith.constant 0 : i32
    %c0_i32_1 = arith.constant 0 : i32
    return %c0_i32, %c0_i32_0 : i32, i32
  }
  func.func @transform_4(%arg0: i32) -> (i32, i32) {
    %c0_i32 = arith.constant 0 : i32
    %c0_i32_0 = arith.constant 0 : i32
    %c0_i32_1 = arith.constant 0 : i32
    return %c0_i32, %c0_i32_0 : i32, i32
  }
  func.func @transform_5(%arg0: i32) -> (i32, i32) {
    %c0_i32 = arith.constant 0 : i32
    %c0_i32_0 = arith.constant 0 : i32
    %c0_i32_1 = arith.constant 0 : i32
    return %c0_i32, %c0_i32_0 : i32, i32
  }
  func.func @transform_6(%arg0: i32) -> (i32, i32) {
    %c0_i32 = arith.constant 0 : i32
    %c0_i32_0 = arith.constant 0 : i32
    %c0_i32_1 = arith.constant 0 : i32
    return %c0_i32, %c0_i32_0 : i32, i32
  }
  func.func @transform_7(%arg0: i32) -> (i32, i32) {
    %c0_i32 = arith.constant 0 : i32
    %c0_i32_0 = arith.constant 0 : i32
    %c0_i32_1 = arith.constant 0 : i32
    return %c0_i32, %c0_i32_0 : i32, i32
  }
  func.func @transform_8(%arg0: i32) -> (i32, i32) {
    %c0_i32 = arith.constant 0 : i32
    %c0_i32_0 = arith.constant 0 : i32
    %c0_i32_1 = arith.constant 0 : i32
    return %c0_i32, %c0_i32_0 : i32, i32
  }
  func.func @transform_9(%arg0: i32) -> (i32, i32) {
    %c0_i32 = arith.constant 0 : i32
    %c0_i32_0 = arith.constant 0 : i32
    %c0_i32_1 = arith.constant 0 : i32
    return %c0_i32, %c0_i32_0 : i32, i32
  }
  func.func @transform_10(%arg0: i32) -> (i32, i32) {
    %c0_i32 = arith.constant 0 : i32
    %c0_i32_0 = arith.constant 0 : i32
    %c0_i32_1 = arith.constant 0 : i32
    return %c0_i32, %c0_i32_0 : i32, i32
  }
  func.func @transform_11(%arg0: i32) -> (i32, i32) {
    %c0_i32 = arith.constant 0 : i32
    %c0_i32_0 = arith.constant 0 : i32
    %c0_i32_1 = arith.constant 0 : i32
    return %c0_i32, %c0_i32_0 : i32, i32
  }
  func.func @transform_12(%arg0: i32) -> (i32, i32) {
    %c0_i32 = arith.constant 0 : i32
    %c0_i32_0 = arith.constant 0 : i32
    %c0_i32_1 = arith.constant 0 : i32
    return %c0_i32, %c0_i32_0 : i32, i32
  }
  func.func @transform_13(%arg0: i32) -> (i32, i32) {
    %c0_i32 = arith.constant 0 : i32
    %c0_i32_0 = arith.constant 0 : i32
    %c0_i32_1 = arith.constant 0 : i32
    return %c0_i32, %c0_i32_0 : i32, i32
  }
  func.func @transform_14(%arg0: i32) -> (i32, i32) {
    %c0_i32 = arith.constant 0 : i32
    %c0_i32_0 = arith.constant 0 : i32
    %c0_i32_1 = arith.constant 0 : i32
    return %c0_i32, %c0_i32_0 : i32, i32
  }
  func.func @transform_15(%arg0: i32) -> (i32, i32) {
    %c0_i32 = arith.constant 0 : i32
    %c0_i32_0 = arith.constant 0 : i32
    %c0_i32_1 = arith.constant 0 : i32
    return %c0_i32, %c0_i32_0 : i32, i32
  }
  func.func @transform_16(%arg0: i32) -> (i32, i32) {
    %c0_i32 = arith.constant 0 : i32
    %c0_i32_0 = arith.constant 0 : i32
    %c0_i32_1 = arith.constant 0 : i32
    return %c0_i32, %c0_i32_0 : i32, i32
  }
  func.func @transform_17(%arg0: i32) -> (i32, i32) {
    %c0_i32 = arith.constant 0 : i32
    %c0_i32_0 = arith.constant 0 : i32
    %c0_i32_1 = arith.constant 0 : i32
    return %c0_i32, %c0_i32_0 : i32, i32
  }
  func.func @transform_18(%arg0: i32) -> (i32, i32) {
    %c0_i32 = arith.constant 0 : i32
    %c0_i32_0 = arith.constant 0 : i32
    %c0_i32_1 = arith.constant 0 : i32
    return %c0_i32, %c0_i32_0 : i32, i32
  }
  func.func @transform_19(%arg0: i32) -> (i32, i32) {
    %c0_i32 = arith.constant 0 : i32
    %c0_i32_0 = arith.constant 0 : i32
    return %arg0, %c0_i32 : i32, i32
  }
}

</mosaic_0001>

<bundles_post_ra>
// kernel: prognet_forward.1
= control target key start
LH: loop header
LB: loop body
LE: loop exit
PB: predicated region body
PF: predicated region fallthrough
CT: control target
= control target key end

     0   :  { %s7999_s0 = inlined_call_operand.vmem [shape: f32[512,128], index: 0, kind: input, shape index: {}]   ;;  %s8000_s1 = inlined_call_operand.vmem [shape: f32[128,128], index: 1, kind: input, shape index: {}]   ;;  %s8001_s2 = inlined_call_operand.vmem [shape: f32[1,128], index: 2, kind: input, shape index: {}]   ;;  %s8002_s3 = inlined_call_operand.vmem [shape: f32[128,128], index: 3, kind: input, shape index: {}]   ;;  %s8003_s4 = inlined_call_operand.vmem [shape: f32[1,128], index: 4, kind: input, shape index: {}]   ;;  %s8004_s5 = inlined_call_operand.vmem [shape: f32[128,128], index: 5, kind: input, shape index: {}]   ;;  %s8005_s6 = inlined_call_operand.vmem [shape: f32[1,128], index: 6, kind: input, shape index: {}]   ;;  %s8006_s7 = inlined_call_operand.vmem [shape: f32[128,128], index: 7, kind: input, shape index: {}]   ;;  %s8007_s8 = inlined_call_operand.vmem [shape: f32[1,128], index: 8, kind: input, shape index: {}]   ;;  %s8008_s9 = inlined_call_operand.vmem [shape: f32[128,128], index: 9, kind: input, shape index: {}]   ;;  %s8009_s10 = inlined_call_operand.vmem [shape: f32[1,128], index: 10, kind: input, shape index: {}]   ;;  %s8010_s11 = inlined_call_operand.vmem [shape: f32[256,128], index: 11, kind: input, shape index: {}]   ;;  %s8011_s12 = inlined_call_operand.vmem [shape: f32[1,128], index: 12, kind: input, shape index: {}]   ;;  %s8012_s13 = inlined_call_operand.vmem [shape: f32[256,128], index: 13, kind: input, shape index: {}]   ;;  %s8013_s14 = inlined_call_operand.vmem [shape: f32[1,128], index: 14, kind: input, shape index: {}]   ;;  %s8014_s15 = inlined_call_operand.vmem [shape: f32[256,128], index: 15, kind: input, shape index: {}]   ;;  %s8015_s16 = inlined_call_operand.vmem [shape: f32[1,128], index: 16, kind: input, shape index: {}]   ;;  %s8016_s17 = inlined_call_operand.vmem [shape: f32[256,128], index: 17, kind: input, shape index: {}]   ;;  %s8017_s18 = inlined_call_operand.vmem [shape: f32[1,128], index: 18, kind: input, shape index: {}]   ;;  %s8018_s19 = inlined_call_operand.vmem [shape: f32[512,128], index: 19, kind: output, shape index: {}]  }
   0x1   :  { %8072 = sst [smem:[#allocation51_spill]] %s7999_s0  ;;  %s5948_s0 = smov 0  }
   0x2   :  { %8073 = sst [smem:[#allocation52_spill]] %s8000_s1 }
   0x3   :  { %8074 = sst [smem:[#allocation53_spill]] %s8001_s2 }
   0x4   :  { %8075 = sst [smem:[#allocation54_spill]] %s8002_s3 }
   0x5 LB: > { %s4465_s30 = sadd.s32 4294967295, %s5845_s0   ;;  %p4469_p0 = scmp.ge.s32.totalorder %s5845_s0, 1  ;;  %s5845_s0 = sphi %s5948_s0, %s29_s0  }
   0x6   : > { %p538_p1 = scmp.lt.s32.totalorder %s5845_s0, 3 }
   0x8   : > { %p539_p2 = pnand %p4469_p0, %p538_p1 }
   0xa   : > { %542 = sbr.rel (%p539_p2) target bundleno = 2055 (0x807), region = 96 }
   0xf   : > { %s8076_s1 = sld [smem:[#allocation52_spill]]  ;;  %s4470_s23 = sshll.u32 %s4465_s30, 5 }
  0x10   : > { %p595_p3 = scmp.lt.s32.totalorder %s4470_s23, 63  ;;  %s8077_s21 = sld [smem:[#allocation51_spill]] }
  0x11   : > { %s8078_s26 = sld [smem:[#allocation54_spill]] }
  0x12   : > { %s8180_s23 = smov (!%p595_p3, %s4470_s23), 63 }
  0x13   : > { %s4471_s27 = sshll.u32 %s8180_s23, 3 }
  0x14   : > { %s7930_s3 = scalar_lea.vmem %s8018_s19, %s4471_s27 }
  0x15   : > { %v653_v0 = vld [vmem:[%s8076_s1 + $0x78] sm:$0xff]  ;;  %v652_v1 = vld [vmem:[%s8076_s1 + $0x70] sm:$0xff]  ;;  %v651_v2 = vld [vmem:[%s8076_s1 + $0x68] sm:$0xff] }
  0x16   : > { %4725 = vmatprep.subr.mxu0 %v653_v0  ;;  %5125 = vmatprep.subr.mxu1 %v653_v0  ;;  %v650_v3 = vld [vmem:[%s8076_s1 + $0x60] sm:$0xff]  ;;  %v649_v4 = vld [vmem:[%s8076_s1 + $0x58] sm:$0xff]  ;;  %s5979_s22 = scalar_lea.vmem %s8077_s21, %s4471_s27  ;;  %v648_v6 = vld [vmem:[%s8076_s1 + $0x50] sm:$0xff]  ;;  %s8079_s21 = sld [smem:[#allocation53_spill]] }
  0x17   : > { %4726 = vmatpush3.msra.mxu0 %v653_v0  ;;  %5141 = vmatpush3.msra.mxu1 %v653_v0  ;;  %v606_v5 = vld [vmem:[%s5979_s22] sm:$0xff]  ;;  %v647_v7 = vld [vmem:[%s8076_s1 + $0x48] sm:$0xff]  ;;  %v645_v9 = vld [vmem:[%s8076_s1 + $0x38] sm:$0xff] }
  0x18   : > { %4727 = vmatprep.subr.mxu0 %v652_v1  ;;  %5126 = vmatprep.subr.mxu1 %v652_v1  ;;  %v646_v8 = vld [vmem:[%s8076_s1 + $0x40] sm:$0xff]  ;;  %v644_v10 = vld [vmem:[%s8076_s1 + $0x30] sm:$0xff]  ;;  %v643_v11 = vld [vmem:[%s8076_s1 + $0x28] sm:$0xff] }
  0x19   : > { %4728 = vmatpush3.msra.mxu0 %v652_v1  ;;  %5142 = vmatpush3.msra.mxu1 %v652_v1  ;;  %v642_v12 = vld [vmem:[%s8076_s1 + $0x20] sm:$0xff]  ;;  %v641_v13 = vld [vmem:[%s8076_s1 + $0x18] sm:$0xff]  ;;  %v640_v14 = vld [vmem:[%s8076_s1 + $0x10] sm:$0xff] }
  0x1a   : > { %4729 = vmatprep.subr.mxu0 %v651_v2  ;;  %5127 = vmatprep.subr.mxu1 %v651_v2  ;;  %v639_v15 = vld [vmem:[%s8076_s1 + $0x8] sm:$0xff]  ;;  %v638_v16 = vld [vmem:[%s8076_s1] sm:$0xff]  ;;  %v608_v18 = vld [vmem:[%s5979_s22 + $0x10] sm:$0xff] }
  0x1b   : > { %4730 = vmatpush3.msra.mxu0 %v651_v2  ;;  %5143 = vmatpush3.msra.mxu1 %v651_v2  ;;  %v607_v17 = vld [vmem:[%s5979_s22 + $0x8] sm:$0xff]  ;;  %v622_v19 = vld [vmem:[%s5979_s22 + $0x80] sm:$0xff]  ;;  %v1029_v21 = vld [vmem:[%s8078_s26 + $0x78] sm:$0xff] }
  0x1c   : > { %4731 = vmatprep.subr.mxu0 %v650_v3  ;;  %5128 = vmatprep.subr.mxu1 %v650_v3  ;;  %v623_v20 = vld [vmem:[%s5979_s22 + $0x88] sm:$0xff]  ;;  %v624_v22 = vld [vmem:[%s5979_s22 + $0x90] sm:$0xff]  ;;  %v609_v23 = vld [vmem:[%s5979_s22 + $0x18] sm:$0xff] }
  0x1d   : > { %4732 = vmatpush3.msra.mxu0 %v650_v3  ;;  %4757 = vmatprep.mubr.f32.mxu0 %v606_v5  ;;  %v1028_v24 = vld [vmem:[%s8078_s26 + $0x70] sm:$0xff]  ;;  %v610_v25 = vld [vmem:[%s5979_s22 + $0x20] sm:$0xff]  ;;  %v625_v26 = vld [vmem:[%s5979_s22 + $0x98] sm:$0xff] }
  0x1e   : > { %4733 = vmatprep.subr.mxu0 %v649_v4  ;;  %5144 = vmatpush3.msra.mxu1 %v650_v3  ;;  %v1027_v27 = vld [vmem:[%s8078_s26 + $0x68] sm:$0xff]  ;;  %v626_v28 = vld [vmem:[%s5979_s22 + $0xa0] sm:$0xff]  ;;  %v612_v31 = vld [vmem:[%s5979_s22 + $0x30] sm:$0xff] }
  0x1f   : > { %4734 = vmatpush3.msra.mxu0 %v649_v4  ;;  %5129 = vmatprep.subr.mxu1 %v649_v4  ;;  %v611_v29 = vld [vmem:[%s5979_s22 + $0x28] sm:$0xff]  ;;  %v1026_v30 = vld [vmem:[%s8078_s26 + $0x60] sm:$0xff]  ;;  %v628_v33 = vld [vmem:[%s5979_s22 + $0xb0] sm:$0xff] }
  0x20   : > { %4735 = vmatprep.subr.mxu0 %v648_v6  ;;  %5145 = vmatpush3.msra.mxu1 %v649_v4  ;;  %v627_v32 = vld [vmem:[%s5979_s22 + $0xa8] sm:$0xff]  ;;  %v613_v34 = vld [vmem:[%s5979_s22 + $0x38] sm:$0xff]  ;;  %v614_v35 = vld [vmem:[%s5979_s22 + $0x40] sm:$0xff] }
  0x21   : > { %4736 = vmatpush3.msra.mxu0 %v648_v6  ;;  %5130 = vmatprep.subr.mxu1 %v648_v6  ;;  %v629_v36 = vld [vmem:[%s5979_s22 + $0xb8] sm:$0xff]  ;;  %v630_v37 = vld [vmem:[%s5979_s22 + $0xc0] sm:$0xff]  ;;  %v615_v38 = vld [vmem:[%s5979_s22 + $0x48] sm:$0xff] }
  0x22   : > { %4737 = vmatprep.subr.mxu0 %v647_v7  ;;  %5146 = vmatpush3.msra.mxu1 %v648_v6  ;;  %v616_v39 = vld [vmem:[%s5979_s22 + $0x50] sm:$0xff]  ;;  %v631_v40 = vld [vmem:[%s5979_s22 + $0xc8] sm:$0xff]  ;;  %v617_v42 = vld [vmem:[%s5979_s22 + $0x58] sm:$0xff] }
  0x23   : > { %4738 = vmatpush3.msra.mxu0 %v647_v7  ;;  %5131 = vmatprep.subr.mxu1 %v647_v7  ;;  %v632_v41 = vld [vmem:[%s5979_s22 + $0xd0] sm:$0xff]  ;;  %v618_v43 = vld [vmem:[%s5979_s22 + $0x60] sm:$0xff]  ;;  %v633_v44 = vld [vmem:[%s5979_s22 + $0xd8] sm:$0xff] }
  0x24   : > { %4739 = vmatprep.subr.mxu0 %v646_v8  ;;  %5147 = vmatpush3.msra.mxu1 %v647_v7  ;;  %v634_v45 = vld [vmem:[%s5979_s22 + $0xe0] sm:$0xff]  ;;  %v619_v46 = vld [vmem:[%s5979_s22 + $0x68] sm:$0xff]  ;;  %v620_v47 = vld [vmem:[%s5979_s22 + $0x70] sm:$0xff] }
  0x25   : > { %4740 = vmatpush3.msra.mxu0 %v646_v8  ;;  %5132 = vmatprep.subr.mxu1 %v646_v8  ;;  %v635_v48 = vld [vmem:[%s5979_s22 + $0xe8] sm:$0xff]  ;;  %v636_v49 = vld [vmem:[%s5979_s22 + $0xf0] sm:$0xff]  ;;  %v621_v50 = vld [vmem:[%s5979_s22 + $0x78] sm:$0xff] }
  0x26   : > { %4741 = vmatprep.subr.mxu0 %v645_v9  ;;  %5148 = vmatpush3.msra.mxu1 %v646_v8  ;;  %v637_v51 = vld [vmem:[%s5979_s22 + $0xf8] sm:$0xff]  ;;  %v1024_v53 = vld [vmem:[%s8078_s26 + $0x50] sm:$0xff]  ;;  %v1023_v54 = vld [vmem:[%s8078_s26 + $0x48] sm:$0xff] }
  0x27   : > { %4742 = vmatpush3.msra.mxu0 %v645_v9  ;;  %5133 = vmatprep.subr.mxu1 %v645_v9  ;;  %v1025_v52 = vld [vmem:[%s8078_s26 + $0x58] sm:$0xff]  ;;  %v1022_v55 = vld [vmem:[%s8078_s26 + $0x40] sm:$0xff]  ;;  %v1020_v57 = vld [vmem:[%s8078_s26 + $0x30] sm:$0xff] }
  0x28   : > { %4743 = vmatprep.subr.mxu0 %v644_v10  ;;  %5149 = vmatpush3.msra.mxu1 %v645_v9  ;;  %v1021_v56 = vld [vmem:[%s8078_s26 + $0x38] sm:$0xff]  ;;  %v1019_v58 = vld [vmem:[%s8078_s26 + $0x28] sm:$0xff]  ;;  %v1018_v59 = vld [vmem:[%s8078_s26 + $0x20] sm:$0xff] }
  0x29   : > { %4744 = vmatpush3.msra.mxu0 %v644_v10  ;;  %5134 = vmatprep.subr.mxu1 %v644_v10  ;;  %v1017_v60 = vld [vmem:[%s8078_s26 + $0x18] sm:$0xff]  ;;  %v1016_v61 = vld [vmem:[%s8078_s26 + $0x10] sm:$0xff]  ;;  %v1015_v62 = vld [vmem:[%s8078_s26 + $0x8] sm:$0xff] }
  0x2a   : > { %4745 = vmatprep.subr.mxu0 %v643_v11  ;;  %5150 = vmatpush3.msra.mxu1 %v644_v10  ;;  %v1014_v63 = vld [vmem:[%s8078_s26] sm:$0xff]  ;;  %v1405_v0 = vld [vmem:[%s8004_s5 + $0x78] sm:$0xff]  ;;  %v1404_v1 = vld [vmem:[%s8004_s5 + $0x70] sm:$0xff] }
  0x2b   : > { %4746 = vmatpush3.msra.mxu0 %v643_v11  ;;  %5135 = vmatprep.subr.mxu1 %v643_v11  ;;  %v1403_v2 = vld [vmem:[%s8004_s5 + $0x68] sm:$0xff]  ;;  %v1402_v3 = vld [vmem:[%s8004_s5 + $0x60] sm:$0xff] }
  0x2c   : > { %4747 = vmatprep.subr.mxu0 %v642_v12  ;;  %5151 = vmatpush3.msra.mxu1 %v643_v11  ;;  %v6109_v4 = vld [vmem:[%s8079_s21] ss:$0 sm:$0xff] }
  0x2d   : > { %4748 = vmatpush3.msra.mxu0 %v642_v12  ;;  %5136 = vmatprep.subr.mxu1 %v642_v12 }
  0x2e   : > { %4749 = vmatprep.subr.mxu0 %v641_v13  ;;  %5152 = vmatpush3.msra.mxu1 %v642_v12 }
  0x2f   : > { %4750 = vmatpush3.msra.mxu0 %v641_v13  ;;  %5137 = vmatprep.subr.mxu1 %v641_v13 }
  0x30   : > { %4751 = vmatprep.subr.mxu0 %v640_v14  ;;  %5153 = vmatpush3.msra.mxu1 %v641_v13 }
  0x31   : > { %4752 = vmatpush3.msra.mxu0 %v640_v14  ;;  %5138 = vmatprep.subr.mxu1 %v640_v14 }
  0x32   : > { %4753 = vmatprep.subr.mxu0 %v639_v15  ;;  %5154 = vmatpush3.msra.mxu1 %v640_v14 }
  0x33   : > { %4754 = vmatpush3.msra.mxu0 %v639_v15  ;;  %5139 = vmatprep.subr.mxu1 %v639_v15 }
  0x34   : > { %4755 = vmatprep.subr.mxu0 %v638_v16  ;;  %5155 = vmatpush3.msra.mxu1 %v639_v15 }
  0x35   : > { %4756 = vmatpush3.msra.mxu0 %v638_v16  ;;  %5140 = vmatprep.subr.mxu1 %v638_v16 }
  0x36   : > { %4758 = vmatmul.mubr.f32.vlgmr.msra.gmra.mxu0 %v607_v17  ;;  %5156 = vmatpush3.msra.mxu1 %v638_v16 }
  0x37   : > { %4760 = vmatprep.mubr.f32.mxu0 %v608_v18  ;;  %4781 = vmatprep.mubr.f32.mxu1 %v622_v19 }
  0x38   : > { %4782 = vmatmul.mubr.f32.vlgmr.msra.gmra.mxu1 %v623_v20  ;;  %4805 = vmatprep.subr.mxu1 %v1029_v21 }
  0x39   : > { %4784 = vmatprep.mubr.f32.mxu1 %v624_v22  ;;  %4806 = vmatpush3.msra.mxu1 %v1029_v21 }
  0x3a   : > { %4761 = vmatmul.mubr.f32.gmra.mxu0 %v609_v23  ;;  %4807 = vmatprep.subr.mxu1 %v1028_v24 }
  0x3b   : > { %4763 = vmatprep.mubr.f32.mxu0 %v610_v25  ;;  %4808 = vmatpush3.msra.mxu1 %v1028_v24 }
  0x3c   : > { %4785 = vmatmul.mubr.f32.gmra.mxu1 %v625_v26  ;;  %4809 = vmatprep.subr.mxu1 %v1027_v27 }
  0x3d   : > { %4787 = vmatprep.mubr.f32.mxu1 %v626_v28  ;;  %4810 = vmatpush3.msra.mxu1 %v1027_v27 }
  0x3e   : > { %4764 = vmatmul.mubr.f32.gmra.mxu0 %v611_v29  ;;  %4811 = vmatprep.subr.mxu1 %v1026_v30 }
  0x3f   : > { %4766 = vmatprep.mubr.f32.mxu0 %v612_v31  ;;  %4812 = vmatpush3.msra.mxu1 %v1026_v30 }
  0x40   : > { %4788 = vmatmul.mubr.f32.gmra.mxu1 %v627_v32  ;;  %4813 = vmatprep.subr.mxu1 %v1025_v52 }
  0x41   : > { %4790 = vmatprep.mubr.f32.mxu1 %v628_v33  ;;  %4814 = vmatpush3.msra.mxu1 %v1025_v52 }
  0x42   : > { %4767 = vmatmul.mubr.f32.gmra.mxu0 %v613_v34  ;;  %4815 = vmatprep.subr.mxu1 %v1024_v53 }
  0x43   : > { %4769 = vmatprep.mubr.f32.mxu0 %v614_v35  ;;  %4816 = vmatpush3.msra.mxu1 %v1024_v53 }
  0x44   : > { %4791 = vmatmul.mubr.f32.gmra.mxu1 %v629_v36  ;;  %4817 = vmatprep.subr.mxu1 %v1023_v54 }
  0x45   : > { %4793 = vmatprep.mubr.f32.mxu1 %v630_v37  ;;  %4818 = vmatpush3.msra.mxu1 %v1023_v54 }
  0x46   : > { %4770 = vmatmul.mubr.f32.gmra.mxu0 %v615_v38  ;;  %4819 = vmatprep.subr.mxu1 %v1022_v55 }
  0x47   : > { %4772 = vmatprep.mubr.f32.mxu0 %v616_v39  ;;  %4820 = vmatpush3.msra.mxu1 %v1022_v55 }
  0x48   : > { %4794 = vmatmul.mubr.f32.gmra.mxu1 %v631_v40  ;;  %4821 = vmatprep.subr.mxu1 %v1021_v56 }
  0x49   : > { %4796 = vmatprep.mubr.f32.mxu1 %v632_v41  ;;  %4822 = vmatpush3.msra.mxu1 %v1021_v56 }
  0x4a   : > { %4773 = vmatmul.mubr.f32.gmra.mxu0 %v617_v42  ;;  %4823 = vmatprep.subr.mxu1 %v1020_v57 }
  0x4b   : > { %4775 = vmatprep.mubr.f32.mxu0 %v618_v43  ;;  %4824 = vmatpush3.msra.mxu1 %v1020_v57 }
  0x4c   : > { %4797 = vmatmul.mubr.f32.gmra.mxu1 %v633_v44  ;;  %4825 = vmatprep.subr.mxu1 %v1019_v58 }
  0x4d   : > { %4799 = vmatprep.mubr.f32.mxu1 %v634_v45  ;;  %4826 = vmatpush3.msra.mxu1 %v1019_v58 }
  0x4e   : > { %4776 = vmatmul.mubr.f32.gmra.mxu0 %v619_v46  ;;  %4827 = vmatprep.subr.mxu1 %v1018_v59 }
  0x4f   : > { %4778 = vmatprep.mubr.f32.mxu0 %v620_v47  ;;  %4828 = vmatpush3.msra.mxu1 %v1018_v59 }
  0x50   : > { %4800 = vmatmul.mubr.f32.gmra.mxu1 %v635_v48  ;;  %4829 = vmatprep.subr.mxu1 %v1017_v60 }
  0x51   : > { %4802 = vmatprep.mubr.f32.mxu1 %v636_v49  ;;  %4830 = vmatpush3.msra.mxu1 %v1017_v60 }
  0x52   : > { %4779 = vmatmul.mubr.f32.gmra.mxu0 %v621_v50  ;;  %4831 = vmatprep.subr.mxu1 %v1016_v61 }
  0x53   : > { %4832 = vmatpush3.msra.mxu1 %v1016_v61  ;;  %4885 = vmatprep.subr.mxu0 %v1405_v0 }
  0x54   : > { %4803 = vmatmul.mubr.f32.gmra.mxu1 %v637_v51  ;;  %4833 = vmatprep.subr.mxu1 %v1015_v62 }
  0x55   : > { %4834 = vmatpush3.msra.mxu1 %v1015_v62  ;;  %4886 = vmatpush3.msra.mxu0 %v1405_v0 }
  0x56   : > { %4835 = vmatprep.subr.mxu1 %v1014_v63  ;;  %4887 = vmatprep.subr.mxu0 %v1404_v1 }
  0x57   : > { %4836 = vmatpush3.msra.mxu1 %v1014_v63  ;;  %4888 = vmatpush3.msra.mxu0 %v1404_v1 }
  0x58   : > { %4889 = vmatprep.subr.mxu0 %v1403_v2 }
  0x59   : > { %4890 = vmatpush3.msra.mxu0 %v1403_v2 }
  0x5a   : > { %4891 = vmatprep.subr.mxu0 %v1402_v3 }
  0x5b   : > { %4892 = vmatpush3.msra.mxu0 %v1402_v3 }
  0xf6   : > { %v4759_v5 = vpop.f32.mrf.mxu0 }
  0xf7   : > { %v733_v6 = vadd.f32 %v4759_v5, %v6109_v4 }
  0xf8   : > { %v727_v7 = vpop.f32.mrf.mxu0  ;;  %v6112_v8 = vpop.f32.mrf.mxu1 }
  0xf9   : > { %v887_v9 = vmul.f32 0.5, %v733_v6  ;;  %v728_v10 = vadd.f32 %v6109_v4, %v727_v7  ;;  %v813_v2 = vadd.f32 %v6112_v8, %v6109_v4 }
  0xfa   : > { %v4762_v11 = vpop.f32.mrf.mxu0  ;;  %v807_v12 = vpop.f32.mrf.mxu1 }
  0xfb   : > { %5166 = vtanh.f32 %v887_v9  ;;  %v886_v13 = vmul.f32 0.5, %v728_v10  ;;  %v743_v14 = vadd.f32 %v4762_v11, %v6109_v4  ;;  %v808_v59 = vadd.f32 %v6109_v4, %v807_v12 }
  0xfc   : > { %v737_v15 = vpop.f32.mrf.mxu0  ;;  %v6116_v16 = vpop.f32.mrf.mxu1 }
  0xfd   : > { %5168 = vtanh.f32 %v886_v13  ;;  %v889_v17 = vmul.f32 0.5, %v743_v14  ;;  %v738_v18 = vadd.f32 %v6109_v4, %v737_v15  ;;  %v902_v11 = vmul.f32 0.5, %v808_v59 }
  0xfe   : > { %v4765_v19 = vpop.f32.mrf.mxu0  ;;  %v6119_v20 = vpop.f32.mrf.mxu1 }
  0xff   : > { %5170 = vtanh.f32 %v889_v17  ;;  %v888_v21 = vmul.f32 0.5, %v738_v18  ;;  %v753_v22 = vadd.f32 %v4765_v19, %v6109_v4  ;;  %v818_v13 = vadd.f32 %v6109_v4, %v6119_v20 }
 0x100   : > { %v747_v23 = vpop.f32.mrf.mxu0  ;;  %v6122_v24 = vpop.f32.mrf.mxu1 }
 0x101   : > { %5172 = vtanh.f32 %v888_v21  ;;  %v891_v25 = vmul.f32 0.5, %v753_v22  ;;  %v748_v26 = vadd.f32 %v6109_v4, %v747_v23  ;;  %v903_v21 = vmul.f32 0.5, %v813_v2 }
 0x102   : > { %v4768_v27 = vpop.f32.mrf.mxu0  ;;  %v6125_v28 = vpop.f32.mrf.mxu1  ;;  %v823_v22 = vadd.f32 %v6116_v16, %v6109_v4 }
 0x103   : > { %5174 = vtanh.f32 %v891_v25  ;;  %v890_v29 = vmul.f32 0.5, %v748_v26  ;;  %v763_v30 = vadd.f32 %v4768_v27, %v6109_v4 }
 0x104   : > { %v757_v31 = vpop.f32.mrf.mxu0  ;;  %v6128_v32 = vpop.f32.mrf.mxu1 }
 0x105   : > { %5176 = vtanh.f32 %v890_v29  ;;  %v893_v33 = vmul.f32 0.5, %v763_v30  ;;  %v758_v34 = vadd.f32 %v6109_v4, %v757_v31  ;;  %v904_v29 = vmul.f32 0.5, %v818_v13 }
 0x106   : > { %v4771_v35 = vpop.f32.mrf.mxu0  ;;  %v6132_v38 = vpop.f32.mrf.mxu1  ;;  %v828_v30 = vadd.f32 %v6109_v4, %v6125_v28 }
 0x107   : > { %5178 = vtanh.f32 %v893_v33  ;;  %v892_v36 = vmul.f32 0.5, %v758_v34  ;;  %v773_v37 = vadd.f32 %v4771_v35, %v6109_v4 }
 0x108   : > { %v5167_v39 = vpop.eup %5166  ;;  %v767_v40 = vpop.f32.mrf.mxu0  ;;  %v906_v28 = vmul.f32 0.5, %v828_v30 }
 0x109   : > { %5180 = vtanh.f32 %v892_v36  ;;  %v895_v41 = vmul.f32 0.5, %v773_v37  ;;  %v768_v42 = vadd.f32 %v6109_v4, %v767_v40  ;;  %v951_v44 = vmul.f32 0.5, %v5167_v39  ;;  %v6136_v48 = vpop.f32.mrf.mxu1 }
 0x10a   : > { %v5169_v43 = vpop.eup %5168  ;;  %v4774_v45 = vpop.f32.mrf.mxu0  ;;  %v833_v37 = vadd.f32 %v6122_v24, %v6109_v4  ;;  %v838_v40 = vadd.f32 %v6109_v4, %v6132_v38  ;;  %v843_v24 = vadd.f32 %v6128_v32, %v6109_v4 }
 0x10b   : > { %5182 = vtanh.f32 %v895_v41  ;;  %v894_v46 = vmul.f32 0.5, %v768_v42  ;;  %v783_v47 = vadd.f32 %v4774_v45, %v6109_v4  ;;  %v950_v51 = vmul.f32 0.5, %v5169_v43  ;;  %v6145_v63 = vpop.f32.mrf.mxu1 }
 0x10c   : > { %v5171_v49 = vpop.eup %5170  ;;  %v777_v50 = vpop.f32.mrf.mxu0  ;;  %v6139_v55 = vadd.f32 0.5, %v951_v44  ;;  %v905_v41 = vmul.f32 0.5, %v823_v22  ;;  %v908_v38 = vmul.f32 0.5, %v838_v40  ;;  %v909_v59 = vmul.f32 0.5, %v843_v24 }
 0x10d   : > { %5184 = vtanh.f32 %v894_v46  ;;  %v897_v52 = vmul.f32 0.5, %v783_v47  ;;  %v778_v53 = vadd.f32 %v6109_v4, %v777_v50  ;;  %v6141_v57 = vadd.f32 0.5, %v950_v51  ;;  %v6160_v17 = vpop.f32.mrf.mxu1 }
 0x10e   : > { %v5173_v54 = vpop.eup %5172  ;;  %v4777_v56 = vpop.f32.mrf.mxu0  ;;  %v953_v58 = vmul.f32 0.5, %v5171_v49  ;;  %v907_v47 = vmul.f32 0.5, %v833_v37  ;;  %v848_v51 = vadd.f32 %v6109_v4, %v6145_v63 }
 0x10f   : > { %5186 = vtanh.f32 %v897_v52  ;;  %v896_v60 = vmul.f32 0.5, %v778_v53  ;;  %v793_v61 = vadd.f32 %v4777_v56, %v6109_v4  ;;  %v952_v62 = vmul.f32 0.5, %v5173_v54  ;;  %4837 = vmatprep.mubr.f32.mxu1 %v6141_v57  ;;  %v857_v34 = vpop.f32.mrf.mxu1 }
 0x110   : > { %v5175_v0 = vpop.eup %5174  ;;  %v787_v1 = vpop.f32.mrf.mxu0  ;;  %4838 = vmatmul.mubr.f32.vlgmr.msra.gmra.mxu1 %v6139_v55  ;;  %v6154_v10 = vadd.f32 0.5, %v953_v58 }
 0x111   : > { %5188 = vtanh.f32 %v896_v60  ;;  %v899_v3 = vmul.f32 0.5, %v793_v61  ;;  %v788_v5 = vadd.f32 %v6109_v4, %v787_v1  ;;  %v6152_v6 = vadd.f32 0.5, %v952_v62  ;;  %v4801_v45 = vpop.f32.mrf.mxu1 }
 0x112   : > { %v5177_v7 = vpop.eup %5176  ;;  %v4780_v9 = vpop.f32.mrf.mxu0  ;;  %v955_v12 = vmul.f32 0.5, %v5175_v0  ;;  %v858_v60 = vadd.f32 %v6109_v4, %v857_v34  ;;  %v910_v62 = vmul.f32 0.5, %v848_v51  ;;  %v853_v0 = vadd.f32 %v6136_v48, %v6109_v4 }
 0x113   : > { %5190 = vtanh.f32 %v899_v3  ;;  %v898_v14 = vmul.f32 0.5, %v788_v5  ;;  %v803_v8 = vadd.f32 %v4780_v9, %v6109_v4  ;;  %4840 = vmatprep.mubr.f32.mxu1 %v6152_v6  ;;  %v954_v15 = vmul.f32 0.5, %v5177_v7  ;;  %v867_v56 = vpop.f32.mrf.mxu1 }
 0x114   : > { %v5179_v18 = vpop.eup %5178  ;;  %v797_v19 = vpop.f32.mrf.mxu0  ;;  %4841 = vmatmul.mubr.f32.gmra.mxu1 %v6154_v10  ;;  %v6168_v27 = vadd.f32 0.5, %v955_v12  ;;  %v863_v12 = vadd.f32 %v6160_v17, %v6109_v4  ;;  %v912_v13 = vmul.f32 0.5, %v858_v60  ;;  %v868_v48 = vadd.f32 %v6109_v4, %v867_v56 }
 0x115   : > { %5192 = vtanh.f32 %v898_v14  ;;  %v901_v23 = vmul.f32 0.5, %v803_v8  ;;  %v798_v25 = vadd.f32 %v6109_v4, %v797_v19  ;;  %v6166_v20 = vadd.f32 0.5, %v954_v15  ;;  %v4804_v5 = vpop.f32.mrf.mxu1 }
 0x116   : > { %v5181_v26 = vpop.eup %5180  ;;  %5194 = vtanh.f32 %v902_v11  ;;  %v957_v33 = vmul.f32 0.5, %v5179_v18  ;;  %v911_v18 = vmul.f32 0.5, %v853_v0 }
 0x117   : > { %5196 = vtanh.f32 %v901_v23  ;;  %v900_v31 = vmul.f32 0.5, %v798_v25  ;;  %4843 = vmatprep.mubr.f32.mxu1 %v6166_v20  ;;  %v956_v16 = vmul.f32 0.5, %v5181_v26  ;;  %v877_v23 = vpop.f32.mrf.mxu1  ;;  %v913_v25 = vmul.f32 0.5, %v863_v12 }
 0x118   : > { %v5183_v35 = vpop.eup %5182  ;;  %5198 = vtanh.f32 %v903_v21  ;;  %4844 = vmatmul.mubr.f32.gmra.mxu1 %v6168_v27  ;;  %v6181_v42 = vadd.f32 0.5, %v957_v33  ;;  %v873_v33 = vadd.f32 %v4801_v45, %v6109_v4 }
 0x119   : > { %5200 = vtanh.f32 %v900_v31  ;;  %v6174_v36 = vadd.f32 0.5, %v956_v16  ;;  %v959_v44 = vmul.f32 0.5, %v5183_v35  ;;  %v878_v31 = vadd.f32 %v6109_v4, %v877_v23 }
 0x11a   : > { %v5185_v39 = vpop.eup %5184  ;;  %5202 = vtanh.f32 %v904_v29  ;;  %v914_v29 = vmul.f32 0.5, %v868_v48 }
 0x11b   : > { %4846 = vmatprep.mubr.f32.mxu1 %v6174_v36  ;;  %v958_v43 = vmul.f32 0.5, %v5185_v39  ;;  %5204 = vtanh.f32 %v906_v28  ;;  %v6191_v52 = vadd.f32 0.5, %v959_v44  ;;  %v916_v40 = vmul.f32 0.5, %v878_v31 }
 0x11c   : > { %v5187_v46 = vpop.eup %5186  ;;  %4847 = vmatmul.mubr.f32.gmra.mxu1 %v6181_v42  ;;  %5206 = vtanh.f32 %v905_v41  ;;  %v915_v44 = vmul.f32 0.5, %v873_v33  ;;  %v1400_v33 = vld [vmem:[%s8004_s5 + $0x50] sm:$0xff] }
 0x11d   : > { %v6184_v49 = vadd.f32 0.5, %v958_v43  ;;  %v961_v54 = vmul.f32 0.5, %v5187_v46  ;;  %5208 = vtanh.f32 %v907_v47  ;;  %v883_v46 = vadd.f32 %v4804_v5, %v6109_v4 }
 0x11e   : > { %v5189_v50 = vpop.eup %5188  ;;  %5210 = vtanh.f32 %v908_v38 }
 0x11f   : > { %4849 = vmatprep.mubr.f32.mxu1 %v6184_v49  ;;  %v960_v53 = vmul.f32 0.5, %v5189_v50  ;;  %v6200_v1 = vadd.f32 0.5, %v961_v54  ;;  %5212 = vtanh.f32 %v909_v59 }
 0x120   : > { %v5191_v58 = vpop.eup %5190  ;;  %4850 = vmatmul.mubr.f32.gmra.mxu1 %v6191_v52  ;;  %5214 = vtanh.f32 %v910_v62 }
 0x121   : > { %v6194_v32 = vadd.f32 0.5, %v960_v53  ;;  %v963_v3 = vmul.f32 0.5, %v5191_v58  ;;  %5216 = vtanh.f32 %v912_v13  ;;  %v917_v53 = vmul.f32 0.5, %v883_v46  ;;  %v1392_v46 = vld [vmem:[%s8004_s5 + $0x10] sm:$0xff] }
 0x122   : > { %v5193_v61 = vpop.eup %5192  ;;  %5218 = vtanh.f32 %v911_v18 }
 0x123   : > { %v5195_v63 = vpop.eup %5194  ;;  %4852 = vmatprep.mubr.f32.mxu1 %v6194_v32  ;;  %v962_v2 = vmul.f32 0.5, %v5193_v61  ;;  %v6209_v19 = vadd.f32 0.5, %v963_v3  ;;  %5220 = vtanh.f32 %v913_v25 }
 0x124   : > { %v5197_v7 = vpop.eup %5196  ;;  %4853 = vmatmul.mubr.f32.gmra.mxu1 %v6200_v1  ;;  %v966_v8 = vmul.f32 0.5, %v5195_v63  ;;  %5222 = vtanh.f32 %v914_v29 }
 0x125   : > { %v5199_v9 = vpop.eup %5198  ;;  %v6203_v11 = vadd.f32 0.5, %v962_v2  ;;  %v965_v22 = vmul.f32 0.5, %v5197_v7  ;;  %5224 = vtanh.f32 %v916_v40  ;;  %v1396_v40 = vld [vmem:[%s8004_s5 + $0x30] sm:$0xff] }
 0x126   : > { %v5201_v14 = vpop.eup %5200  ;;  %v6214_v26 = vadd.f32 0.5, %v966_v8  ;;  %v967_v35 = vmul.f32 0.5, %v5199_v9  ;;  %5226 = vtanh.f32 %v915_v44  ;;  %v1393_v44 = vld [vmem:[%s8004_s5 + $0x18] sm:$0xff] }
 0x127   : > { %v5203_v15 = vpop.eup %5202  ;;  %4855 = vmatprep.mubr.f32.mxu1 %v6203_v11  ;;  %v964_v21 = vmul.f32 0.5, %v5201_v14  ;;  %v6219_v34 = vadd.f32 0.5, %v965_v22  ;;  %5228 = vtanh.f32 %v917_v53 }
 0x128   : > { %4856 = vmatmul.mubr.f32.gmra.mxu1 %v6209_v19  ;;  %v968_v30 = vmul.f32 0.5, %v5203_v15  ;;  %v5205_v16 = vpop.eup %5204  ;;  %v6226_v45 = vadd.f32 0.5, %v967_v35  ;;  %v1399_v35 = vld [vmem:[%s8004_s5 + $0x48] sm:$0xff] }
 0x129   : > { %v6212_v17 = vadd.f32 0.5, %v964_v21  ;;  %v5207_v37 = vpop.eup %5206  ;;  %v970_v41 = vmul.f32 0.5, %v5205_v16  ;;  %v1401_v16 = vld [vmem:[%s8004_s5 + $0x58] sm:$0xff] }
 0x12a   : > { %v5209_v39 = vpop.eup %5208  ;;  %v6223_v28 = vadd.f32 0.5, %v968_v30  ;;  %v969_v47 = vmul.f32 0.5, %v5207_v37  ;;  %4893 = vmatprep.subr.mxu0 %v1401_v16  ;;  %v1398_v37 = vld [vmem:[%s8004_s5 + $0x40] sm:$0xff] }
 0x12b   : > { %4858 = vmatprep.mubr.f32.mxu1 %v6212_v17  ;;  %v5211_v43 = vpop.eup %5210  ;;  %v6230_v50 = vadd.f32 0.5, %v970_v41  ;;  %v971_v56 = vmul.f32 0.5, %v5209_v39  ;;  %4894 = vmatpush3.msra.mxu0 %v1401_v16  ;;  %v1397_v39 = vld [vmem:[%s8004_s5 + $0x38] sm:$0xff]  ;;  %v1395_v41 = vld [vmem:[%s8004_s5 + $0x28] sm:$0xff] }
 0x12c   : > { %4859 = vmatmul.mubr.f32.gmra.mxu1 %v6219_v34  ;;  %v5213_v24 = vpop.eup %5212  ;;  %v972_v38 = vmul.f32 0.5, %v5211_v43  ;;  %v6232_v54 = vadd.f32 0.5, %v969_v47  ;;  %4895 = vmatprep.subr.mxu0 %v1400_v33  ;;  %v1394_v43 = vld [vmem:[%s8004_s5 + $0x20] sm:$0xff]  ;;  %v1391_v47 = vld [vmem:[%s8004_s5 + $0x8] sm:$0xff] }
 0x12d   : > { %4861 = vmatprep.mubr.f32.mxu1 %v6214_v26  ;;  %v5215_v51 = vpop.eup %5214  ;;  %v6238_v60 = vadd.f32 0.5, %v971_v56  ;;  %v973_v61 = vmul.f32 0.5, %v5213_v24  ;;  %4896 = vmatpush3.msra.mxu0 %v1400_v33  ;;  %v1390_v24 = vld [vmem:[%s8004_s5] sm:$0xff] }
 0x12e   : > { %v5217_v4 = vpop.eup %5216  ;;  %v6236_v58 = vadd.f32 0.5, %v972_v38  ;;  %v974_v59 = vmul.f32 0.5, %v5215_v51  ;;  %4897 = vmatprep.subr.mxu0 %v1399_v35  ;;  %v6308_v38 = vld [vmem:[%s8008_s9 + $0x78] sm:$0xff]  ;;  %v6314_v51 = vld [vmem:[%s8003_s4] ss:$0 sm:$0xff] }
 0x12f   : > { %v5219_v62 = vpop.eup %5218  ;;  %v976_v2 = vmul.f32 0.5, %v5217_v4  ;;  %v6244_v5 = vadd.f32 0.5, %v973_v61  ;;  %4898 = vmatpush3.msra.mxu0 %v1399_v35 }
 0x130   : > { %4862 = vmatmul.mubr.f32.gmra.mxu1 %v6226_v45  ;;  %v5221_v63 = vpop.eup %5220  ;;  %v6242_v0 = vadd.f32 0.5, %v974_v59  ;;  %v975_v7 = vmul.f32 0.5, %v5219_v62  ;;  %4899 = vmatprep.subr.mxu0 %v1398_v37 }
 0x131   : > { %4864 = vmatprep.mubr.f32.mxu1 %v6223_v28  ;;  %v5223_v3 = vpop.eup %5222  ;;  %v6248_v9 = vadd.f32 0.5, %v976_v2  ;;  %v977_v8 = vmul.f32 0.5, %v5221_v63  ;;  %4900 = vmatpush3.msra.mxu0 %v1398_v37 }
 0x132   : > { %v978_v12 = vmul.f32 0.5, %v5223_v3  ;;  %v5225_v13 = vpop.eup %5224  ;;  %v6250_v14 = vadd.f32 0.5, %v975_v7  ;;  %4901 = vmatprep.subr.mxu0 %v1397_v39 }
 0x133   : > { %v5227_v48 = vpop.eup %5226  ;;  %v980_v18 = vmul.f32 0.5, %v5225_v13  ;;  %v6256_v21 = vadd.f32 0.5, %v977_v8  ;;  %4902 = vmatpush3.msra.mxu0 %v1397_v39 }
 0x134   : > { %4865 = vmatmul.mubr.f32.gmra.mxu1 %v6232_v54  ;;  %v6254_v15 = vadd.f32 0.5, %v978_v12  ;;  %v979_v22 = vmul.f32 0.5, %v5227_v48  ;;  %v5229_v23 = vpop.eup %5228  ;;  %4903 = vmatprep.subr.mxu0 %v1396_v40 }
 0x135   : > { %4867 = vmatprep.mubr.f32.mxu1 %v6230_v50  ;;  %v6260_v25 = vadd.f32 0.5, %v980_v18  ;;  %v981_v30 = vmul.f32 0.5, %v5229_v23  ;;  %4904 = vmatpush3.msra.mxu0 %v1396_v40 }
 0x136   : > { %v6262_v29 = vadd.f32 0.5, %v979_v22  ;;  %4905 = vmatprep.subr.mxu0 %v1395_v41 }
 0x137   : > { %v6266_v31 = vadd.f32 0.5, %v981_v30  ;;  %4906 = vmatpush3.msra.mxu0 %v1395_v41 }
 0x138   : > { %4868 = vmatmul.mubr.f32.gmra.mxu1 %v6238_v60  ;;  %4907 = vmatprep.subr.mxu0 %v1394_v43 }
 0x139   : > { %4870 = vmatprep.mubr.f32.mxu1 %v6236_v58  ;;  %4908 = vmatpush3.msra.mxu0 %v1394_v43 }
 0x13a   : > { %4909 = vmatprep.subr.mxu0 %v1393_v44 }
 0x13b   : > { %4910 = vmatpush3.msra.mxu0 %v1393_v44 }
 0x13c   : > { %4871 = vmatmul.mubr.f32.gmra.mxu1 %v6244_v5  ;;  %4911 = vmatprep.subr.mxu0 %v1392_v46 }
 0x13d   : > { %4873 = vmatprep.mubr.f32.mxu1 %v6242_v0  ;;  %4912 = vmatpush3.msra.mxu0 %v1392_v46 }
 0x13e   : > { %4913 = vmatprep.subr.mxu0 %v1391_v47 }
 0x13f   : > { %4914 = vmatpush3.msra.mxu0 %v1391_v47 }
 0x140   : > { %4874 = vmatmul.mubr.f32.gmra.mxu1 %v6250_v14  ;;  %4915 = vmatprep.subr.mxu0 %v1390_v24 }
 0x141   : > { %4876 = vmatprep.mubr.f32.mxu1 %v6248_v9  ;;  %4916 = vmatpush3.msra.mxu0 %v1390_v24 }
 0x142   : > { %5045 = vmatprep.subr.mxu0 %v6308_v38 }
 0x144   : > { %4877 = vmatmul.mubr.f32.gmra.mxu1 %v6256_v21 }
 0x145   : > { %4879 = vmatprep.mubr.f32.mxu1 %v6254_v15 }
 0x148   : > { %4880 = vmatmul.mubr.f32.gmra.mxu1 %v6262_v29 }
 0x149   : > { %4882 = vmatprep.mubr.f32.mxu1 %v6260_v25 }
 0x14c   : > { %4883 = vmatmul.mubr.f32.gmra.mxu1 %v6266_v31 }
 0x1d0   : > { %v4839_v53 = vpop.f32.mrf.mxu1 }
 0x1d1   : > { %v1109_v56 = vadd.f32 %v4839_v53, %v6314_v51 }
 0x1d2   : > { %v1103_v4 = vpop.f32.mrf.mxu1 }
 0x1d3   : > { %v1263_v59 = vmul.f32 0.5, %v1109_v56  ;;  %v1104_v61 = vadd.f32 %v6314_v51, %v1103_v4 }
 0x1d4   : > { %v4842_v62 = vpop.f32.mrf.mxu1 }
 0x1d5   : > { %5230 = vtanh.f32 %v1263_v59  ;;  %v1262_v63 = vmul.f32 0.5, %v1104_v61  ;;  %v1119_v2 = vadd.f32 %v4842_v62, %v6314_v51 }
 0x1d6   : > { %v1113_v3 = vpop.f32.mrf.mxu1 }
 0x1d7   : > { %5232 = vtanh.f32 %v1262_v63  ;;  %v1265_v7 = vmul.f32 0.5, %v1119_v2  ;;  %v1114_v12 = vadd.f32 %v6314_v51, %v1113_v3 }
 0x1d8   : > { %v4845_v13 = vpop.f32.mrf.mxu1 }
 0x1d9   : > { %5234 = vtanh.f32 %v1265_v7  ;;  %v1264_v8 = vmul.f32 0.5, %v1114_v12  ;;  %v1129_v48 = vadd.f32 %v4845_v13, %v6314_v51 }
 0x1da   : > { %v1123_v18 = vpop.f32.mrf.mxu1 }
 0x1db   : > { %5236 = vtanh.f32 %v1264_v8  ;;  %v1267_v22 = vmul.f32 0.5, %v1129_v48  ;;  %v1124_v23 = vadd.f32 %v6314_v51, %v1123_v18 }
 0x1dc   : > { %v4848_v30 = vpop.f32.mrf.mxu1 }
 0x1dd   : > { %5238 = vtanh.f32 %v1267_v22  ;;  %v1266_v16 = vmul.f32 0.5, %v1124_v23  ;;  %v1139_v33 = vadd.f32 %v4848_v30, %v6314_v51  ;;  %v1781_v22 = vld [vmem:[%s8006_s7 + $0x78] sm:$0xff]  ;;  %v1780_v23 = vld [vmem:[%s8006_s7 + $0x70] sm:$0xff] }
 0x1de   : > { %v1133_v35 = vpop.f32.mrf.mxu1  ;;  %4965 = vmatprep.subr.mxu1 %v1781_v22 }
 0x1df   : > { %5240 = vtanh.f32 %v1266_v16  ;;  %v1269_v37 = vmul.f32 0.5, %v1139_v33  ;;  %v1134_v39 = vadd.f32 %v6314_v51, %v1133_v35  ;;  %4966 = vmatpush3.msra.mxu1 %v1781_v22 }
 0x1e0   : > { %v4851_v40 = vpop.f32.mrf.mxu1  ;;  %4967 = vmatprep.subr.mxu1 %v1780_v23 }
 0x1e1   : > { %5242 = vtanh.f32 %v1269_v37  ;;  %v1268_v41 = vmul.f32 0.5, %v1134_v39  ;;  %v1149_v43 = vadd.f32 %v4851_v40, %v6314_v51  ;;  %v2156_v39 = vld [vmem:[%s8008_s9 + $0x70] sm:$0xff]  ;;  %4968 = vmatpush3.msra.mxu1 %v1780_v23 }
 0x1e2   : > { %v5231_v44 = vpop.eup %5230  ;;  %v1143_v46 = vpop.f32.mrf.mxu1 }
 0x1e3   : > { %5244 = vtanh.f32 %v1268_v41  ;;  %v1271_v47 = vmul.f32 0.5, %v1149_v43  ;;  %v1144_v24 = vadd.f32 %v6314_v51, %v1143_v46  ;;  %v1327_v56 = vmul.f32 0.5, %v5231_v44  ;;  %v1779_v44 = vld [vmem:[%s8006_s7 + $0x68] sm:$0xff] }
 0x1e4   : > { %v5233_v53 = vpop.eup %5232  ;;  %v4854_v4 = vpop.f32.mrf.mxu1  ;;  %4969 = vmatprep.subr.mxu1 %v1779_v44 }
 0x1e5   : > { %5246 = vtanh.f32 %v1271_v47  ;;  %v1270_v59 = vmul.f32 0.5, %v1144_v24  ;;  %v1159_v61 = vadd.f32 %v4854_v4, %v6314_v51  ;;  %v1326_v2 = vmul.f32 0.5, %v5233_v53  ;;  %4970 = vmatpush3.msra.mxu1 %v1779_v44 }
 0x1e6   : > { %v5235_v62 = vpop.eup %5234  ;;  %v1153_v63 = vpop.f32.mrf.mxu1  ;;  %v6328_v13 = vadd.f32 0.5, %v1327_v56  ;;  %v2155_v56 = vld [vmem:[%s8008_s9 + $0x68] sm:$0xff] }
 0x1e7   : > { %5248 = vtanh.f32 %v1270_v59  ;;  %v1273_v3 = vmul.f32 0.5, %v1159_v61  ;;  %v1154_v7 = vadd.f32 %v6314_v51, %v1153_v63  ;;  %v6330_v48 = vadd.f32 0.5, %v1326_v2 }
 0x1e8   : > { %v5237_v12 = vpop.eup %5236  ;;  %v4857_v8 = vpop.f32.mrf.mxu1  ;;  %v1329_v18 = vmul.f32 0.5, %v5235_v62 }
 0x1e9   : > { %5250 = vtanh.f32 %v1273_v3  ;;  %v1272_v30 = vmul.f32 0.5, %v1154_v7  ;;  %v1169_v16 = vadd.f32 %v4857_v8, %v6314_v51  ;;  %v1328_v33 = vmul.f32 0.5, %v5237_v12  ;;  %4917 = vmatprep.mubr.f32.mxu0 %v6330_v48  ;;  %v1778_v12 = vld [vmem:[%s8006_s7 + $0x60] sm:$0xff] }
 0x1ea   : > { %v5239_v35 = vpop.eup %5238  ;;  %v1163_v37 = vpop.f32.mrf.mxu1  ;;  %4918 = vmatmul.mubr.f32.vlgmr.msra.gmra.mxu0 %v6328_v13  ;;  %v6351_v24 = vadd.f32 0.5, %v1329_v18  ;;  %4971 = vmatprep.subr.mxu1 %v1778_v12 }
 0x1eb   : > { %5252 = vtanh.f32 %v1272_v30  ;;  %v1275_v40 = vmul.f32 0.5, %v1169_v16  ;;  %v1164_v41 = vadd.f32 %v6314_v51, %v1163_v37  ;;  %v6345_v43 = vadd.f32 0.5, %v1328_v33  ;;  %5046 = vmatpush3.msra.mxu0 %v6308_v38  ;;  %v2154_v38 = vld [vmem:[%s8008_s9 + $0x60] sm:$0xff]  ;;  %v2153_v30 = vld [vmem:[%s8008_s9 + $0x58] sm:$0xff]  ;;  %4972 = vmatpush3.msra.mxu1 %v1778_v12 }
 0x1ec   : > { %v5241_v46 = vpop.eup %5240  ;;  %v4860_v47 = vpop.f32.mrf.mxu1  ;;  %v1331_v53 = vmul.f32 0.5, %v5239_v35  ;;  %5047 = vmatprep.subr.mxu0 %v2156_v39 }
 0x1ed   : > { %5254 = vtanh.f32 %v1275_v40  ;;  %v1274_v4 = vmul.f32 0.5, %v1164_v41  ;;  %v1179_v59 = vadd.f32 %v4860_v47, %v6314_v51  ;;  %4920 = vmatprep.mubr.f32.mxu0 %v6345_v43  ;;  %v1330_v61 = vmul.f32 0.5, %v5241_v46  ;;  %5048 = vmatpush3.msra.mxu0 %v2156_v39  ;;  %v2152_v40 = vld [vmem:[%s8008_s9 + $0x50] sm:$0xff]  ;;  %v1777_v47 = vld [vmem:[%s8006_s7 + $0x58] sm:$0xff] }
 0x1ee   : > { %v5243_v62 = vpop.eup %5242  ;;  %v1173_v63 = vpop.f32.mrf.mxu1  ;;  %4921 = vmatmul.mubr.f32.gmra.mxu0 %v6351_v24  ;;  %5049 = vmatprep.subr.mxu0 %v2155_v56  ;;  %v6368_v22 = vadd.f32 0.5, %v1331_v53 }
 0x1ef   : > { %5256 = vtanh.f32 %v1274_v4  ;;  %v1277_v2 = vmul.f32 0.5, %v1179_v59  ;;  %v1174_v3 = vadd.f32 %v6314_v51, %v1173_v63  ;;  %v6363_v7 = vadd.f32 0.5, %v1330_v61  ;;  %5050 = vmatpush3.msra.mxu0 %v2155_v56  ;;  %v2151_v61 = vld [vmem:[%s8008_s9 + $0x48] sm:$0xff]  ;;  %4973 = vmatprep.subr.mxu1 %v1777_v47 }
 0x1f0   : > { %v5245_v8 = vpop.eup %5244  ;;  %v4863_v18 = vpop.f32.mrf.mxu1  ;;  %v1333_v23 = vmul.f32 0.5, %v5243_v62  ;;  %5051 = vmatprep.subr.mxu0 %v2154_v38  ;;  %4974 = vmatpush3.msra.mxu1 %v1777_v47 }
 0x1f1   : > { %5258 = vtanh.f32 %v1277_v2  ;;  %v1276_v16 = vmul.f32 0.5, %v1174_v3  ;;  %v1189_v33 = vadd.f32 %v4863_v18, %v6314_v51  ;;  %4923 = vmatprep.mubr.f32.mxu0 %v6363_v7  ;;  %v1332_v35 = vmul.f32 0.5, %v5245_v8  ;;  %5052 = vmatpush3.msra.mxu0 %v2154_v38  ;;  %v2150_v8 = vld [vmem:[%s8008_s9 + $0x40] sm:$0xff] }
 0x1f2   : > { %v5247_v37 = vpop.eup %5246  ;;  %v1183_v39 = vpop.f32.mrf.mxu1  ;;  %4924 = vmatmul.mubr.f32.gmra.mxu0 %v6368_v22  ;;  %5053 = vmatprep.subr.mxu0 %v2153_v30  ;;  %v6385_v4 = vadd.f32 0.5, %v1333_v23 }
 0x1f3   : > { %5260 = vtanh.f32 %v1276_v16  ;;  %v1279_v41 = vmul.f32 0.5, %v1189_v33  ;;  %v1184_v44 = vadd.f32 %v6314_v51, %v1183_v39  ;;  %v6380_v46 = vadd.f32 0.5, %v1332_v35  ;;  %5054 = vmatpush3.msra.mxu0 %v2153_v30  ;;  %v1776_v30 = vld [vmem:[%s8006_s7 + $0x50] sm:$0xff]  ;;  %v2149_v39 = vld [vmem:[%s8008_s9 + $0x38] sm:$0xff] }
 0x1f4   : > { %v5249_v53 = vpop.eup %5248  ;;  %v4866_v56 = vpop.f32.mrf.mxu1  ;;  %v1335_v59 = vmul.f32 0.5, %v5247_v37  ;;  %5055 = vmatprep.subr.mxu0 %v2152_v40  ;;  %4975 = vmatprep.subr.mxu1 %v1776_v30 }
 0x1f5   : > { %5262 = vtanh.f32 %v1279_v41  ;;  %v1278_v62 = vmul.f32 0.5, %v1184_v44  ;;  %v1199_v63 = vadd.f32 %v4866_v56, %v6314_v51  ;;  %4926 = vmatprep.mubr.f32.mxu0 %v6380_v46  ;;  %v1334_v38 = vmul.f32 0.5, %v5249_v53  ;;  %5056 = vmatpush3.msra.mxu0 %v2152_v40 }
 0x1f6   : > { %v5251_v2 = vpop.eup %5250  ;;  %v1193_v3 = vpop.f32.mrf.mxu1  ;;  %4927 = vmatmul.mubr.f32.gmra.mxu0 %v6385_v4  ;;  %5057 = vmatprep.subr.mxu0 %v2151_v61  ;;  %v6402_v35 = vadd.f32 0.5, %v1335_v59  ;;  %v2148_v59 = vld [vmem:[%s8008_s9 + $0x30] sm:$0xff] }
 0x1f7   : > { %5264 = vtanh.f32 %v1278_v62  ;;  %v1281_v18 = vmul.f32 0.5, %v1199_v63  ;;  %v1194_v12 = vadd.f32 %v6314_v51, %v1193_v3  ;;  %v6397_v23 = vadd.f32 0.5, %v1334_v38  ;;  %5058 = vmatpush3.msra.mxu0 %v2151_v61  ;;  %v1775_v63 = vld [vmem:[%s8006_s7 + $0x48] sm:$0xff]  ;;  %4976 = vmatpush3.msra.mxu1 %v1776_v30 }
 0x1f8   : > { %v5253_v16 = vpop.eup %5252  ;;  %v4869_v33 = vpop.f32.mrf.mxu1  ;;  %v1337_v37 = vmul.f32 0.5, %v5251_v2  ;;  %5059 = vmatprep.subr.mxu0 %v2150_v8  ;;  %4977 = vmatprep.subr.mxu1 %v1775_v63 }
 0x1f9   : > { %5266 = vtanh.f32 %v1281_v18  ;;  %v1280_v40 = vmul.f32 0.5, %v1194_v12  ;;  %v1209_v41 = vadd.f32 %v4869_v33, %v6314_v51  ;;  %4929 = vmatprep.mubr.f32.mxu0 %v6397_v23  ;;  %v1336_v44 = vmul.f32 0.5, %v5253_v16  ;;  %5060 = vmatpush3.msra.mxu0 %v2150_v8  ;;  %v2147_v18 = vld [vmem:[%s8008_s9 + $0x28] sm:$0xff] }
 0x1fa   : > { %v5255_v53 = vpop.eup %5254  ;;  %v1203_v56 = vpop.f32.mrf.mxu1  ;;  %4930 = vmatmul.mubr.f32.gmra.mxu0 %v6402_v35  ;;  %5061 = vmatprep.subr.mxu0 %v2149_v39  ;;  %v6419_v3 = vadd.f32 0.5, %v1337_v37  ;;  %v2146_v37 = vld [vmem:[%s8008_s9 + $0x20] sm:$0xff] }
 0x1fb   : > { %5268 = vtanh.f32 %v1280_v40  ;;  %v1283_v61 = vmul.f32 0.5, %v1209_v41  ;;  %v1204_v47 = vadd.f32 %v6314_v51, %v1203_v56  ;;  %v6414_v62 = vadd.f32 0.5, %v1336_v44  ;;  %5062 = vmatpush3.msra.mxu0 %v2149_v39  ;;  %4978 = vmatpush3.msra.mxu1 %v1775_v63 }
 0x1fc   : > { %v5257_v38 = vpop.eup %5256  ;;  %v4872_v2 = vpop.f32.mrf.mxu1  ;;  %v1339_v8 = vmul.f32 0.5, %v5255_v53  ;;  %5063 = vmatprep.subr.mxu0 %v2148_v59  ;;  %v1774_v53 = vld [vmem:[%s8006_s7 + $0x40] sm:$0xff] }
 0x1fd   : > { %5270 = vtanh.f32 %v1283_v61  ;;  %v1282_v12 = vmul.f32 0.5, %v1204_v47  ;;  %v1219_v16 = vadd.f32 %v4872_v2, %v6314_v51  ;;  %4932 = vmatprep.mubr.f32.mxu0 %v6414_v62  ;;  %v1338_v33 = vmul.f32 0.5, %v5257_v38  ;;  %5064 = vmatpush3.msra.mxu0 %v2148_v59  ;;  %v2145_v38 = vld [vmem:[%s8008_s9 + $0x18] sm:$0xff] }
 0x1fe   : > { %v5259_v40 = vpop.eup %5258  ;;  %v1213_v41 = vpop.f32.mrf.mxu1  ;;  %4933 = vmatmul.mubr.f32.gmra.mxu0 %v6419_v3  ;;  %5065 = vmatprep.subr.mxu0 %v2147_v18  ;;  %v6436_v61 = vadd.f32 0.5, %v1339_v8  ;;  %v2144_v8 = vld [vmem:[%s8008_s9 + $0x10] sm:$0xff] }
 0x1ff   : > { %5272 = vtanh.f32 %v1282_v12  ;;  %v1285_v39 = vmul.f32 0.5, %v1219_v16  ;;  %v1214_v30 = vadd.f32 %v6314_v51, %v1213_v41  ;;  %v6431_v44 = vadd.f32 0.5, %v1338_v33  ;;  %5066 = vmatpush3.msra.mxu0 %v2147_v18  ;;  %4979 = vmatprep.subr.mxu1 %v1774_v53 }
 0x200   : > { %v5261_v56 = vpop.eup %5260  ;;  %v4875_v59 = vpop.f32.mrf.mxu1  ;;  %8081 = vst [vmem:[#allocation3_spill] sm:$0xff] %v6436_v61  ;;  %v1341_v47 = vmul.f32 0.5, %v5259_v40  ;;  %5067 = vmatprep.subr.mxu0 %v2146_v37  ;;  %4980 = vmatpush3.msra.mxu1 %v1774_v53 }
 0x201   : > { %8080 = vst [vmem:[#allocation2_spill] sm:$0xff] %v6431_v44  ;;  %5274 = vtanh.f32 %v1285_v39  ;;  %v1284_v2 = vmul.f32 0.5, %v1214_v30  ;;  %v1229_v12 = vadd.f32 %v4875_v59, %v6314_v51  ;;  %4935 = vmatprep.mubr.f32.mxu0 %v6431_v44  ;;  %v1340_v16 = vmul.f32 0.5, %v5261_v56  ;;  %5068 = vmatpush3.msra.mxu0 %v2146_v37  ;;  %v1773_v39 = vld [vmem:[%s8006_s7 + $0x38] sm:$0xff] }
 0x202   : > { %v5263_v33 = vpop.eup %5262  ;;  %v1223_v41 = vpop.f32.mrf.mxu1  ;;  %4936 = vmatmul.mubr.f32.gmra.mxu0 %v6436_v61  ;;  %5069 = vmatprep.subr.mxu0 %v2145_v38  ;;  %v6453_v56 = vadd.f32 0.5, %v1341_v47  ;;  %v2142_v47 = vld [vmem:[%s8008_s9] sm:$0xff] }
 0x203   : > { %5276 = vtanh.f32 %v1284_v2  ;;  %v1287_v18 = vmul.f32 0.5, %v1229_v12  ;;  %v1224_v63 = vadd.f32 %v6314_v51, %v1223_v41  ;;  %v6448_v40 = vadd.f32 0.5, %v1340_v16  ;;  %5070 = vmatpush3.msra.mxu0 %v2145_v38  ;;  %v2143_v2 = vld [vmem:[%s8008_s9 + $0x8] sm:$0xff]  ;;  %4981 = vmatprep.subr.mxu1 %v1773_v39 }
 0x204   : > { %v5265_v30 = vpop.eup %5264  ;;  %v4878_v37 = vpop.f32.mrf.mxu1  ;;  %8083 = vst [vmem:[#allocation5_spill] sm:$0xff] %v6453_v56  ;;  %v1343_v59 = vmul.f32 0.5, %v5263_v33  ;;  %5071 = vmatprep.subr.mxu0 %v2144_v8  ;;  %4982 = vmatpush3.msra.mxu1 %v1773_v39 }
 0x205   : > { %8082 = vst [vmem:[#allocation4_spill] sm:$0xff] %v6448_v40  ;;  %5278 = vtanh.f32 %v1287_v18  ;;  %v1286_v12 = vmul.f32 0.5, %v1224_v63  ;;  %v1239_v16 = vadd.f32 %v4878_v37, %v6314_v51  ;;  %4938 = vmatprep.mubr.f32.mxu0 %v6448_v40  ;;  %v1342_v41 = vmul.f32 0.5, %v5265_v30  ;;  %5072 = vmatpush3.msra.mxu0 %v2144_v8  ;;  %v1772_v18 = vld [vmem:[%s8006_s7 + $0x30] sm:$0xff] }
 0x206   : > { %v5267_v61 = vpop.eup %5266  ;;  %v1233_v44 = vpop.f32.mrf.mxu1  ;;  %4939 = vmatmul.mubr.f32.gmra.mxu0 %v6453_v56  ;;  %5073 = vmatprep.subr.mxu0 %v2143_v2  ;;  %v6470_v30 = vadd.f32 0.5, %v1343_v59 }
 0x207   : > { %5280 = vtanh.f32 %v1286_v12  ;;  %v1289_v38 = vmul.f32 0.5, %v1239_v16  ;;  %v1234_v53 = vadd.f32 %v6314_v51, %v1233_v44  ;;  %v6465_v33 = vadd.f32 0.5, %v1342_v41  ;;  %5074 = vmatpush3.msra.mxu0 %v2143_v2  ;;  %4983 = vmatprep.subr.mxu1 %v1772_v18 }
 0x208   : > { %v5269_v63 = vpop.eup %5268  ;;  %v4881_v8 = vpop.f32.mrf.mxu1  ;;  %8085 = vst [vmem:[#allocation7_spill] sm:$0xff] %v6470_v30  ;;  %v1345_v37 = vmul.f32 0.5, %v5267_v61  ;;  %5075 = vmatprep.subr.mxu0 %v2142_v47  ;;  %4984 = vmatpush3.msra.mxu1 %v1772_v18 }
 0x209   : > { %8084 = vst [vmem:[#allocation6_spill] sm:$0xff] %v6465_v33  ;;  %5282 = vtanh.f32 %v1289_v38  ;;  %v1288_v12 = vmul.f32 0.5, %v1234_v53  ;;  %v1249_v44 = vadd.f32 %v4881_v8, %v6314_v51  ;;  %4941 = vmatprep.mubr.f32.mxu0 %v6465_v33  ;;  %v1344_v16 = vmul.f32 0.5, %v5269_v63  ;;  %5076 = vmatpush3.msra.mxu0 %v2142_v47 }
 0x20a   : > { %v5271_v41 = vpop.eup %5270  ;;  %v1243_v56 = vpop.f32.mrf.mxu1  ;;  %4942 = vmatmul.mubr.f32.gmra.mxu0 %v6470_v30  ;;  %v6478_v38 = vadd.f32 0.5, %v1345_v37 }
 0x20b   : > { %5284 = vtanh.f32 %v1288_v12  ;;  %v1291_v40 = vmul.f32 0.5, %v1249_v44  ;;  %v1244_v59 = vadd.f32 %v6314_v51, %v1243_v56  ;;  %v6476_v61 = vadd.f32 0.5, %v1344_v16 }
 0x20c   : > { %v5273_v39 = vpop.eup %5272  ;;  %v4884_v2 = vpop.f32.mrf.mxu1  ;;  %8087 = vst [vmem:[#allocation9_spill] sm:$0xff] %v6478_v38  ;;  %v1347_v53 = vmul.f32 0.5, %v5271_v41 }
 0x20d   : > { %8086 = vst [vmem:[#allocation8_spill] sm:$0xff] %v6476_v61  ;;  %5286 = vtanh.f32 %v1291_v40  ;;  %v1290_v63 = vmul.f32 0.5, %v1244_v59  ;;  %v1259_v8 = vadd.f32 %v4884_v2, %v6314_v51  ;;  %4944 = vmatprep.mubr.f32.mxu0 %v6476_v61  ;;  %v1346_v47 = vmul.f32 0.5, %v5273_v39 }
 0x20e   : > { %v5275_v12 = vpop.eup %5274  ;;  %v1253_v44 = vpop.f32.mrf.mxu1  ;;  %4945 = vmatmul.mubr.f32.gmra.mxu0 %v6478_v38  ;;  %v6486_v30 = vadd.f32 0.5, %v1347_v53 }
 0x20f   : > { %5288 = vtanh.f32 %v1290_v63  ;;  %v1293_v56 = vmul.f32 0.5, %v1259_v8  ;;  %v1254_v16 = vadd.f32 %v6314_v51, %v1253_v44  ;;  %v6484_v18 = vadd.f32 0.5, %v1346_v47 }
 0x210   : > { %v5277_v37 = vpop.eup %5276  ;;  %8089 = vst [vmem:[#allocation11_spill] sm:$0xff] %v6486_v30  ;;  %v1349_v59 = vmul.f32 0.5, %v5275_v12 }
 0x211   : > { %8088 = vst [vmem:[#allocation10_spill] sm:$0xff] %v6484_v18  ;;  %5290 = vtanh.f32 %v1293_v56  ;;  %v1292_v40 = vmul.f32 0.5, %v1254_v16  ;;  %4947 = vmatprep.mubr.f32.mxu0 %v6484_v18  ;;  %v1348_v41 = vmul.f32 0.5, %v5277_v37 }
 0x212   : > { %v5279_v39 = vpop.eup %5278  ;;  %4948 = vmatmul.mubr.f32.gmra.mxu0 %v6486_v30  ;;  %v6493_v63 = vadd.f32 0.5, %v1349_v59 }
 0x213   : > { %5292 = vtanh.f32 %v1292_v40  ;;  %v6490_v2 = vadd.f32 0.5, %v1348_v41  ;;  %v1351_v53 = vmul.f32 0.5, %v5279_v39 }
 0x214   : > { %v5281_v51 = vpop.eup %5280  ;;  %8091 = vst [vmem:[#allocation13_spill] sm:$0xff] %v6493_v63 }
 0x215   : > { %8090 = vst [vmem:[#allocation12_spill] sm:$0xff] %v6490_v2  ;;  %4950 = vmatprep.mubr.f32.mxu0 %v6490_v2  ;;  %v1350_v8 = vmul.f32 0.5, %v5281_v51  ;;  %v6499_v12 = vadd.f32 0.5, %v1351_v53 }
 0x216   : > { %v5283_v47 = vpop.eup %5282  ;;  %4951 = vmatmul.mubr.f32.gmra.mxu0 %v6493_v63 }
 0x217   : > { %v6496_v44 = vadd.f32 0.5, %v1350_v8  ;;  %8093 = vst [vmem:[#allocation15_spill] sm:$0xff] %v6499_v12  ;;  %v1353_v37 = vmul.f32 0.5, %v5283_v47 }
 0x218   : > { %v5285_v56 = vpop.eup %5284 }
 0x219   : > { %8092 = vst [vmem:[#allocation14_spill] sm:$0xff] %v6496_v44  ;;  %4953 = vmatprep.mubr.f32.mxu0 %v6496_v44  ;;  %v1352_v16 = vmul.f32 0.5, %v5285_v56  ;;  %v6505_v39 = vadd.f32 0.5, %v1353_v37 }
 0x21a   : > { %v5287_v40 = vpop.eup %5286  ;;  %4954 = vmatmul.mubr.f32.gmra.mxu0 %v6499_v12 }
 0x21b   : > { %v6502_v41 = vadd.f32 0.5, %v1352_v16  ;;  %8095 = vst [vmem:[#allocation17_spill] sm:$0xff] %v6505_v39  ;;  %v1355_v8 = vmul.f32 0.5, %v5287_v40 }
 0x21c   : > { %v5289_v59 = vpop.eup %5288 }
 0x21d   : > { %8094 = vst [vmem:[#allocation16_spill] sm:$0xff] %v6502_v41  ;;  %4956 = vmatprep.mubr.f32.mxu0 %v6502_v41  ;;  %v1354_v51 = vmul.f32 0.5, %v5289_v59  ;;  %v6511_v56 = vadd.f32 0.5, %v1355_v8  ;;  %v5807_v8 = vld [vmem:[%s5979_s22 + $0x8] sm:$0xff] }
 0x21e   : > { %v5291_v63 = vpop.eup %5290  ;;  %4957 = vmatmul.mubr.f32.gmra.mxu0 %v6505_v39 }
 0x21f   : > { %v6508_v53 = vadd.f32 0.5, %v1354_v51  ;;  %8097 = vst [vmem:[#allocation19_spill] sm:$0xff] %v6511_v56  ;;  %v1357_v37 = vmul.f32 0.5, %v5291_v63  ;;  %v5806_v51 = vld [vmem:[%s5979_s22] sm:$0xff]  ;;  %v5809_v63 = vld [vmem:[%s5979_s22 + $0x18] sm:$0xff] }
 0x220   : > { %v5293_v47 = vpop.eup %5292 }
 0x221   : > { %8096 = vst [vmem:[#allocation18_spill] sm:$0xff] %v6508_v53  ;;  %4959 = vmatprep.mubr.f32.mxu0 %v6508_v53  ;;  %v1356_v16 = vmul.f32 0.5, %v5293_v47  ;;  %v6517_v59 = vadd.f32 0.5, %v1357_v37  ;;  %v5808_v47 = vld [vmem:[%s5979_s22 + $0x10] sm:$0xff] }
 0x222   : > { %4960 = vmatmul.mubr.f32.gmra.mxu0 %v6511_v56  ;;  %v5811_v56 = vld [vmem:[%s5979_s22 + $0x28] sm:$0xff]  ;;  %v5812_v37 = vld [vmem:[%s5979_s22 + $0x30] sm:$0xff] }
 0x223   : > { %v6514_v40 = vadd.f32 0.5, %v1356_v16  ;;  %8099 = vst [vmem:[#allocation21_spill] sm:$0xff] %v6517_v59  ;;  %v5810_v16 = vld [vmem:[%s5979_s22 + $0x20] sm:$0xff]  ;;  %v5836_v53 = vld [vmem:[%s5979_s22 + $0xf0] sm:$0xff] }
 0x225   : > { %8098 = vst [vmem:[#allocation20_spill] sm:$0xff] %v6514_v40  ;;  %4962 = vmatprep.mubr.f32.mxu0 %v6514_v40  ;;  %v5813_v40 = vld [vmem:[%s5979_s22 + $0x38] sm:$0xff] }
 0x226   : > { %4963 = vmatmul.mubr.f32.gmra.mxu0 %v6517_v59  ;;  %v5814_v59 = vld [vmem:[%s5979_s22 + $0x40] sm:$0xff] }
 0x227   : > { %5077 = vmatprep.mubr.f32.mxu0 %v5806_v51  ;;  %v1771_v51 = vld [vmem:[%s8006_s7 + $0x28] sm:$0xff] }
 0x228   : > { %4985 = vmatprep.subr.mxu1 %v1771_v51 }
 0x229   : > { %4986 = vmatpush3.msra.mxu1 %v1771_v51  ;;  %v1766_v51 = vld [vmem:[%s8006_s7] sm:$0xff] }
 0x22a   : > { %5078 = vmatmul.mubr.f32.vlgmr.msra.gmra.mxu0 %v5807_v8  ;;  %v1770_v8 = vld [vmem:[%s8006_s7 + $0x20] sm:$0xff] }
 0x22b   : > { %5080 = vmatprep.mubr.f32.mxu0 %v5808_v47  ;;  %v5815_v47 = vld [vmem:[%s5979_s22 + $0x48] sm:$0xff]  ;;  %4987 = vmatprep.subr.mxu1 %v1770_v8 }
 0x22c   : > { %4988 = vmatpush3.msra.mxu1 %v1770_v8  ;;  %v5819_v8 = vld [vmem:[%s5979_s22 + $0x68] sm:$0xff] }
 0x22e   : > { %5081 = vmatmul.mubr.f32.gmra.mxu0 %v5809_v63  ;;  %v5817_v63 = vld [vmem:[%s5979_s22 + $0x58] sm:$0xff] }
 0x22f   : > { %5083 = vmatprep.mubr.f32.mxu0 %v5810_v16  ;;  %v5818_v16 = vld [vmem:[%s5979_s22 + $0x60] sm:$0xff] }
 0x232   : > { %5084 = vmatmul.mubr.f32.gmra.mxu0 %v5811_v56  ;;  %v5816_v56 = vld [vmem:[%s5979_s22 + $0x50] sm:$0xff] }
 0x233   : > { %5086 = vmatprep.mubr.f32.mxu0 %v5812_v37  ;;  %v1767_v37 = vld [vmem:[%s8006_s7 + $0x8] sm:$0xff] }
 0x236   : > { %5087 = vmatmul.mubr.f32.gmra.mxu0 %v5813_v40  ;;  %v1769_v40 = vld [vmem:[%s8006_s7 + $0x18] sm:$0xff] }
 0x237   : > { %5089 = vmatprep.mubr.f32.mxu0 %v5814_v59  ;;  %4989 = vmatprep.subr.mxu1 %v1769_v40  ;;  %v1768_v59 = vld [vmem:[%s8006_s7 + $0x10] sm:$0xff] }
 0x238   : > { %4990 = vmatpush3.msra.mxu1 %v1769_v40  ;;  %v5821_v40 = vld [vmem:[%s5979_s22 + $0x78] sm:$0xff] }
 0x239   : > { %4991 = vmatprep.subr.mxu1 %v1768_v59 }
 0x23a   : > { %5090 = vmatmul.mubr.f32.gmra.mxu0 %v5815_v47  ;;  %4992 = vmatpush3.msra.mxu1 %v1768_v59  ;;  %v5820_v47 = vld [vmem:[%s5979_s22 + $0x70] sm:$0xff]  ;;  %v5822_v59 = vld [vmem:[%s5979_s22 + $0x80] sm:$0xff] }
 0x23b   : > { %5092 = vmatprep.mubr.f32.mxu0 %v5816_v56  ;;  %4993 = vmatprep.subr.mxu1 %v1767_v37  ;;  %v8030_v56 = vmov 0.0  }
 0x23c   : > { %4994 = vmatpush3.msra.mxu1 %v1767_v37  ;;  %2949 = vmatprep.subr.mxu0 %v8030_v56  ;;  %v5825_v37 = vld [vmem:[%s5979_s22 + $0x98] sm:$0xff] }
 0x23d   : > { %4995 = vmatprep.subr.mxu1 %v1766_v51 }
 0x23e   : > { %5093 = vmatmul.mubr.f32.gmra.mxu0 %v5817_v63  ;;  %4996 = vmatpush3.msra.mxu1 %v1766_v51  ;;  %v5823_v63 = vld [vmem:[%s5979_s22 + $0x88] sm:$0xff]  ;;  %v5826_v51 = vld [vmem:[%s5979_s22 + $0xa0] sm:$0xff] }
 0x23f   : > { %5095 = vmatprep.mubr.f32.mxu0 %v5818_v16  ;;  %2557 = vmatprep.subr.mxu1 %v8030_v56  ;;  %v5824_v16 = vld [vmem:[%s5979_s22 + $0x90] sm:$0xff]  ;;  %v5833_v56 = vld [vmem:[%s5979_s22 + $0xd8] sm:$0xff] }
 0x242   : > { %5096 = vmatmul.mubr.f32.gmra.mxu0 %v5819_v8  ;;  %v5827_v8 = vld [vmem:[%s5979_s22 + $0xa8] sm:$0xff] }
 0x243   : > { %5098 = vmatprep.mubr.f32.mxu0 %v5820_v47  ;;  %v5828_v47 = vld [vmem:[%s5979_s22 + $0xb0] sm:$0xff] }
 0x246   : > { %5099 = vmatmul.mubr.f32.gmra.mxu0 %v5821_v40  ;;  %v5829_v40 = vld [vmem:[%s5979_s22 + $0xb8] sm:$0xff] }
 0x247   : > { %5101 = vmatprep.mubr.f32.mxu0 %v5822_v59  ;;  %v5830_v59 = vld [vmem:[%s5979_s22 + $0xc0] sm:$0xff] }
 0x24a   : > { %5102 = vmatmul.mubr.f32.gmra.mxu0 %v5823_v63  ;;  %v5831_v63 = vld [vmem:[%s5979_s22 + $0xc8] sm:$0xff] }
 0x24b   : > { %5104 = vmatprep.mubr.f32.mxu0 %v5824_v16  ;;  %v5832_v16 = vld [vmem:[%s5979_s22 + $0xd0] sm:$0xff] }
 0x24e   : > { %5105 = vmatmul.mubr.f32.gmra.mxu0 %v5825_v37  ;;  %v5834_v37 = vld [vmem:[%s5979_s22 + $0xe0] sm:$0xff] }
 0x24f   : > { %5107 = vmatprep.mubr.f32.mxu0 %v5826_v51  ;;  %v5835_v51 = vld [vmem:[%s5979_s22 + $0xe8] sm:$0xff] }
 0x252   : > { %5108 = vmatmul.mubr.f32.gmra.mxu0 %v5827_v8  ;;  %v5837_v8 = vld [vmem:[%s5979_s22 + $0xf8] sm:$0xff] }
 0x253   : > { %5110 = vmatprep.mubr.f32.mxu0 %v5828_v47  ;;  %v6576_v47 = vld [vmem:[%s8005_s6] ss:$0 sm:$0xff] }
 0x256   : > { %5111 = vmatmul.mubr.f32.gmra.mxu0 %v5829_v40 }
 0x257   : > { %5113 = vmatprep.mubr.f32.mxu0 %v5830_v59 }
 0x25a   : > { %5114 = vmatmul.mubr.f32.gmra.mxu0 %v5831_v63 }
 0x25b   : > { %5116 = vmatprep.mubr.f32.mxu0 %v5832_v16 }
 0x25e   : > { %5117 = vmatmul.mubr.f32.gmra.mxu0 %v5833_v56 }
 0x25f   : > { %5119 = vmatprep.mubr.f32.mxu0 %v5834_v37 }
 0x262   : > { %5120 = vmatmul.mubr.f32.gmra.mxu0 %v5835_v51 }
 0x263   : > { %5122 = vmatprep.mubr.f32.mxu0 %v5836_v53 }
 0x266   : > { %5123 = vmatmul.mubr.f32.gmra.mxu0 %v5837_v8 }
 0x267   : > { %3013 = vmatprep.mubr.f32.mxu0 %v6330_v48 }
 0x2aa   : > { %v4919_v40 = vpop.f32.mrf.mxu0 }
 0x2ab   : > { %v1485_v59 = vadd.f32 %v4919_v40, %v6576_v47 }
 0x2ac   : > { %v1479_v63 = vpop.f32.mrf.mxu0 }
 0x2ad   : > { %v1639_v56 = vmul.f32 0.5, %v1485_v59  ;;  %v1480_v16 = vadd.f32 %v6576_v47, %v1479_v63 }
 0x2ae   : > { %v4922_v37 = vpop.f32.mrf.mxu0 }
 0x2af   : > { %5294 = vtanh.f32 %v1639_v56  ;;  %v1638_v51 = vmul.f32 0.5, %v1480_v16  ;;  %v1495_v53 = vadd.f32 %v4922_v37, %v6576_v47 }
 0x2b0   : > { %v1489_v8 = vpop.f32.mrf.mxu0 }
 0x2b1   : > { %5296 = vtanh.f32 %v1638_v51  ;;  %v1641_v48 = vmul.f32 0.5, %v1495_v53  ;;  %v1490_v39 = vadd.f32 %v6576_v47, %v1489_v8 }
 0x2b2   : > { %v4925_v41 = vpop.f32.mrf.mxu0 }
 0x2b3   : > { %5298 = vtanh.f32 %v1641_v48  ;;  %v1640_v12 = vmul.f32 0.5, %v1490_v39  ;;  %v1505_v44 = vadd.f32 %v4925_v41, %v6576_v47 }
 0x2b4   : > { %v1499_v40 = vpop.f32.mrf.mxu0 }
 0x2b5   : > { %5300 = vtanh.f32 %v1640_v12  ;;  %v1643_v59 = vmul.f32 0.5, %v1505_v44  ;;  %v1500_v63 = vadd.f32 %v6576_v47, %v1499_v40 }
 0x2b6   : > { %v4928_v2 = vpop.f32.mrf.mxu0 }
 0x2b7   : > { %5302 = vtanh.f32 %v1643_v59  ;;  %v1642_v56 = vmul.f32 0.5, %v1500_v63  ;;  %v1515_v16 = vadd.f32 %v4928_v2, %v6576_v47 }
 0x2b8   : > { %v1509_v37 = vpop.f32.mrf.mxu0 }
 0x2b9   : > { %5304 = vtanh.f32 %v1642_v56  ;;  %v1645_v51 = vmul.f32 0.5, %v1515_v16  ;;  %v1510_v53 = vadd.f32 %v6576_v47, %v1509_v37 }
 0x2ba   : > { %v4931_v8 = vpop.f32.mrf.mxu0 }
 0x2bb   : > { %5306 = vtanh.f32 %v1645_v51  ;;  %v1644_v39 = vmul.f32 0.5, %v1510_v53  ;;  %v1525_v41 = vadd.f32 %v4931_v8, %v6576_v47 }
 0x2bc   : > { %v5295_v48 = vpop.eup %5294  ;;  %v1519_v12 = vpop.f32.mrf.mxu0 }
 0x2bd   : > { %5308 = vtanh.f32 %v1644_v39  ;;  %v1647_v44 = vmul.f32 0.5, %v1525_v41  ;;  %v1520_v40 = vadd.f32 %v6576_v47, %v1519_v12  ;;  %v1703_v63 = vmul.f32 0.5, %v5295_v48 }
 0x2be   : > { %v5297_v59 = vpop.eup %5296  ;;  %v4934_v30 = vpop.f32.mrf.mxu0 }
 0x2bf   : > { %5310 = vtanh.f32 %v1647_v44  ;;  %v1646_v2 = vmul.f32 0.5, %v1520_v40  ;;  %v1535_v56 = vadd.f32 %v4934_v30, %v6576_v47  ;;  %v1702_v18 = vmul.f32 0.5, %v5297_v59  ;;  %v2533_v30 = vld [vmem:[%s8010_s11 + $0x78] sm:$0xff] }
 0x2c0   : > { %v5299_v16 = vpop.eup %5298  ;;  %v1529_v37 = vpop.f32.mrf.mxu0  ;;  %v6590_v38 = vadd.f32 0.5, %v1703_v63 }
 0x2c1   : > { %5312 = vtanh.f32 %v1646_v2  ;;  %v1649_v51 = vmul.f32 0.5, %v1535_v56  ;;  %v1530_v53 = vadd.f32 %v6576_v47, %v1529_v37  ;;  %v6592_v41 = vadd.f32 0.5, %v1702_v18  ;;  %v2532_v18 = vld [vmem:[%s8010_s11 + $0x70] sm:$0xff] }
 0x2c2   : > { %v5301_v8 = vpop.eup %5300  ;;  %8100 = vst [vmem:[#allocation22_spill] sm:$0xff] %v6590_v38  ;;  %v4937_v39 = vpop.f32.mrf.mxu0  ;;  %v1705_v12 = vmul.f32 0.5, %v5299_v16 }
 0x2c3   : > { %5314 = vtanh.f32 %v1649_v51  ;;  %v1648_v48 = vmul.f32 0.5, %v1530_v53  ;;  %v1545_v44 = vadd.f32 %v4937_v39, %v6576_v47  ;;  %v1704_v40 = vmul.f32 0.5, %v5301_v8  ;;  %4997 = vmatprep.mubr.f32.mxu1 %v6592_v41 }
 0x2c4   : > { %v5303_v59 = vpop.eup %5302  ;;  %v1539_v2 = vpop.f32.mrf.mxu0  ;;  %4998 = vmatmul.mubr.f32.vlgmr.msra.gmra.mxu1 %v6590_v38  ;;  %v6606_v53 = vadd.f32 0.5, %v1705_v12 }
 0x2c5   : > { %5316 = vtanh.f32 %v1648_v48  ;;  %v1651_v63 = vmul.f32 0.5, %v1545_v44  ;;  %v1540_v56 = vadd.f32 %v6576_v47, %v1539_v2  ;;  %v6604_v16 = vadd.f32 0.5, %v1704_v40  ;;  %2558 = vmatpush1.msra.mxu1 %v2533_v30  ;;  %v2531_v2 = vld [vmem:[%s8010_s11 + $0x68] sm:$0xff] }
 0x2c6   : > { %v5305_v37 = vpop.eup %5304  ;;  %v4940_v51 = vpop.f32.mrf.mxu0  ;;  %8102 = vst [vmem:[#allocation24_spill] sm:$0xff] %v6606_v53  ;;  %v1707_v8 = vmul.f32 0.5, %v5303_v59  ;;  %v8103_v48 = vmov 0.0  }
 0x2c7   : > { %8101 = vst [vmem:[#allocation23_spill] sm:$0xff] %v6604_v16  ;;  %5318 = vtanh.f32 %v1651_v63  ;;  %v1650_v39 = vmul.f32 0.5, %v1540_v56  ;;  %2559 = vmatprep.subr.mxu1 %v8103_v48  ;;  %v1555_v44 = vadd.f32 %v4940_v51, %v6576_v47  ;;  %5000 = vmatprep.mubr.f32.mxu1 %v6604_v16  ;;  %v1706_v40 = vmul.f32 0.5, %v5305_v37  ;;  %v2530_v63 = vld [vmem:[%s8010_s11 + $0x60] sm:$0xff] }
 0x2c8   : > { %v5307_v38 = vpop.eup %5306  ;;  %2560 = vmatpush1.msra.mxu1 %v2532_v18  ;;  %v1549_v30 = vpop.f32.mrf.mxu0  ;;  %v6622_v16 = vadd.f32 0.5, %v1707_v8 }
 0x2c9   : > { %5320 = vtanh.f32 %v1650_v39  ;;  %v1653_v12 = vmul.f32 0.5, %v1555_v44  ;;  %2561 = vmatprep.subr.mxu1 %v8103_v48  ;;  %v1550_v59 = vadd.f32 %v6576_v47, %v1549_v30  ;;  %5001 = vmatmul.mubr.f32.gmra.mxu1 %v6606_v53  ;;  %v6620_v56 = vadd.f32 0.5, %v1706_v40  ;;  %v2529_v30 = vld [vmem:[%s8010_s11 + $0x58] sm:$0xff] }
 0x2ca   : > { %v5309_v51 = vpop.eup %5308  ;;  %2562 = vmatpush1.msra.mxu1 %v2531_v2  ;;  %v4943_v37 = vpop.f32.mrf.mxu0  ;;  %8105 = vst [vmem:[#allocation26_spill] sm:$0xff] %v6622_v16  ;;  %v1709_v18 = vmul.f32 0.5, %v5307_v38 }
 0x2cb   : > { %8104 = vst [vmem:[#allocation25_spill] sm:$0xff] %v6620_v56  ;;  %5322 = vtanh.f32 %v1653_v12  ;;  %v1652_v39 = vmul.f32 0.5, %v1550_v59  ;;  %2563 = vmatprep.subr.mxu1 %v8103_v48  ;;  %v1565_v44 = vadd.f32 %v4943_v37, %v6576_v47  ;;  %5003 = vmatprep.mubr.f32.mxu1 %v6620_v56  ;;  %v1708_v40 = vmul.f32 0.5, %v5309_v51  ;;  %v2528_v12 = vld [vmem:[%s8010_s11 + $0x50] sm:$0xff] }
 0x2cc   : > { %v5311_v53 = vpop.eup %5310  ;;  %2564 = vmatpush1.msra.mxu1 %v2530_v63  ;;  %v1559_v2 = vpop.f32.mrf.mxu0  ;;  %v6638_v56 = vadd.f32 0.5, %v1709_v18 }
 0x2cd   : > { %5324 = vtanh.f32 %v1652_v39  ;;  %v1655_v8 = vmul.f32 0.5, %v1565_v44  ;;  %2565 = vmatprep.subr.mxu1 %v8103_v48  ;;  %v1560_v38 = vadd.f32 %v6576_v47, %v1559_v2  ;;  %5004 = vmatmul.mubr.f32.gmra.mxu1 %v6622_v16  ;;  %v6636_v59 = vadd.f32 0.5, %v1708_v40  ;;  %v2527_v2 = vld [vmem:[%s8010_s11 + $0x48] sm:$0xff] }
 0x2ce   : > { %v5313_v37 = vpop.eup %5312  ;;  %2566 = vmatpush1.msra.mxu1 %v2529_v30  ;;  %v4946_v51 = vpop.f32.mrf.mxu0  ;;  %8107 = vst [vmem:[#allocation28_spill] sm:$0xff] %v6638_v56  ;;  %v1711_v63 = vmul.f32 0.5, %v5311_v53 }
 0x2cf   : > { %8106 = vst [vmem:[#allocation27_spill] sm:$0xff] %v6636_v59  ;;  %5326 = vtanh.f32 %v1655_v8  ;;  %v1654_v39 = vmul.f32 0.5, %v1560_v38  ;;  %2567 = vmatprep.subr.mxu1 %v8103_v48  ;;  %v1575_v44 = vadd.f32 %v4946_v51, %v6576_v47  ;;  %5006 = vmatprep.mubr.f32.mxu1 %v6636_v59  ;;  %v1710_v40 = vmul.f32 0.5, %v5313_v37  ;;  %v2526_v8 = vld [vmem:[%s8010_s11 + $0x40] sm:$0xff] }
 0x2d0   : > { %v5315_v16 = vpop.eup %5314  ;;  %2568 = vmatpush1.msra.mxu1 %v2528_v12  ;;  %v1569_v30 = vpop.f32.mrf.mxu0  ;;  %v6654_v59 = vadd.f32 0.5, %v1711_v63 }
 0x2d1   : > { %5328 = vtanh.f32 %v1654_v39  ;;  %v1657_v18 = vmul.f32 0.5, %v1575_v44  ;;  %2569 = vmatprep.subr.mxu1 %v8103_v48  ;;  %v1570_v53 = vadd.f32 %v6576_v47, %v1569_v30  ;;  %5007 = vmatmul.mubr.f32.gmra.mxu1 %v6638_v56  ;;  %v6652_v38 = vadd.f32 0.5, %v1710_v40  ;;  %v2525_v30 = vld [vmem:[%s8010_s11 + $0x38] sm:$0xff] }
 0x2d2   : > { %v5317_v51 = vpop.eup %5316  ;;  %2570 = vmatpush1.msra.mxu1 %v2527_v2  ;;  %v4949_v37 = vpop.f32.mrf.mxu0  ;;  %8109 = vst [vmem:[#allocation30_spill] sm:$0xff] %v6654_v59  ;;  %v1713_v12 = vmul.f32 0.5, %v5315_v16 }
 0x2d3   : > { %8108 = vst [vmem:[#allocation29_spill] sm:$0xff] %v6652_v38  ;;  %5330 = vtanh.f32 %v1657_v18  ;;  %v1656_v39 = vmul.f32 0.5, %v1570_v53  ;;  %2571 = vmatprep.subr.mxu1 %v8103_v48  ;;  %v1585_v44 = vadd.f32 %v4949_v37, %v6576_v47  ;;  %5009 = vmatprep.mubr.f32.mxu1 %v6652_v38  ;;  %v1712_v40 = vmul.f32 0.5, %v5317_v51  ;;  %v2524_v18 = vld [vmem:[%s8010_s11 + $0x30] sm:$0xff] }
 0x2d4   : > { %v5319_v56 = vpop.eup %5318  ;;  %2572 = vmatpush1.msra.mxu1 %v2526_v8  ;;  %v1579_v2 = vpop.f32.mrf.mxu0  ;;  %v6670_v38 = vadd.f32 0.5, %v1713_v12 }
 0x2d5   : > { %5332 = vtanh.f32 %v1656_v39  ;;  %v1659_v63 = vmul.f32 0.5, %v1585_v44  ;;  %2573 = vmatprep.subr.mxu1 %v8103_v48  ;;  %v1580_v16 = vadd.f32 %v6576_v47, %v1579_v2  ;;  %5010 = vmatmul.mubr.f32.gmra.mxu1 %v6654_v59  ;;  %v6668_v53 = vadd.f32 0.5, %v1712_v40  ;;  %v2523_v2 = vld [vmem:[%s8010_s11 + $0x28] sm:$0xff] }
 0x2d6   : > { %v5321_v37 = vpop.eup %5320  ;;  %2574 = vmatpush1.msra.mxu1 %v2525_v30  ;;  %v4952_v51 = vpop.f32.mrf.mxu0  ;;  %8111 = vst [vmem:[#allocation32_spill] sm:$0xff] %v6670_v38  ;;  %v1715_v8 = vmul.f32 0.5, %v5319_v56 }
 0x2d7   : > { %8110 = vst [vmem:[#allocation31_spill] sm:$0xff] %v6668_v53  ;;  %5334 = vtanh.f32 %v1659_v63  ;;  %v1658_v39 = vmul.f32 0.5, %v1580_v16  ;;  %2575 = vmatprep.subr.mxu1 %v8103_v48  ;;  %v1595_v44 = vadd.f32 %v4952_v51, %v6576_v47  ;;  %5012 = vmatprep.mubr.f32.mxu1 %v6668_v53  ;;  %v1714_v40 = vmul.f32 0.5, %v5321_v37  ;;  %v2522_v63 = vld [vmem:[%s8010_s11 + $0x20] sm:$0xff] }
 0x2d8   : > { %v5323_v59 = vpop.eup %5322  ;;  %2576 = vmatpush1.msra.mxu1 %v2524_v18  ;;  %v1589_v30 = vpop.f32.mrf.mxu0  ;;  %v6686_v53 = vadd.f32 0.5, %v1715_v8 }
 0x2d9   : > { %5336 = vtanh.f32 %v1658_v39  ;;  %v1661_v12 = vmul.f32 0.5, %v1595_v44  ;;  %2577 = vmatprep.subr.mxu1 %v8103_v48  ;;  %v1590_v56 = vadd.f32 %v6576_v47, %v1589_v30  ;;  %5013 = vmatmul.mubr.f32.gmra.mxu1 %v6670_v38  ;;  %v6684_v16 = vadd.f32 0.5, %v1714_v40  ;;  %v2521_v30 = vld [vmem:[%s8010_s11 + $0x18] sm:$0xff] }
 0x2da   : > { %v5325_v51 = vpop.eup %5324  ;;  %2578 = vmatpush1.msra.mxu1 %v2523_v2  ;;  %v4955_v37 = vpop.f32.mrf.mxu0  ;;  %8113 = vst [vmem:[#allocation34_spill] sm:$0xff] %v6686_v53  ;;  %v1717_v18 = vmul.f32 0.5, %v5323_v59 }
 0x2db   : > { %8112 = vst [vmem:[#allocation33_spill] sm:$0xff] %v6684_v16  ;;  %5338 = vtanh.f32 %v1661_v12  ;;  %v1660_v39 = vmul.f32 0.5, %v1590_v56  ;;  %2579 = vmatprep.subr.mxu1 %v8103_v48  ;;  %v1605_v44 = vadd.f32 %v4955_v37, %v6576_v47  ;;  %5015 = vmatprep.mubr.f32.mxu1 %v6684_v16  ;;  %v1716_v40 = vmul.f32 0.5, %v5325_v51  ;;  %v2520_v12 = vld [vmem:[%s8010_s11 + $0x10] sm:$0xff] }
 0x2dc   : > { %v5327_v38 = vpop.eup %5326  ;;  %2580 = vmatpush1.msra.mxu1 %v2522_v63  ;;  %v1599_v2 = vpop.f32.mrf.mxu0  ;;  %v6702_v16 = vadd.f32 0.5, %v1717_v18 }
 0x2dd   : > { %5340 = vtanh.f32 %v1660_v39  ;;  %v1663_v8 = vmul.f32 0.5, %v1605_v44  ;;  %2581 = vmatprep.subr.mxu1 %v8103_v48  ;;  %v1600_v59 = vadd.f32 %v6576_v47, %v1599_v2  ;;  %5016 = vmatmul.mubr.f32.gmra.mxu1 %v6686_v53  ;;  %v6700_v56 = vadd.f32 0.5, %v1716_v40  ;;  %v2519_v2 = vld [vmem:[%s8010_s11 + $0x8] sm:$0xff] }
 0x2de   : > { %v5329_v37 = vpop.eup %5328  ;;  %2582 = vmatpush1.msra.mxu1 %v2521_v30  ;;  %v4958_v51 = vpop.f32.mrf.mxu0  ;;  %8115 = vst [vmem:[#allocation36_spill] sm:$0xff] %v6702_v16  ;;  %v1719_v63 = vmul.f32 0.5, %v5327_v38 }
 0x2df   : > { %8114 = vst [vmem:[#allocation35_spill] sm:$0xff] %v6700_v56  ;;  %5342 = vtanh.f32 %v1663_v8  ;;  %v1662_v39 = vmul.f32 0.5, %v1600_v59  ;;  %2583 = vmatprep.subr.mxu1 %v8103_v48  ;;  %v1615_v44 = vadd.f32 %v4958_v51, %v6576_v47  ;;  %5018 = vmatprep.mubr.f32.mxu1 %v6700_v56  ;;  %v1718_v40 = vmul.f32 0.5, %v5329_v37  ;;  %v2518_v8 = vld [vmem:[%s8010_s11] sm:$0xff] }
 0x2e0   : > { %v5331_v53 = vpop.eup %5330  ;;  %2584 = vmatpush1.msra.mxu1 %v2520_v12  ;;  %v1609_v30 = vpop.f32.mrf.mxu0  ;;  %v6718_v56 = vadd.f32 0.5, %v1719_v63 }
 0x2e1   : > { %5344 = vtanh.f32 %v1662_v39  ;;  %v1665_v18 = vmul.f32 0.5, %v1615_v44  ;;  %2585 = vmatprep.subr.mxu1 %v8103_v48  ;;  %v1610_v38 = vadd.f32 %v6576_v47, %v1609_v30  ;;  %5019 = vmatmul.mubr.f32.gmra.mxu1 %v6702_v16  ;;  %v6716_v59 = vadd.f32 0.5, %v1718_v40  ;;  %v2549_v30 = vld [vmem:[%s8010_s11 + $0xf8] sm:$0xff] }
 0x2e2   : > { %v5333_v51 = vpop.eup %5332  ;;  %2586 = vmatpush1.msra.mxu1 %v2519_v2  ;;  %v4961_v37 = vpop.f32.mrf.mxu0  ;;  %8117 = vst [vmem:[#allocation38_spill] sm:$0xff] %v6718_v56  ;;  %v1721_v12 = vmul.f32 0.5, %v5331_v53 }
 0x2e3   : > { %8116 = vst [vmem:[#allocation37_spill] sm:$0xff] %v6716_v59  ;;  %5346 = vtanh.f32 %v1665_v18  ;;  %v1664_v39 = vmul.f32 0.5, %v1610_v38  ;;  %2587 = vmatprep.subr.mxu1 %v8103_v48  ;;  %v1625_v44 = vadd.f32 %v4961_v37, %v6576_v47  ;;  %5021 = vmatprep.mubr.f32.mxu1 %v6716_v59  ;;  %v1720_v40 = vmul.f32 0.5, %v5333_v51  ;;  %v2548_v18 = vld [vmem:[%s8010_s11 + $0xf0] sm:$0xff] }
 0x2e4   : > { %v5335_v16 = vpop.eup %5334  ;;  %2588 = vmatpush1.msra.mxu1 %v2518_v8  ;;  %v1619_v2 = vpop.f32.mrf.mxu0  ;;  %v6734_v59 = vadd.f32 0.5, %v1721_v12 }
 0x2e5   : > { %5348 = vtanh.f32 %v1664_v39  ;;  %v1667_v63 = vmul.f32 0.5, %v1625_v44  ;;  %2589 = vmatprep.subr.mxu1 %v8103_v48  ;;  %v1620_v53 = vadd.f32 %v6576_v47, %v1619_v2  ;;  %5022 = vmatmul.mubr.f32.gmra.mxu1 %v6718_v56  ;;  %v6732_v38 = vadd.f32 0.5, %v1720_v40  ;;  %v2547_v2 = vld [vmem:[%s8010_s11 + $0xe8] sm:$0xff] }
 0x2e6   : > { %v5337_v37 = vpop.eup %5336  ;;  %2590 = vmatpush2.msra.mxu1 %v2549_v30  ;;  %v4964_v51 = vpop.f32.mrf.mxu0  ;;  %8119 = vst [vmem:[#allocation40_spill] sm:$0xff] %v6734_v59  ;;  %v1723_v8 = vmul.f32 0.5, %v5335_v16  ;;  %v6745_v16 = vld [vmem:[%s8009_s10] ss:$0 sm:$0xff] }
 0x2e7   : > { %8118 = vst [vmem:[#allocation39_spill] sm:$0xff] %v6732_v38  ;;  %5350 = vtanh.f32 %v1667_v63  ;;  %v1666_v39 = vmul.f32 0.5, %v1620_v53  ;;  %2591 = vmatprep.subr.mxu1 %v8103_v48  ;;  %v1635_v44 = vadd.f32 %v4964_v51, %v6576_v47  ;;  %5024 = vmatprep.mubr.f32.mxu1 %v6732_v38  ;;  %v1722_v40 = vmul.f32 0.5, %v5337_v37  ;;  %v2546_v53 = vld [vmem:[%s8010_s11 + $0xe0] sm:$0xff] }
 0x2e8   : > { %v5339_v56 = vpop.eup %5338  ;;  %2592 = vmatpush2.msra.mxu1 %v2548_v18  ;;  %v1629_v30 = vpop.f32.mrf.mxu0  ;;  %v6755_v38 = vadd.f32 0.5, %v1723_v8  ;;  %v2544_v8 = vld [vmem:[%s8010_s11 + $0xd0] sm:$0xff] }
 0x2e9   : > { %5352 = vtanh.f32 %v1666_v39  ;;  %v1669_v12 = vmul.f32 0.5, %v1635_v44  ;;  %2593 = vmatprep.subr.mxu1 %v8103_v48  ;;  %v1630_v63 = vadd.f32 %v6576_v47, %v1629_v30  ;;  %5025 = vmatmul.mubr.f32.gmra.mxu1 %v6734_v59  ;;  %v6753_v37 = vadd.f32 0.5, %v1722_v40  ;;  %v2545_v44 = vld [vmem:[%s8010_s11 + $0xd8] sm:$0xff] }
 0x2ea   : > { %v5341_v18 = vpop.eup %5340  ;;  %2594 = vmatpush2.msra.mxu1 %v2547_v2  ;;  %v5079_v51 = vpop.f32.mrf.mxu0  ;;  %8121 = vst [vmem:[#allocation42_spill] sm:$0xff] %v6755_v38  ;;  %v1725_v61 = vmul.f32 0.5, %v5339_v56 }
 0x2eb   : > { %8120 = vst [vmem:[#allocation41_spill] sm:$0xff] %v6753_v37  ;;  %5354 = vtanh.f32 %v1669_v12  ;;  %v1668_v39 = vmul.f32 0.5, %v1630_v63  ;;  %2595 = vmatprep.subr.mxu1 %v8103_v48  ;;  %v2237_v47 = vadd.f32 %v5079_v51, %v6745_v16  ;;  %5027 = vmatprep.mubr.f32.mxu1 %v6753_v37  ;;  %v1724_v40 = vmul.f32 0.5, %v5341_v18 }
 0x2ec   : > { %v5343_v30 = vpop.eup %5342  ;;  %2596 = vmatpush2.msra.mxu1 %v2546_v53  ;;  %v2231_v2 = vpop.f32.mrf.mxu0  ;;  %v6771_v51 = vadd.f32 0.5, %v1725_v61  ;;  %v2542_v61 = vld [vmem:[%s8010_s11 + $0xc0] sm:$0xff] }
 0x2ed   : > { %5356 = vtanh.f32 %v1668_v39  ;;  %2597 = vmatprep.subr.mxu1 %v8103_v48  ;;  %5028 = vmatmul.mubr.f32.gmra.mxu1 %v6755_v38  ;;  %v2232_v56 = vadd.f32 %v6745_v16, %v2231_v2  ;;  %v6769_v12 = vadd.f32 0.5, %v1724_v40  ;;  %v2391_v53 = vmul.f32 0.5, %v2237_v47  ;;  %v2543_v39 = vld [vmem:[%s8010_s11 + $0xc8] sm:$0xff] }
 0x2ee   : > { %v5345_v63 = vpop.eup %5344  ;;  %2598 = vmatpush2.msra.mxu1 %v2545_v44  ;;  %8123 = vst [vmem:[#allocation44_spill] sm:$0xff] %v6771_v51  ;;  %v5082_v18 = vpop.f32.mrf.mxu0  ;;  %v1727_v38 = vmul.f32 0.5, %v5343_v30 }
 0x2ef   : > { %8122 = vst [vmem:[#allocation43_spill] sm:$0xff] %v6769_v12  ;;  %v2390_v37 = vmul.f32 0.5, %v2232_v56  ;;  %2599 = vmatprep.subr.mxu1 %v8103_v48  ;;  %5030 = vmatprep.mubr.f32.mxu1 %v6769_v12  ;;  %v1726_v2 = vmul.f32 0.5, %v5345_v63  ;;  %v2247_v30 = vadd.f32 %v5082_v18, %v6745_v16 }
 0x2f0   : > { %v5347_v59 = vpop.eup %5346  ;;  %2600 = vmatpush2.msra.mxu1 %v2544_v8  ;;  %v2241_v40 = vpop.f32.mrf.mxu0 }
 0x2f1   : > { %5358 = vtanh.f32 %v2390_v37  ;;  %2601 = vmatprep.subr.mxu1 %v8103_v48  ;;  %5031 = vmatmul.mubr.f32.gmra.mxu1 %v6771_v51  ;;  %v6783_v47 = vadd.f32 0.5, %v1726_v2  ;;  %v2242_v44 = vadd.f32 %v6745_v16, %v2241_v40  ;;  %v1729_v63 = vmul.f32 0.5, %v5347_v59  ;;  %v2541_v2 = vld [vmem:[%s8010_s11 + $0xb8] sm:$0xff]  ;;  %v2540_v59 = vld [vmem:[%s8010_s11 + $0xb0] sm:$0xff] }
 0x2f2   : > { %v5349_v56 = vpop.eup %5348  ;;  %2602 = vmatpush2.msra.mxu1 %v2543_v39  ;;  %v5085_v8 = vpop.f32.mrf.mxu0  ;;  %5360 = vtanh.f32 %v2391_v53  ;;  %v6789_v51 = vadd.f32 0.5, %v1727_v38  ;;  %v2393_v53 = vmul.f32 0.5, %v2247_v30  ;;  %v2538_v30 = vld [vmem:[%s8010_s11 + $0xa0] sm:$0xff] }
 0x2f3   : > { %8124 = vst [vmem:[#allocation45_spill] sm:$0xff] %v6783_v47  ;;  %2603 = vmatprep.subr.mxu1 %v8103_v48  ;;  %5033 = vmatprep.mubr.f32.mxu1 %v6783_v47  ;;  %v2392_v37 = vmul.f32 0.5, %v2242_v44  ;;  %v1728_v12 = vmul.f32 0.5, %v5349_v56  ;;  %v6801_v44 = vadd.f32 0.5, %v1729_v63 }
 0x2f4   : > { %8125 = vst [vmem:[#allocation46_spill] sm:$0xff] %v6789_v51  ;;  %v5351_v40 = vpop.eup %5350  ;;  %2604 = vmatpush2.msra.mxu1 %v2542_v61  ;;  %v2251_v39 = vpop.f32.mrf.mxu0  ;;  %v2539_v61 = vld [vmem:[%s8010_s11 + $0xa8] sm:$0xff] }
 0x2f5   : > { %2605 = vmatprep.subr.mxu1 %v8103_v48  ;;  %5034 = vmatmul.mubr.f32.gmra.mxu1 %v6789_v51  ;;  %v6799_v18 = vadd.f32 0.5, %v1728_v12  ;;  %8126 = vst [vmem:[#allocation47_spill] sm:$0xff] %v6801_v44  ;;  %5362 = vtanh.f32 %v2392_v37  ;;  %v2252_v51 = vadd.f32 %v6745_v16, %v2251_v39  ;;  %v1731_v47 = vmul.f32 0.5, %v5351_v40 }
 0x2f6   : > { %v5353_v38 = vpop.eup %5352  ;;  %2606 = vmatpush2.msra.mxu1 %v2541_v2  ;;  %v5088_v33 = vpop.f32.mrf.mxu0  ;;  %5364 = vtanh.f32 %v2393_v53  ;;  %v2257_v2 = vadd.f32 %v5085_v8, %v6745_v16  ;;  %v2536_v8 = vld [vmem:[%s8010_s11 + $0x90] sm:$0xff] }
 0x2f7   : > { %2607 = vmatprep.subr.mxu1 %v8103_v48  ;;  %5036 = vmatprep.mubr.f32.mxu1 %v6799_v18  ;;  %v1730_v56 = vmul.f32 0.5, %v5353_v38  ;;  %v2394_v40 = vmul.f32 0.5, %v2252_v51  ;;  %v6819_v39 = vadd.f32 0.5, %v1731_v47 }
 0x2f8   : > { %v5355_v12 = vpop.eup %5354  ;;  %2608 = vmatpush2.msra.mxu1 %v2540_v59  ;;  %v2537_v59 = vld [vmem:[%s8010_s11 + $0x98] sm:$0xff]  ;;  %v2395_v47 = vmul.f32 0.5, %v2257_v2  ;;  %v2534_v2 = vld [vmem:[%s8010_s11 + $0x80] sm:$0xff] }
 0x2f9   : > { %2609 = vmatprep.subr.mxu1 %v8103_v48  ;;  %5037 = vmatmul.mubr.f32.gmra.mxu1 %v6801_v44  ;;  %v6814_v63 = vadd.f32 0.5, %v1730_v56  ;;  %8128 = vst [vmem:[#allocation49_spill] sm:$0xff] %v6819_v39  ;;  %v1733_v44 = vmul.f32 0.5, %v5355_v12  ;;  %v2261_v56 = vpop.f32.mrf.mxu0  ;;  %5366 = vtanh.f32 %v2394_v40 }
 0x2fa   : > { %v5357_v37 = vpop.eup %5356  ;;  %2610 = vmatpush2.msra.mxu1 %v2539_v61  ;;  %5368 = vtanh.f32 %v2395_v47 }
 0x2fb   : > { %8127 = vst [vmem:[#allocation48_spill] sm:$0xff] %v6814_v63  ;;  %2611 = vmatprep.subr.mxu1 %v8103_v48  ;;  %5039 = vmatprep.mubr.f32.mxu1 %v6814_v63  ;;  %v1732_v38 = vmul.f32 0.5, %v5357_v37  ;;  %v6833_v12 = vadd.f32 0.5, %v1733_v44  ;;  %v2262_v37 = vadd.f32 %v6745_v16, %v2261_v56  ;;  %v2267_v44 = vadd.f32 %v5088_v33, %v6745_v16 }
 0x2fc   : > { %2612 = vmatpush2.msra.mxu1 %v2538_v30  ;;  %v2535_v30 = vld [vmem:[%s8010_s11 + $0x88] sm:$0xff] }
 0x2fd   : > { %2613 = vmatprep.subr.mxu1 %v8103_v48  ;;  %5040 = vmatmul.mubr.f32.gmra.mxu1 %v6819_v39  ;;  %v6829_v53 = vadd.f32 0.5, %v1732_v38  ;;  %8129 = vst [vmem:[#allocation50_spill] sm:$0xff] %v6833_v12  ;;  %v5091_v38 = vpop.f32.mrf.mxu0  ;;  %v2396_v40 = vmul.f32 0.5, %v2262_v37 }
 0x2fe   : > { %v5359_v51 = vpop.eup %5358  ;;  %2614 = vmatpush2.msra.mxu1 %v2537_v59  ;;  %v2277_v37 = vadd.f32 %v5091_v38, %v6745_v16 }
 0x2ff   : > { %v2454_v61 = vmul.f32 0.5, %v5359_v51  ;;  %2615 = vmatprep.subr.mxu1 %v8103_v48  ;;  %5042 = vmatprep.mubr.f32.mxu1 %v6829_v53  ;;  %v5361_v39 = vpop.eup %5360  ;;  %v2397_v51 = vmul.f32 0.5, %v2267_v44  ;;  %5370 = vtanh.f32 %v2396_v40 }
 0x300   : > { %2616 = vmatpush2.msra.mxu1 %v2536_v8  ;;  %v2455_v59 = vmul.f32 0.5, %v5361_v39  ;;  %v2271_v8 = vpop.f32.mrf.mxu0 }
 0x301   : > { %v2486_v63 = vadd.f32 0.5, %v2454_v61  ;;  %2617 = vmatprep.subr.mxu1 %v8103_v48  ;;  %5043 = vmatmul.mubr.f32.gmra.mxu1 %v6833_v12  ;;  %v2272_v33 = vadd.f32 %v6745_v16, %v2271_v8  ;;  %5372 = vtanh.f32 %v2397_v51 }
 0x302   : > { %2618 = vmatpush2.msra.mxu1 %v2535_v30  ;;  %2621 = vmatprep.mubr.f32.mxu1 %v6141_v57  ;;  %v5363_v56 = vpop.eup %5362  ;;  %v2487_v30 = vadd.f32 0.5, %v2455_v59  ;;  %v5094_v47 = vpop.f32.mrf.mxu0 }
 0x303   : > { %2619 = vmatprep.subr.mxu1 %v8103_v48  ;;  %v5365_v61 = vpop.eup %5364  ;;  %v2456_v57 = vmul.f32 0.5, %v5363_v56  ;;  %v2398_v39 = vmul.f32 0.5, %v2272_v33 }
 0x304   : > { %2620 = vmatpush2.msra.mxu1 %v2534_v2  ;;  %v2457_v2 = vmul.f32 0.5, %v5365_v61  ;;  %v2281_v44 = vpop.f32.mrf.mxu0 }
 0x305   : > { %2622 = vmatmul.mubr.f32.vlgmr.msra.gmra.mxu1 %v2486_v63  ;;  %3341 = vmatprep.subr.mxu1 %v8103_v48  ;;  %v2488_v63 = vadd.f32 0.5, %v2456_v57  ;;  %5374 = vtanh.f32 %v2398_v39  ;;  %v2282_v59 = vadd.f32 %v6745_v16, %v2281_v44 }
 0x306   : > { %2626 = vmatprep.mubr.f32.mxu1 %v6139_v55  ;;  %v5367_v12 = vpop.eup %5366  ;;  %v2399_v55 = vmul.f32 0.5, %v2277_v37  ;;  %v2489_v40 = vadd.f32 0.5, %v2457_v2 }
 0x307   : > { %v2458_v56 = vmul.f32 0.5, %v5367_v12  ;;  %v5369_v8 = vpop.eup %5368  ;;  %v2400_v38 = vmul.f32 0.5, %v2282_v59 }
 0x308   : > { %5376 = vtanh.f32 %v2399_v55  ;;  %v2459_v61 = vmul.f32 0.5, %v5369_v8 }
 0x309   : > { %2627 = vmatmul.mubr.f32.gmra.mxu1 %v2487_v30  ;;  %v5097_v30 = vpop.f32.mrf.mxu0  ;;  %v2490_v51 = vadd.f32 0.5, %v2458_v56  ;;  %5378 = vtanh.f32 %v2400_v38 }
 0x30a   : > { %2631 = vmatprep.mubr.f32.mxu1 %v6152_v6  ;;  %v2287_v6 = vadd.f32 %v5094_v47, %v6745_v16  ;;  %v2491_v37 = vadd.f32 0.5, %v2459_v61 }
 0x30b   : > { %v2291_v57 = vpop.f32.mrf.mxu0 }
 0x30c   : > { %v5371_v33 = vpop.eup %5370  ;;  %v2292_v12 = vadd.f32 %v6745_v16, %v2291_v57 }
 0x30d   : > { %2632 = vmatmul.mubr.f32.gmra.mxu1 %v2488_v63  ;;  %v2460_v39 = vmul.f32 0.5, %v5371_v33  ;;  %v5100_v2 = vpop.f32.mrf.mxu0  ;;  %v2922_v33 = vld [vmem:[%s8012_s13 + $0x60] sm:$0xff] }
 0x30e   : > { %2636 = vmatprep.mubr.f32.mxu1 %v6154_v10  ;;  %v2401_v10 = vmul.f32 0.5, %v2287_v6  ;;  %v5373_v63 = vpop.eup %5372  ;;  %v2402_v47 = vmul.f32 0.5, %v2292_v12  ;;  %v2307_v61 = vadd.f32 %v5100_v2, %v6745_v16  ;;  %v2920_v2 = vld [vmem:[%s8012_s13 + $0x50] sm:$0xff] }
 0x30f   : > { %v2492_v44 = vadd.f32 0.5, %v2460_v39  ;;  %v2461_v55 = vmul.f32 0.5, %v5373_v63  ;;  %v2301_v59 = vpop.f32.mrf.mxu0  ;;  %v2921_v63 = vld [vmem:[%s8012_s13 + $0x58] sm:$0xff] }
 0x310   : > { %5380 = vtanh.f32 %v2401_v10 }
 0x311   : > { %2637 = vmatmul.mubr.f32.gmra.mxu1 %v2489_v40  ;;  %5382 = vtanh.f32 %v2402_v47  ;;  %v2493_v8 = vadd.f32 0.5, %v2461_v55 }
 0x312   : > { %2641 = vmatprep.mubr.f32.mxu1 %v6166_v20  ;;  %v2297_v20 = vadd.f32 %v5097_v30, %v6745_v16  ;;  %v5375_v40 = vpop.eup %5374  ;;  %v2302_v30 = vadd.f32 %v6745_v16, %v2301_v59 }
 0x313   : > { %v2462_v6 = vmul.f32 0.5, %v5375_v40 }
 0x314   : > { %v2403_v56 = vmul.f32 0.5, %v2297_v20  ;;  %v2404_v57 = vmul.f32 0.5, %v2302_v30 }
 0x315   : > { %2642 = vmatmul.mubr.f32.gmra.mxu1 %v2490_v51  ;;  %v5377_v38 = vpop.eup %5376  ;;  %v5103_v51 = vpop.f32.mrf.mxu0  ;;  %v2494_v10 = vadd.f32 0.5, %v2462_v6 }
 0x316   : > { %2646 = vmatprep.mubr.f32.mxu1 %v6168_v27  ;;  %v2925_v27 = vld [vmem:[%s8012_s13 + $0x78] sm:$0xff]  ;;  %5384 = vtanh.f32 %v2403_v56  ;;  %v5379_v12 = vpop.eup %5378  ;;  %v2317_v59 = vadd.f32 %v5103_v51, %v6745_v16  ;;  %v2916_v51 = vld [vmem:[%s8012_s13 + $0x30] sm:$0xff] }
 0x317   : > { %2950 = vmatpush1.msra.mxu0 %v2925_v27  ;;  %v2311_v39 = vpop.f32.mrf.mxu0  ;;  %5386 = vtanh.f32 %v2404_v57  ;;  %v2918_v27 = vld [vmem:[%s8012_s13 + $0x40] sm:$0xff] }
 0x318   : > { %2951 = vmatprep.subr.mxu0 %v8103_v48  ;;  %v2312_v47 = vadd.f32 %v6745_v16, %v2311_v39 }
 0x319   : > { %2647 = vmatmul.mubr.f32.gmra.mxu1 %v2491_v37  ;;  %v2463_v37 = vmul.f32 0.5, %v5377_v38  ;;  %v5106_v40 = vpop.f32.mrf.mxu0  ;;  %v2917_v38 = vld [vmem:[%s8012_s13 + $0x38] sm:$0xff] }
 0x31a   : > { %2651 = vmatprep.mubr.f32.mxu1 %v6174_v36  ;;  %v2924_v36 = vld [vmem:[%s8012_s13 + $0x70] sm:$0xff]  ;;  %v2406_v56 = vmul.f32 0.5, %v2312_v47  ;;  %v2913_v47 = vld [vmem:[%s8012_s13 + $0x18] sm:$0xff] }
 0x31b   : > { %2952 = vmatpush1.msra.mxu0 %v2924_v36  ;;  %v2495_v20 = vadd.f32 0.5, %v2463_v37  ;;  %v2321_v6 = vpop.f32.mrf.mxu0  ;;  %v2327_v37 = vadd.f32 %v5106_v40, %v6745_v16 }
 0x31c   : > { %2953 = vmatprep.subr.mxu0 %v8103_v48 }
 0x31d   : > { %2652 = vmatmul.mubr.f32.gmra.mxu1 %v2492_v44  ;;  %v2464_v44 = vmul.f32 0.5, %v5379_v12  ;;  %v5381_v55 = vpop.eup %5380  ;;  %v2914_v12 = vld [vmem:[%s8012_s13 + $0x20] sm:$0xff] }
 0x31e   : > { %2656 = vmatprep.mubr.f32.mxu1 %v6181_v42  ;;  %v2923_v42 = vld [vmem:[%s8012_s13 + $0x68] sm:$0xff]  ;;  %v5383_v30 = vpop.eup %5382 }
 0x31f   : > { %2954 = vmatpush1.msra.mxu0 %v2923_v42  ;;  %v2496_v36 = vadd.f32 0.5, %v2464_v44  ;;  %v2912_v44 = vld [vmem:[%s8012_s13 + $0x10] sm:$0xff] }
 0x320   : > { %2955 = vmatprep.subr.mxu0 %v8103_v48 }
 0x321   : > { %2657 = vmatmul.mubr.f32.gmra.mxu1 %v2493_v8  ;;  %2956 = vmatpush1.msra.mxu0 %v2922_v33  ;;  %v2465_v8 = vmul.f32 0.5, %v5381_v55  ;;  %v2466_v33 = vmul.f32 0.5, %v5383_v30 }
 0x322   : > { %2661 = vmatprep.mubr.f32.mxu1 %v6184_v49  ;;  %2957 = vmatprep.subr.mxu0 %v8103_v48  ;;  %v2405_v49 = vmul.f32 0.5, %v2307_v61  ;;  %v2322_v61 = vadd.f32 %v6745_v16, %v2321_v6 }
 0x323   : > { %2958 = vmatpush1.msra.mxu0 %v2921_v63  ;;  %v2497_v42 = vadd.f32 0.5, %v2465_v8  ;;  %v5385_v57 = vpop.eup %5384  ;;  %v2498_v63 = vadd.f32 0.5, %v2466_v33 }
 0x324   : > { %2959 = vmatprep.subr.mxu0 %v8103_v48  ;;  %5388 = vtanh.f32 %v2405_v49  ;;  %v2408_v39 = vmul.f32 0.5, %v2322_v61  ;;  %v2467_v49 = vmul.f32 0.5, %v5385_v57 }
 0x325   : > { %2662 = vmatmul.mubr.f32.gmra.mxu1 %v2494_v10  ;;  %2960 = vmatpush1.msra.mxu0 %v2920_v2  ;;  %5390 = vtanh.f32 %v2406_v56  ;;  %v5109_v10 = vpop.f32.mrf.mxu0  ;;  %v5387_v2 = vpop.eup %5386 }
 0x326   : > { %2666 = vmatprep.mubr.f32.mxu1 %v6191_v52  ;;  %2961 = vmatprep.subr.mxu0 %v8103_v48  ;;  %v2919_v52 = vld [vmem:[%s8012_s13 + $0x48] sm:$0xff]  ;;  %v2499_v55 = vadd.f32 0.5, %v2467_v49  ;;  %v2337_v56 = vadd.f32 %v5109_v10, %v6745_v16 }
 0x327   : > { %2962 = vmatpush1.msra.mxu0 %v2919_v52  ;;  %v2468_v52 = vmul.f32 0.5, %v5387_v2 }
 0x328   : > { %2963 = vmatprep.subr.mxu0 %v8103_v48 }
 0x329   : > { %2667 = vmatmul.mubr.f32.gmra.mxu1 %v2495_v20  ;;  %2964 = vmatpush1.msra.mxu0 %v2918_v27  ;;  %v2331_v20 = vpop.f32.mrf.mxu0  ;;  %v2500_v30 = vadd.f32 0.5, %v2468_v52 }
 0x32a   : > { %2671 = vmatprep.mubr.f32.mxu1 %v6194_v32  ;;  %2965 = vmatprep.subr.mxu0 %v8103_v48  ;;  %v2407_v32 = vmul.f32 0.5, %v2317_v59  ;;  %v2332_v40 = vadd.f32 %v6745_v16, %v2331_v20 }
 0x32b   : > { %2966 = vmatpush1.msra.mxu0 %v2917_v38  ;;  %v5112_v27 = vpop.f32.mrf.mxu0 }
 0x32c   : > { %2967 = vmatprep.subr.mxu0 %v8103_v48  ;;  %5392 = vtanh.f32 %v2407_v32  ;;  %v2410_v8 = vmul.f32 0.5, %v2332_v40 }
 0x32d   : > { %2672 = vmatmul.mubr.f32.gmra.mxu1 %v2496_v36  ;;  %2968 = vmatpush1.msra.mxu0 %v2916_v51  ;;  %5394 = vtanh.f32 %v2408_v39  ;;  %v2910_v36 = vld [vmem:[%s8012_s13] sm:$0xff]  ;;  %v2341_v32 = vpop.f32.mrf.mxu0  ;;  %v2941_v51 = vld [vmem:[%s8012_s13 + $0xf8] sm:$0xff] }
 0x32e   : > { %2676 = vmatprep.mubr.f32.mxu1 %v6200_v1  ;;  %2969 = vmatprep.subr.mxu0 %v8103_v48  ;;  %v2915_v1 = vld [vmem:[%s8012_s13 + $0x28] sm:$0xff]  ;;  %v2342_v57 = vadd.f32 %v6745_v16, %v2341_v32  ;;  %v2932_v32 = vld [vmem:[%s8012_s13 + $0xb0] sm:$0xff] }
 0x32f   : > { %2970 = vmatpush1.msra.mxu0 %v2915_v1  ;;  %v5115_v1 = vpop.f32.mrf.mxu0 }
 0x330   : > { %2971 = vmatprep.subr.mxu0 %v8103_v48  ;;  %v2412_v49 = vmul.f32 0.5, %v2342_v57 }
 0x331   : > { %2677 = vmatmul.mubr.f32.gmra.mxu1 %v2497_v42  ;;  %2972 = vmatpush1.msra.mxu0 %v2914_v12  ;;  %v5389_v59 = vpop.eup %5388  ;;  %v2940_v42 = vld [vmem:[%s8012_s13 + $0xf0] sm:$0xff]  ;;  %v2938_v12 = vld [vmem:[%s8012_s13 + $0xe0] sm:$0xff]  ;;  %v2351_v20 = vpop.f32.mrf.mxu0 }
 0x332   : > { %2681 = vmatprep.mubr.f32.mxu1 %v6203_v11  ;;  %2973 = vmatprep.subr.mxu0 %v8103_v48  ;;  %v2409_v11 = vmul.f32 0.5, %v2327_v37  ;;  %v2469_v6 = vmul.f32 0.5, %v5389_v59  ;;  %v5391_v38 = vpop.eup %5390  ;;  %v2347_v37 = vadd.f32 %v5112_v27, %v6745_v16  ;;  %v2352_v40 = vadd.f32 %v6745_v16, %v2351_v20 }
 0x333   : > { %2974 = vmatpush1.msra.mxu0 %v2913_v47  ;;  %v2470_v61 = vmul.f32 0.5, %v5391_v38  ;;  %v2937_v47 = vld [vmem:[%s8012_s13 + $0xd8] sm:$0xff]  ;;  %v5118_v59 = vpop.f32.mrf.mxu0  ;;  %v2357_v27 = vadd.f32 %v5115_v1, %v6745_v16 }
 0x334   : > { %2975 = vmatprep.subr.mxu0 %v8103_v48  ;;  %5396 = vtanh.f32 %v2409_v11  ;;  %v2501_v33 = vadd.f32 0.5, %v2469_v6  ;;  %v2936_v11 = vld [vmem:[%s8012_s13 + $0xd0] sm:$0xff]  ;;  %v2933_v38 = vld [vmem:[%s8012_s13 + $0xb8] sm:$0xff]  ;;  %v2367_v57 = vadd.f32 %v5118_v59, %v6745_v16 }
 0x335   : > { %2682 = vmatmul.mubr.f32.gmra.mxu1 %v2498_v63  ;;  %2976 = vmatpush1.msra.mxu0 %v2912_v44  ;;  %5398 = vtanh.f32 %v2410_v8  ;;  %v2502_v63 = vadd.f32 0.5, %v2470_v61  ;;  %v2414_v8 = vmul.f32 0.5, %v2352_v40  ;;  %v2361_v6 = vpop.f32.mrf.mxu0 }
 0x336   : > { %2686 = vmatprep.mubr.f32.mxu1 %v6209_v19  ;;  %2977 = vmatprep.subr.mxu0 %v8103_v48  ;;  %v2911_v19 = vld [vmem:[%s8012_s13 + $0x8] sm:$0xff] }
 0x337   : > { %2978 = vmatpush1.msra.mxu0 %v2911_v19  ;;  %v2934_v19 = vld [vmem:[%s8012_s13 + $0xc0] sm:$0xff] }
 0x338   : > { %2979 = vmatprep.subr.mxu0 %v8103_v48 }
 0x339   : > { %2687 = vmatmul.mubr.f32.gmra.mxu1 %v2499_v55  ;;  %2980 = vmatpush1.msra.mxu0 %v2910_v36  ;;  %v5393_v10 = vpop.eup %5392 }
 0x33a   : > { %2691 = vmatprep.mubr.f32.mxu1 %v6212_v17  ;;  %2981 = vmatprep.subr.mxu0 %v8103_v48  ;;  %v2411_v17 = vmul.f32 0.5, %v2337_v56  ;;  %v2471_v39 = vmul.f32 0.5, %v5393_v10  ;;  %v5395_v2 = vpop.eup %5394  ;;  %v2930_v10 = vld [vmem:[%s8012_s13 + $0xa0] sm:$0xff] }
 0x33b   : > { %2982 = vmatpush2.msra.mxu0 %v2941_v51  ;;  %v2472_v55 = vmul.f32 0.5, %v5395_v2 }
 0x33c   : > { %2983 = vmatprep.subr.mxu0 %v8103_v48  ;;  %5400 = vtanh.f32 %v2411_v17  ;;  %v2503_v44 = vadd.f32 0.5, %v2471_v39 }
 0x33d   : > { %2692 = vmatmul.mubr.f32.gmra.mxu1 %v2500_v30  ;;  %2984 = vmatpush2.msra.mxu0 %v2940_v42  ;;  %5402 = vtanh.f32 %v2412_v49  ;;  %v2504_v36 = vadd.f32 0.5, %v2472_v55  ;;  %v2362_v42 = vadd.f32 %v6745_v16, %v2361_v6  ;;  %v2928_v49 = vld [vmem:[%s8012_s13 + $0x90] sm:$0xff]  ;;  %v2926_v55 = vld [vmem:[%s8012_s13 + $0x80] sm:$0xff] }
 0x33e   : > { %2696 = vmatprep.mubr.f32.mxu1 %v6219_v34  ;;  %2985 = vmatprep.subr.mxu0 %v8103_v48  ;;  %v2939_v34 = vld [vmem:[%s8012_s13 + $0xe8] sm:$0xff] }
 0x33f   : > { %2986 = vmatpush2.msra.mxu0 %v2939_v34 }
 0x340   : > { %2987 = vmatprep.subr.mxu0 %v8103_v48 }
 0x341   : > { %2697 = vmatmul.mubr.f32.gmra.mxu1 %v2501_v33  ;;  %2988 = vmatpush2.msra.mxu0 %v2938_v12  ;;  %v5397_v52 = vpop.eup %5396  ;;  %v5121_v33 = vpop.f32.mrf.mxu0 }
 0x342   : > { %2701 = vmatprep.mubr.f32.mxu1 %v6214_v26  ;;  %2989 = vmatprep.subr.mxu0 %v8103_v48  ;;  %v2413_v26 = vmul.f32 0.5, %v2347_v37  ;;  %v2473_v56 = vmul.f32 0.5, %v5397_v52  ;;  %v5399_v30 = vpop.eup %5398  ;;  %v2416_v37 = vmul.f32 0.5, %v2362_v42 }
 0x343   : > { %2990 = vmatpush2.msra.mxu0 %v2937_v47  ;;  %v2474_v17 = vmul.f32 0.5, %v5399_v30  ;;  %v2371_v39 = vpop.f32.mrf.mxu0 }
 0x344   : > { %2991 = vmatprep.subr.mxu0 %v8103_v48  ;;  %5404 = vtanh.f32 %v2413_v26  ;;  %v2505_v51 = vadd.f32 0.5, %v2473_v56  ;;  %v2372_v47 = vadd.f32 %v6745_v16, %v2371_v39 }
 0x345   : > { %2702 = vmatmul.mubr.f32.gmra.mxu1 %v2502_v63  ;;  %2992 = vmatpush2.msra.mxu0 %v2936_v11  ;;  %5406 = vtanh.f32 %v2414_v8  ;;  %v2506_v34 = vadd.f32 0.5, %v2474_v17  ;;  %v2929_v63 = vld [vmem:[%s8012_s13 + $0x98] sm:$0xff]  ;;  %v5124_v11 = vpop.f32.mrf.mxu0 }
 0x346   : > { %2706 = vmatprep.mubr.f32.mxu1 %v6226_v45  ;;  %2993 = vmatprep.subr.mxu0 %v8103_v48  ;;  %v2935_v45 = vld [vmem:[%s8012_s13 + $0xc8] sm:$0xff]  ;;  %v2418_v59 = vmul.f32 0.5, %v2372_v47 }
 0x347   : > { %2994 = vmatpush2.msra.mxu0 %v2935_v45 }
 0x348   : > { %2995 = vmatprep.subr.mxu0 %v8103_v48 }
 0x349   : > { %2707 = vmatmul.mubr.f32.gmra.mxu1 %v2503_v44  ;;  %2996 = vmatpush2.msra.mxu0 %v2934_v19  ;;  %v5401_v61 = vpop.eup %5400  ;;  %v2377_v44 = vadd.f32 %v5121_v33, %v6745_v16 }
 0x34a   : > { %2711 = vmatprep.mubr.f32.mxu1 %v6223_v28  ;;  %2997 = vmatprep.subr.mxu0 %v8103_v48  ;;  %v2415_v28 = vmul.f32 0.5, %v2357_v27  ;;  %v2475_v1 = vmul.f32 0.5, %v5401_v61  ;;  %v5403_v12 = vpop.eup %5402  ;;  %v2381_v27 = vpop.f32.mrf.mxu0 }
 0x34b   : > { %2998 = vmatpush2.msra.mxu0 %v2933_v38  ;;  %v2476_v20 = vmul.f32 0.5, %v5403_v12  ;;  %v2419_v19 = vmul.f32 0.5, %v2377_v44  ;;  %v2387_v38 = vadd.f32 %v5124_v11, %v6745_v16 }
 0x34c   : > { %2999 = vmatprep.subr.mxu0 %v8103_v48  ;;  %5408 = vtanh.f32 %v2415_v28  ;;  %v2507_v2 = vadd.f32 0.5, %v2475_v1 }
 0x34d   : > { %2712 = vmatmul.mubr.f32.gmra.mxu1 %v2504_v36  ;;  %3000 = vmatpush2.msra.mxu0 %v2932_v32  ;;  %5410 = vtanh.f32 %v2416_v37  ;;  %v2508_v52 = vadd.f32 0.5, %v2476_v20  ;;  %v2382_v36 = vadd.f32 %v6745_v16, %v2381_v27  ;;  %v2421_v17 = vmul.f32 0.5, %v2387_v38 }
 0x34e   : > { %2716 = vmatprep.mubr.f32.mxu1 %v6232_v54  ;;  %3001 = vmatprep.subr.mxu0 %v8103_v48  ;;  %v2931_v54 = vld [vmem:[%s8012_s13 + $0xa8] sm:$0xff] }
 0x34f   : > { %3002 = vmatpush2.msra.mxu0 %v2931_v54  ;;  %v2420_v28 = vmul.f32 0.5, %v2382_v36 }
 0x350   : > { %3003 = vmatprep.subr.mxu0 %v8103_v48 }
 0x351   : > { %2717 = vmatmul.mubr.f32.gmra.mxu1 %v2505_v51  ;;  %3004 = vmatpush2.msra.mxu0 %v2930_v10  ;;  %v5405_v26 = vpop.eup %5404 }
 0x352   : > { %2721 = vmatprep.mubr.f32.mxu1 %v6230_v50  ;;  %3005 = vmatprep.subr.mxu0 %v8103_v48  ;;  %v2417_v50 = vmul.f32 0.5, %v2367_v57  ;;  %v2477_v40 = vmul.f32 0.5, %v5405_v26  ;;  %v5407_v45 = vpop.eup %5406 }
 0x353   : > { %3006 = vmatpush2.msra.mxu0 %v2929_v63  ;;  %v2478_v56 = vmul.f32 0.5, %v5407_v45 }
 0x354   : > { %3007 = vmatprep.subr.mxu0 %v8103_v48  ;;  %5412 = vtanh.f32 %v2417_v50 }
 0x355   : > { %2722 = vmatmul.mubr.f32.gmra.mxu1 %v2506_v34  ;;  %3008 = vmatpush2.msra.mxu0 %v2928_v49  ;;  %5414 = vtanh.f32 %v2418_v59  ;;  %v2510_v6 = vadd.f32 0.5, %v2478_v56 }
 0x356   : > { %2726 = vmatprep.mubr.f32.mxu1 %v6238_v60  ;;  %3009 = vmatprep.subr.mxu0 %v8103_v48  ;;  %v2927_v60 = vld [vmem:[%s8012_s13 + $0x88] sm:$0xff]  ;;  %5416 = vtanh.f32 %v2419_v19 }
 0x357   : > { %3010 = vmatpush2.msra.mxu0 %v2927_v60  ;;  %5418 = vtanh.f32 %v2420_v28 }
 0x358   : > { %3011 = vmatprep.subr.mxu0 %v8103_v48  ;;  %5420 = vtanh.f32 %v2421_v17 }
 0x359   : > { %2727 = vmatmul.mubr.f32.gmra.mxu1 %v2507_v2  ;;  %3012 = vmatpush2.msra.mxu0 %v2926_v55  ;;  %v5409_v8 = vpop.eup %5408 }
 0x35a   : > { %2731 = vmatprep.mubr.f32.mxu1 %v6236_v58  ;;  %3733 = vmatprep.subr.mxu0 %v8103_v48  ;;  %v2509_v58 = vadd.f32 0.5, %v2477_v40  ;;  %v2479_v30 = vmul.f32 0.5, %v5409_v8  ;;  %v5411_v32 = vpop.eup %5410 }
 0x35b   : > { %v2480_v51 = vmul.f32 0.5, %v5411_v32 }
 0x35d   : > { %2732 = vmatmul.mubr.f32.gmra.mxu1 %v2508_v52  ;;  %v2512_v33 = vadd.f32 0.5, %v2480_v51 }
 0x35e   : > { %2736 = vmatprep.mubr.f32.mxu1 %v6244_v5  ;;  %v2511_v5 = vadd.f32 0.5, %v2479_v30 }
 0x361   : > { %2737 = vmatmul.mubr.f32.gmra.mxu1 %v2509_v58  ;;  %v5413_v42 = vpop.eup %5412 }
 0x362   : > { %2741 = vmatprep.mubr.f32.mxu1 %v6242_v0  ;;  %v2481_v61 = vmul.f32 0.5, %v5413_v42  ;;  %v5415_v0 = vpop.eup %5414 }
 0x363   : > { %v5417_v16 = vpop.eup %5416  ;;  %v2482_v57 = vmul.f32 0.5, %v5415_v0 }
 0x364   : > { %v2513_v54 = vadd.f32 0.5, %v2481_v61  ;;  %v5419_v1 = vpop.eup %5418 }
 0x365   : > { %2742 = vmatmul.mubr.f32.gmra.mxu1 %v2510_v6  ;;  %v2514_v10 = vadd.f32 0.5, %v2482_v57  ;;  %v2484_v34 = vmul.f32 0.5, %v5419_v1  ;;  %v5421_v37 = vpop.eup %5420 }
 0x366   : > { %2746 = vmatprep.mubr.f32.mxu1 %v6250_v14  ;;  %v2483_v14 = vmul.f32 0.5, %v5417_v16  ;;  %v2485_v12 = vmul.f32 0.5, %v5421_v37 }
 0x368   : > { %v2517_v39 = vadd.f32 0.5, %v2485_v12 }
 0x369   : > { %2747 = vmatmul.mubr.f32.gmra.mxu1 %v2511_v5 }
 0x36a   : > { %2751 = vmatprep.mubr.f32.mxu1 %v6248_v9  ;;  %v2515_v9 = vadd.f32 0.5, %v2483_v14 }
 0x36d   : > { %2752 = vmatmul.mubr.f32.gmra.mxu1 %v2512_v33 }
 0x36e   : > { %2756 = vmatprep.mubr.f32.mxu1 %v6256_v21  ;;  %v2516_v21 = vadd.f32 0.5, %v2484_v34 }
 0x371   : > { %2757 = vmatmul.mubr.f32.gmra.mxu1 %v2513_v54 }
 0x372   : > { %2761 = vmatprep.mubr.f32.mxu1 %v6254_v15  ;;  %v7035_v15 = vld [vmem:[%s8007_s8] ss:$0 sm:$0xff] }
 0x375   : > { %2762 = vmatmul.mubr.f32.gmra.mxu1 %v2514_v10 }
 0x376   : > { %2766 = vmatprep.mubr.f32.mxu1 %v6262_v29 }
 0x379   : > { %2767 = vmatmul.mubr.f32.gmra.mxu1 %v2515_v9 }
 0x37a   : > { %2771 = vmatprep.mubr.f32.mxu1 %v6260_v25 }
 0x37d   : > { %2772 = vmatmul.mubr.f32.gmra.mxu1 %v2516_v21 }
 0x37e   : > { %2776 = vmatprep.mubr.f32.mxu1 %v6266_v31 }
 0x381   : > { %2777 = vmatmul.mubr.f32.gmra.mxu1 %v2517_v39  ;;  %v7120_v39 = vld [vmem:[%s8011_s12] ss:$0 sm:$0xff] }
 0x382   : > { %3405 = vmatprep.mubr.f32.mxu1 %v6592_v41 }
 0x384   : > { %v4999_v29 = vpop.f32.mrf.mxu1 }
 0x385   : > { %v7038_v63 = vadd.f32 %v4999_v29, %v7035_v15 }
 0x386   : > { %v7040_v50 = vpop.f32.mrf.mxu1 }
 0x389   : > { %v5002_v25 = vpop.f32.mrf.mxu1 }
 0x38a   : > { %v7043_v49 = vadd.f32 %v5002_v25, %v7035_v15 }
 0x38b   : > { %v7045_v31 = vpop.f32.mrf.mxu1 }
 0x38d   : > { %v5005_v2 = vpop.f32.mrf.mxu1 }
 0x38e   : > { %v7048_v41 = vadd.f32 %v5005_v2, %v7035_v15  ;;  %v3317_v2 = vld [vmem:[%s8014_s15 + $0x78] sm:$0xff] }
 0x38f   : > { %v7050_v20 = vpop.f32.mrf.mxu1  ;;  %3342 = vmatpush1.msra.mxu1 %v3317_v2 }
 0x390   : > { %3343 = vmatprep.subr.mxu1 %v8103_v48 }
 0x391   : > { %v5008_v47 = vpop.f32.mrf.mxu1 }
 0x392   : > { %v7053_v26 = vadd.f32 %v5008_v47, %v7035_v15 }
 0x393   : > { %v7055_v11 = vpop.f32.mrf.mxu1 }
 0x395   : > { %v5011_v60 = vpop.f32.mrf.mxu1 }
 0x396   : > { %v7058_v44 = vadd.f32 %v5011_v60, %v7035_v15 }
 0x397   : > { %v7060_v55 = vpop.f32.mrf.mxu1 }
 0x399   : > { %v5014_v40 = vpop.f32.mrf.mxu1 }
 0x39a   : > { %v7063_v52 = vadd.f32 %v5014_v40, %v7035_v15 }
 0x39b   : > { %v7065_v59 = vpop.f32.mrf.mxu1 }
 0x39d   : > { %v5017_v45 = vpop.f32.mrf.mxu1 }
 0x39e   : > { %v7068_v27 = vadd.f32 %v5017_v45, %v7035_v15 }
 0x39f   : > { %v7070_v19 = vpop.f32.mrf.mxu1 }
 0x3a1   : > { %v5020_v58 = vpop.f32.mrf.mxu1 }
 0x3a2   : > { %v7073_v56 = vadd.f32 %v5020_v58, %v7035_v15  ;;  %v3316_v58 = vld [vmem:[%s8014_s15 + $0x70] sm:$0xff] }
 0x3a3   : > { %v7075_v36 = vpop.f32.mrf.mxu1  ;;  %3344 = vmatpush1.msra.mxu1 %v3316_v58  ;;  %v3312_v58 = vld [vmem:[%s8014_s15 + $0x50] sm:$0xff] }
 0x3a4   : > { %3345 = vmatprep.subr.mxu1 %v8103_v48 }
 0x3a5   : > { %v5023_v8 = vpop.f32.mrf.mxu1 }
 0x3a6   : > { %v7078_v30 = vadd.f32 %v5023_v8, %v7035_v15 }
 0x3a7   : > { %v7080_v6 = vpop.f32.mrf.mxu1 }
 0x3a9   : > { %v5026_v38 = vpop.f32.mrf.mxu1 }
 0x3aa   : > { %v7083_v28 = vadd.f32 %v5026_v38, %v7035_v15 }
 0x3ab   : > { %v7085_v32 = vpop.f32.mrf.mxu1 }
 0x3ad   : > { %v5029_v5 = vpop.f32.mrf.mxu1 }
 0x3ae   : > { %v7088_v51 = vadd.f32 %v5029_v5, %v7035_v15 }
 0x3af   : > { %v7090_v17 = vpop.f32.mrf.mxu1 }
 0x3b1   : > { %v5032_v42 = vpop.f32.mrf.mxu1 }
 0x3b2   : > { %v7093_v61 = vadd.f32 %v5032_v42, %v7035_v15 }
 0x3b3   : > { %v7095_v33 = vpop.f32.mrf.mxu1 }
 0x3b5   : > { %v5035_v0 = vpop.f32.mrf.mxu1 }
 0x3b6   : > { %v7098_v16 = vadd.f32 %v5035_v0, %v7035_v15  ;;  %v3315_v0 = vld [vmem:[%s8014_s15 + $0x68] sm:$0xff] }
 0x3b7   : > { %v7100_v54 = vpop.f32.mrf.mxu1  ;;  %3346 = vmatpush1.msra.mxu1 %v3315_v0  ;;  %v3311_v0 = vld [vmem:[%s8014_s15 + $0x48] sm:$0xff] }
 0x3b8   : > { %3347 = vmatprep.subr.mxu1 %v8103_v48 }
 0x3b9   : > { %v5038_v57 = vpop.f32.mrf.mxu1 }
 0x3ba   : > { %v7103_v14 = vadd.f32 %v5038_v57, %v7035_v15 }
 0x3bb   : > { %v7105_v10 = vpop.f32.mrf.mxu1 }
 0x3bd   : > { %v5041_v1 = vpop.f32.mrf.mxu1 }
 0x3be   : > { %v7108_v9 = vadd.f32 %v5041_v1, %v7035_v15 }
 0x3bf   : > { %v7110_v34 = vpop.f32.mrf.mxu1 }
 0x3c1   : > { %v5044_v37 = vpop.f32.mrf.mxu1 }
 0x3c2   : > { %v7113_v12 = vadd.f32 %v5044_v37, %v7035_v15 }
 0x3c3   : > { %v7115_v21 = vpop.f32.mrf.mxu1 }
 0x3c5   : > { %v2623_v29 = vpop.f32.mrf.mxu1 }
 0x3c6   : > { %v2624_v25 = vadd.f32 %v7120_v39, %v2623_v29 }
 0x3c7   : > { %v2625_v47 = vpop.f32.mrf.mxu1 }
 0x3c8   : > { %v2782_v60 = vmul.f32 0.5, %v2624_v25  ;;  %v3314_v25 = vld [vmem:[%s8014_s15 + $0x60] sm:$0xff] }
 0x3c9   : > { %v2628_v40 = vpop.f32.mrf.mxu1  ;;  %3348 = vmatpush1.msra.mxu1 %v3314_v25 }
 0x3ca   : > { %5422 = vtanh.f32 %v2782_v60  ;;  %v2629_v45 = vadd.f32 %v7120_v39, %v2628_v40  ;;  %3349 = vmatprep.subr.mxu1 %v8103_v48 }
 0x3cb   : > { %v2630_v8 = vpop.f32.mrf.mxu1 }
 0x3cc   : > { %v2783_v38 = vmul.f32 0.5, %v2629_v45  ;;  %v3313_v45 = vld [vmem:[%s8014_s15 + $0x58] sm:$0xff] }
 0x3cd   : > { %v2633_v5 = vpop.f32.mrf.mxu1  ;;  %3350 = vmatpush1.msra.mxu1 %v3313_v45 }
 0x3ce   : > { %5424 = vtanh.f32 %v2783_v38  ;;  %v2634_v42 = vadd.f32 %v7120_v39, %v2633_v5  ;;  %3351 = vmatprep.subr.mxu1 %v8103_v48 }
 0x3cf   : > { %v2635_v57 = vpop.f32.mrf.mxu1  ;;  %3352 = vmatpush1.msra.mxu1 %v3312_v58 }
 0x3d0   : > { %v2784_v1 = vmul.f32 0.5, %v2634_v42  ;;  %3353 = vmatprep.subr.mxu1 %v8103_v48 }
 0x3d1   : > { %v2638_v37 = vpop.f32.mrf.mxu1  ;;  %3354 = vmatpush1.msra.mxu1 %v3311_v0 }
 0x3d2   : > { %5426 = vtanh.f32 %v2784_v1  ;;  %v2639_v29 = vadd.f32 %v7120_v39, %v2638_v37  ;;  %3355 = vmatprep.subr.mxu1 %v8103_v48 }
 0x3d3   : > { %v2640_v2 = vpop.f32.mrf.mxu1 }
 0x3d4   : > { %v2785_v47 = vmul.f32 0.5, %v2639_v29  ;;  %v3310_v29 = vld [vmem:[%s8014_s15 + $0x40] sm:$0xff] }
 0x3d5   : > { %v2643_v60 = vpop.f32.mrf.mxu1  ;;  %3356 = vmatpush1.msra.mxu1 %v3310_v29 }
 0x3d6   : > { %5428 = vtanh.f32 %v2785_v47  ;;  %v2644_v40 = vadd.f32 %v7120_v39, %v2643_v60  ;;  %3357 = vmatprep.subr.mxu1 %v8103_v48 }
 0x3d7   : > { %v5423_v8 = vpop.eup %5422  ;;  %v2645_v38 = vpop.f32.mrf.mxu1 }
 0x3d8   : > { %v2846_v5 = vmul.f32 0.5, %v5423_v8  ;;  %v2786_v42 = vmul.f32 0.5, %v2644_v40  ;;  %v3309_v40 = vld [vmem:[%s8014_s15 + $0x38] sm:$0xff]  ;;  %v3308_v38 = vld [vmem:[%s8014_s15 + $0x30] sm:$0xff] }
 0x3d9   : > { %v2648_v57 = vpop.f32.mrf.mxu1  ;;  %3358 = vmatpush1.msra.mxu1 %v3309_v40 }
 0x3da   : > { %v2878_v1 = vadd.f32 0.5, %v2846_v5  ;;  %5430 = vtanh.f32 %v2786_v42  ;;  %v2649_v37 = vadd.f32 %v7120_v39, %v2648_v57  ;;  %3359 = vmatprep.subr.mxu1 %v8103_v48 }
 0x3db   : > { %v5425_v25 = vpop.eup %5424  ;;  %v2650_v2 = vpop.f32.mrf.mxu1  ;;  %3360 = vmatpush1.msra.mxu1 %v3308_v38  ;;  %v3304_v38 = vld [vmem:[%s8014_s15 + $0x10] sm:$0xff] }
 0x3dc   : > { %v2787_v47 = vmul.f32 0.5, %v2649_v37  ;;  %3014 = vmatmul.mubr.f32.vlgmr.msra.gmra.mxu0 %v2878_v1  ;;  %v2847_v60 = vmul.f32 0.5, %v5425_v25  ;;  %3361 = vmatprep.subr.mxu1 %v8103_v48  ;;  %v3306_v25 = vld [vmem:[%s8014_s15 + $0x20] sm:$0xff] }
 0x3dd   : > { %v2653_v45 = vpop.f32.mrf.mxu1  ;;  %3018 = vmatprep.mubr.f32.mxu0 %v6328_v13  ;;  %v3307_v13 = vld [vmem:[%s8014_s15 + $0x28] sm:$0xff] }
 0x3de   : > { %5432 = vtanh.f32 %v2787_v47  ;;  %v2654_v58 = vadd.f32 %v7120_v39, %v2653_v45  ;;  %v2879_v8 = vadd.f32 0.5, %v2847_v60  ;;  %3362 = vmatpush1.msra.mxu1 %v3307_v13 }
 0x3df   : > { %v5427_v5 = vpop.eup %5426  ;;  %v2655_v42 = vpop.f32.mrf.mxu1  ;;  %3363 = vmatprep.subr.mxu1 %v8103_v48 }
 0x3e0   : > { %v2788_v0 = vmul.f32 0.5, %v2654_v58  ;;  %3019 = vmatmul.mubr.f32.gmra.mxu0 %v2879_v8  ;;  %v2848_v57 = vmul.f32 0.5, %v5427_v5  ;;  %3364 = vmatpush1.msra.mxu1 %v3306_v25 }
 0x3e1   : > { %v2658_v1 = vpop.f32.mrf.mxu1  ;;  %3023 = vmatprep.mubr.f32.mxu0 %v6345_v43  ;;  %v3305_v43 = vld [vmem:[%s8014_s15 + $0x18] sm:$0xff]  ;;  %3365 = vmatprep.subr.mxu1 %v8103_v48 }
 0x3e2   : > { %5434 = vtanh.f32 %v2788_v0  ;;  %v2659_v37 = vadd.f32 %v7120_v39, %v2658_v1  ;;  %v2880_v29 = vadd.f32 0.5, %v2848_v57  ;;  %3366 = vmatpush1.msra.mxu1 %v3305_v43 }
 0x3e3   : > { %v5429_v2 = vpop.eup %5428  ;;  %v2660_v47 = vpop.f32.mrf.mxu1  ;;  %3367 = vmatprep.subr.mxu1 %v8103_v48 }
 0x3e4   : > { %v2789_v60 = vmul.f32 0.5, %v2659_v37  ;;  %3024 = vmatmul.mubr.f32.gmra.mxu0 %v2880_v29  ;;  %v2849_v40 = vmul.f32 0.5, %v5429_v2  ;;  %3368 = vmatpush1.msra.mxu1 %v3304_v38  ;;  %v3302_v29 = vld [vmem:[%s8014_s15] sm:$0xff] }
 0x3e5   : > { %v2663_v45 = vpop.f32.mrf.mxu1  ;;  %3028 = vmatprep.mubr.f32.mxu0 %v6351_v24  ;;  %v3303_v24 = vld [vmem:[%s8014_s15 + $0x8] sm:$0xff]  ;;  %3369 = vmatprep.subr.mxu1 %v8103_v48 }
 0x3e6   : > { %5436 = vtanh.f32 %v2789_v60  ;;  %v2664_v58 = vadd.f32 %v7120_v39, %v2663_v45  ;;  %v2881_v8 = vadd.f32 0.5, %v2849_v40  ;;  %3370 = vmatpush1.msra.mxu1 %v3303_v24 }
 0x3e7   : > { %v5431_v5 = vpop.eup %5430  ;;  %v2665_v42 = vpop.f32.mrf.mxu1  ;;  %3371 = vmatprep.subr.mxu1 %v8103_v48 }
 0x3e8   : > { %v2790_v0 = vmul.f32 0.5, %v2664_v58  ;;  %3029 = vmatmul.mubr.f32.gmra.mxu0 %v2881_v8  ;;  %v2850_v57 = vmul.f32 0.5, %v5431_v5  ;;  %3372 = vmatpush1.msra.mxu1 %v3302_v29  ;;  %v3332_v58 = vld [vmem:[%s8014_s15 + $0xf0] sm:$0xff] }
 0x3e9   : > { %v2668_v13 = vpop.f32.mrf.mxu1  ;;  %3033 = vmatprep.mubr.f32.mxu0 %v6363_v7  ;;  %v3333_v7 = vld [vmem:[%s8014_s15 + $0xf8] sm:$0xff]  ;;  %3373 = vmatprep.subr.mxu1 %v8103_v48 }
 0x3ea   : > { %5438 = vtanh.f32 %v2790_v0  ;;  %v2669_v1 = vadd.f32 %v7120_v39, %v2668_v13  ;;  %v2882_v37 = vadd.f32 0.5, %v2850_v57  ;;  %3374 = vmatpush2.msra.mxu1 %v3333_v7  ;;  %v3330_v13 = vld [vmem:[%s8014_s15 + $0xe0] sm:$0xff]  ;;  %v3328_v7 = vld [vmem:[%s8014_s15 + $0xd0] sm:$0xff] }
 0x3eb   : > { %v5433_v25 = vpop.eup %5432  ;;  %v2670_v2 = vpop.f32.mrf.mxu1  ;;  %3375 = vmatprep.subr.mxu1 %v8103_v48 }
 0x3ec   : > { %v2791_v47 = vmul.f32 0.5, %v2669_v1  ;;  %3034 = vmatmul.mubr.f32.gmra.mxu0 %v2882_v37  ;;  %v2851_v60 = vmul.f32 0.5, %v5433_v25  ;;  %3376 = vmatpush2.msra.mxu1 %v3332_v58 }
 0x3ed   : > { %v2673_v40 = vpop.f32.mrf.mxu1  ;;  %3038 = vmatprep.mubr.f32.mxu0 %v6368_v22  ;;  %v3331_v22 = vld [vmem:[%s8014_s15 + $0xe8] sm:$0xff]  ;;  %3377 = vmatprep.subr.mxu1 %v8103_v48 }
 0x3ee   : > { %5440 = vtanh.f32 %v2791_v47  ;;  %v2674_v43 = vadd.f32 %v7120_v39, %v2673_v40  ;;  %v2883_v45 = vadd.f32 0.5, %v2851_v60  ;;  %3378 = vmatpush2.msra.mxu1 %v3331_v22 }
 0x3ef   : > { %v5435_v8 = vpop.eup %5434  ;;  %v2675_v38 = vpop.f32.mrf.mxu1  ;;  %3379 = vmatprep.subr.mxu1 %v8103_v48 }
 0x3f0   : > { %v2792_v5 = vmul.f32 0.5, %v2674_v43  ;;  %3039 = vmatmul.mubr.f32.gmra.mxu0 %v2883_v45  ;;  %v2852_v42 = vmul.f32 0.5, %v5435_v8  ;;  %3380 = vmatpush2.msra.mxu1 %v3330_v13 }
 0x3f1   : > { %v2678_v0 = vpop.f32.mrf.mxu1  ;;  %3043 = vmatprep.mubr.f32.mxu0 %v6380_v46  ;;  %v3329_v46 = vld [vmem:[%s8014_s15 + $0xd8] sm:$0xff]  ;;  %3381 = vmatprep.subr.mxu1 %v8103_v48 }
 0x3f2   : > { %5442 = vtanh.f32 %v2792_v5  ;;  %v2679_v57 = vadd.f32 %v7120_v39, %v2678_v0  ;;  %v2884_v24 = vadd.f32 0.5, %v2852_v42  ;;  %3382 = vmatpush2.msra.mxu1 %v3329_v46  ;;  %v3326_v42 = vld [vmem:[%s8014_s15 + $0xc0] sm:$0xff] }
 0x3f3   : > { %v5437_v1 = vpop.eup %5436  ;;  %v2680_v37 = vpop.f32.mrf.mxu1  ;;  %3383 = vmatprep.subr.mxu1 %v8103_v48 }
 0x3f4   : > { %v2793_v29 = vmul.f32 0.5, %v2679_v57  ;;  %3044 = vmatmul.mubr.f32.gmra.mxu0 %v2884_v24  ;;  %v2853_v25 = vmul.f32 0.5, %v5437_v1  ;;  %3384 = vmatpush2.msra.mxu1 %v3328_v7 }
 0x3f5   : > { %v2683_v2 = vpop.f32.mrf.mxu1  ;;  %3048 = vmatprep.mubr.f32.mxu0 %v6385_v4  ;;  %v3327_v4 = vld [vmem:[%s8014_s15 + $0xc8] sm:$0xff]  ;;  %3385 = vmatprep.subr.mxu1 %v8103_v48 }
 0x3f6   : > { %5444 = vtanh.f32 %v2793_v29  ;;  %v2684_v47 = vadd.f32 %v7120_v39, %v2683_v2  ;;  %v2885_v60 = vadd.f32 0.5, %v2853_v25  ;;  %3386 = vmatpush2.msra.mxu1 %v3327_v4  ;;  %v3324_v29 = vld [vmem:[%s8014_s15 + $0xb0] sm:$0xff] }
 0x3f7   : > { %v5439_v40 = vpop.eup %5438  ;;  %v2685_v43 = vpop.f32.mrf.mxu1  ;;  %3387 = vmatprep.subr.mxu1 %v8103_v48 }
 0x3f8   : > { %v2794_v45 = vmul.f32 0.5, %v2684_v47  ;;  %3049 = vmatmul.mubr.f32.gmra.mxu0 %v2885_v60  ;;  %v2854_v58 = vmul.f32 0.5, %v5439_v40  ;;  %3388 = vmatpush2.msra.mxu1 %v3326_v42 }
 0x3f9   : > { %v2688_v8 = vpop.f32.mrf.mxu1  ;;  %3053 = vmatprep.mubr.f32.mxu0 %v6397_v23  ;;  %v3325_v23 = vld [vmem:[%s8014_s15 + $0xb8] sm:$0xff]  ;;  %3389 = vmatprep.subr.mxu1 %v8103_v48 }
 0x3fa   : > { %5446 = vtanh.f32 %v2794_v45  ;;  %v2689_v38 = vadd.f32 %v7120_v39, %v2688_v8  ;;  %v2886_v5 = vadd.f32 0.5, %v2854_v58  ;;  %3390 = vmatpush2.msra.mxu1 %v3325_v23 }
 0x3fb   : > { %v5441_v22 = vpop.eup %5440  ;;  %v2690_v0 = vpop.f32.mrf.mxu1  ;;  %3391 = vmatprep.subr.mxu1 %v8103_v48 }
 0x3fc   : > { %v2795_v57 = vmul.f32 0.5, %v2689_v38  ;;  %3054 = vmatmul.mubr.f32.gmra.mxu0 %v2886_v5  ;;  %v2855_v24 = vmul.f32 0.5, %v5441_v22  ;;  %3392 = vmatpush2.msra.mxu1 %v3324_v29 }
 0x3fd   : > { %v2693_v13 = vpop.f32.mrf.mxu1  ;;  %3058 = vmatprep.mubr.f32.mxu0 %v6402_v35  ;;  %v3323_v35 = vld [vmem:[%s8014_s15 + $0xa8] sm:$0xff]  ;;  %3393 = vmatprep.subr.mxu1 %v8103_v48 }
 0x3fe   : > { %5448 = vtanh.f32 %v2795_v57  ;;  %v2694_v1 = vadd.f32 %v7120_v39, %v2693_v13  ;;  %v2887_v37 = vadd.f32 0.5, %v2855_v24  ;;  %3394 = vmatpush2.msra.mxu1 %v3323_v35  ;;  %v8130_v24 = vld [vmem:[#allocation2_spill] sm:$0xff] }
 0x3ff   : > { %v5443_v25 = vpop.eup %5442  ;;  %v2695_v46 = vpop.f32.mrf.mxu1  ;;  %3395 = vmatprep.subr.mxu1 %v8103_v48 }
 0x400   : > { %v2796_v2 = vmul.f32 0.5, %v2694_v1  ;;  %3059 = vmatmul.mubr.f32.gmra.mxu0 %v2887_v37  ;;  %v2856_v47 = vmul.f32 0.5, %v5443_v25  ;;  %v8131_v46 = vld [vmem:[#allocation3_spill] sm:$0xff] }
 0x401   : > { %v2698_v60 = vpop.f32.mrf.mxu1  ;;  %3063 = vmatprep.mubr.f32.mxu0 %v6414_v62 }
 0x402   : > { %5450 = vtanh.f32 %v2796_v2  ;;  %v2699_v7 = vadd.f32 %v7120_v39, %v2698_v60  ;;  %v2888_v40 = vadd.f32 0.5, %v2856_v47 }
 0x403   : > { %v5445_v43 = vpop.eup %5444  ;;  %v2700_v45 = vpop.f32.mrf.mxu1 }
 0x404   : > { %v2797_v58 = vmul.f32 0.5, %v2699_v7  ;;  %3064 = vmatmul.mubr.f32.gmra.mxu0 %v2888_v40  ;;  %v2857_v4 = vmul.f32 0.5, %v5445_v43  ;;  %v8132_v45 = vld [vmem:[#allocation4_spill] sm:$0xff] }
 0x405   : > { %v2703_v8 = vpop.f32.mrf.mxu1  ;;  %3068 = vmatprep.mubr.f32.mxu0 %v6419_v3 }
 0x406   : > { %5452 = vtanh.f32 %v2797_v58  ;;  %v2704_v62 = vadd.f32 %v7120_v39, %v2703_v8  ;;  %v2889_v38 = vadd.f32 0.5, %v2857_v4 }
 0x407   : > { %v5447_v5 = vpop.eup %5446  ;;  %v2705_v42 = vpop.f32.mrf.mxu1 }
 0x408   : > { %v2798_v22 = vmul.f32 0.5, %v2704_v62  ;;  %3069 = vmatmul.mubr.f32.gmra.mxu0 %v2889_v38  ;;  %v2858_v0 = vmul.f32 0.5, %v5447_v5 }
 0x409   : > { %v2708_v57 = vpop.f32.mrf.mxu1  ;;  %3073 = vmatprep.mubr.f32.mxu0 %v8130_v24 }
 0x40a   : > { %5454 = vtanh.f32 %v2798_v22  ;;  %v2709_v23 = vadd.f32 %v7120_v39, %v2708_v57  ;;  %v2890_v13 = vadd.f32 0.5, %v2858_v0  ;;  %v8133_v22 = vld [vmem:[#allocation5_spill] sm:$0xff] }
 0x40b   : > { %v5449_v1 = vpop.eup %5448  ;;  %v2710_v37 = vpop.f32.mrf.mxu1 }
 0x40c   : > { %v2799_v29 = vmul.f32 0.5, %v2709_v23  ;;  %3074 = vmatmul.mubr.f32.gmra.mxu0 %v2890_v13  ;;  %v2859_v3 = vmul.f32 0.5, %v5449_v1 }
 0x40d   : > { %v2713_v25 = vpop.f32.mrf.mxu1  ;;  %3078 = vmatprep.mubr.f32.mxu0 %v8131_v46 }
 0x40e   : > { %5456 = vtanh.f32 %v2799_v29  ;;  %v2714_v2 = vadd.f32 %v7120_v39, %v2713_v25  ;;  %v2891_v47 = vadd.f32 0.5, %v2859_v3  ;;  %v8134_v29 = vld [vmem:[#allocation6_spill] sm:$0xff] }
 0x40f   : > { %v5451_v35 = vpop.eup %5450  ;;  %v2715_v60 = vpop.f32.mrf.mxu1 }
 0x410   : > { %v2800_v7 = vmul.f32 0.5, %v2714_v2  ;;  %3079 = vmatmul.mubr.f32.gmra.mxu0 %v2891_v47  ;;  %v2860_v40 = vmul.f32 0.5, %v5451_v35 }
 0x411   : > { %v2718_v43 = vpop.f32.mrf.mxu1  ;;  %3083 = vmatprep.mubr.f32.mxu0 %v8132_v45 }
 0x412   : > { %5458 = vtanh.f32 %v2800_v7  ;;  %v2719_v58 = vadd.f32 %v7120_v39, %v2718_v43  ;;  %v2892_v4 = vadd.f32 0.5, %v2860_v40  ;;  %v8135_v7 = vld [vmem:[#allocation7_spill] sm:$0xff] }
 0x413   : > { %v5453_v8 = vpop.eup %5452  ;;  %v2720_v62 = vpop.f32.mrf.mxu1 }
 0x414   : > { %v2801_v38 = vmul.f32 0.5, %v2719_v58  ;;  %3084 = vmatmul.mubr.f32.gmra.mxu0 %v2892_v4  ;;  %v2861_v5 = vmul.f32 0.5, %v5453_v8 }
 0x415   : > { %v2723_v42 = vpop.f32.mrf.mxu1  ;;  %3088 = vmatprep.mubr.f32.mxu0 %v8133_v22 }
 0x416   : > { %5460 = vtanh.f32 %v2801_v38  ;;  %v2724_v0 = vadd.f32 %v7120_v39, %v2723_v42  ;;  %v2893_v57 = vadd.f32 0.5, %v2861_v5  ;;  %v8136_v38 = vld [vmem:[#allocation8_spill] sm:$0xff] }
 0x417   : > { %v5455_v24 = vpop.eup %5454  ;;  %v2725_v23 = vpop.f32.mrf.mxu1 }
 0x418   : > { %v2862_v13 = vmul.f32 0.5, %v5455_v24  ;;  %v2802_v1 = vmul.f32 0.5, %v2724_v0  ;;  %3089 = vmatmul.mubr.f32.gmra.mxu0 %v2893_v57 }
 0x419   : > { %v2728_v37 = vpop.f32.mrf.mxu1  ;;  %3093 = vmatprep.mubr.f32.mxu0 %v8134_v29 }
 0x41a   : > { %v2894_v3 = vadd.f32 0.5, %v2862_v13  ;;  %5462 = vtanh.f32 %v2802_v1  ;;  %v2729_v25 = vadd.f32 %v7120_v39, %v2728_v37  ;;  %v8137_v13 = vld [vmem:[#allocation9_spill] sm:$0xff] }
 0x41b   : > { %v5457_v46 = vpop.eup %5456  ;;  %v2730_v2 = vpop.f32.mrf.mxu1 }
 0x41c   : > { %v2863_v47 = vmul.f32 0.5, %v5457_v46  ;;  %v2803_v35 = vmul.f32 0.5, %v2729_v25  ;;  %3094 = vmatmul.mubr.f32.gmra.mxu0 %v2894_v3 }
 0x41d   : > { %v2733_v60 = vpop.f32.mrf.mxu1  ;;  %3098 = vmatprep.mubr.f32.mxu0 %v8135_v7 }
 0x41e   : > { %v2895_v40 = vadd.f32 0.5, %v2863_v47  ;;  %5464 = vtanh.f32 %v2803_v35  ;;  %v2734_v43 = vadd.f32 %v7120_v39, %v2733_v60  ;;  %v8138_v47 = vld [vmem:[#allocation10_spill] sm:$0xff] }
 0x41f   : > { %v5459_v45 = vpop.eup %5458  ;;  %v2735_v58 = vpop.f32.mrf.mxu1  ;;  %v3322_v35 = vld [vmem:[%s8014_s15 + $0xa0] sm:$0xff] }
 0x420   : > { %v2864_v4 = vmul.f32 0.5, %v5459_v45  ;;  %v2804_v8 = vmul.f32 0.5, %v2734_v43  ;;  %3099 = vmatmul.mubr.f32.gmra.mxu0 %v2895_v40  ;;  %3396 = vmatpush2.msra.mxu1 %v3322_v35  ;;  %v3321_v45 = vld [vmem:[%s8014_s15 + $0x98] sm:$0xff] }
 0x421   : > { %v2738_v62 = vpop.f32.mrf.mxu1  ;;  %3103 = vmatprep.mubr.f32.mxu0 %v8136_v38  ;;  %3397 = vmatprep.subr.mxu1 %v8103_v48  ;;  %v3320_v38 = vld [vmem:[%s8014_s15 + $0x90] sm:$0xff] }
 0x422   : > { %v2896_v5 = vadd.f32 0.5, %v2864_v4  ;;  %5466 = vtanh.f32 %v2804_v8  ;;  %v2739_v42 = vadd.f32 %v7120_v39, %v2738_v62  ;;  %3398 = vmatpush2.msra.mxu1 %v3321_v45  ;;  %v8139_v62 = vld [vmem:[#allocation11_spill] sm:$0xff] }
 0x423   : > { %v5461_v22 = vpop.eup %5460  ;;  %v2740_v0 = vpop.f32.mrf.mxu1  ;;  %3399 = vmatprep.subr.mxu1 %v8103_v48 }
 0x424   : > { %v2865_v57 = vmul.f32 0.5, %v5461_v22  ;;  %v2805_v24 = vmul.f32 0.5, %v2739_v42  ;;  %3104 = vmatmul.mubr.f32.gmra.mxu0 %v2896_v5  ;;  %3400 = vmatpush2.msra.mxu1 %v3320_v38 }
 0x425   : > { %v2743_v23 = vpop.f32.mrf.mxu1  ;;  %3108 = vmatprep.mubr.f32.mxu0 %v8137_v13  ;;  %3401 = vmatprep.subr.mxu1 %v8103_v48 }
 0x426   : > { %v2897_v1 = vadd.f32 0.5, %v2865_v57  ;;  %5468 = vtanh.f32 %v2805_v24  ;;  %v2744_v37 = vadd.f32 %v7120_v39, %v2743_v23  ;;  %v3319_v57 = vld [vmem:[%s8014_s15 + $0x88] sm:$0xff] }
 0x427   : > { %v5463_v29 = vpop.eup %5462  ;;  %v2745_v3 = vpop.f32.mrf.mxu1  ;;  %3402 = vmatpush2.msra.mxu1 %v3319_v57 }
 0x428   : > { %v2866_v25 = vmul.f32 0.5, %v5463_v29  ;;  %v2806_v46 = vmul.f32 0.5, %v2744_v37  ;;  %3109 = vmatmul.mubr.f32.gmra.mxu0 %v2897_v1  ;;  %v8140_v1 = vld [vmem:[#allocation12_spill] sm:$0xff]  ;;  %3403 = vmatprep.subr.mxu1 %v8103_v48  ;;  %v3318_v37 = vld [vmem:[%s8014_s15 + $0x80] sm:$0xff] }
 0x429   : > { %v2748_v2 = vpop.f32.mrf.mxu1  ;;  %3113 = vmatprep.mubr.f32.mxu0 %v8138_v47  ;;  %3404 = vmatpush2.msra.mxu1 %v3318_v37 }
 0x42a   : > { %v2898_v60 = vadd.f32 0.5, %v2866_v25  ;;  %5470 = vtanh.f32 %v2806_v46  ;;  %v2749_v7 = vadd.f32 %v7120_v39, %v2748_v2 }
 0x42b   : > { %v5465_v40 = vpop.eup %5464  ;;  %v2750_v43 = vpop.f32.mrf.mxu1 }
 0x42c   : > { %v2867_v58 = vmul.f32 0.5, %v5465_v40  ;;  %v2807_v4 = vmul.f32 0.5, %v2749_v7  ;;  %3114 = vmatmul.mubr.f32.gmra.mxu0 %v2898_v60  ;;  %v8141_v60 = vld [vmem:[#allocation13_spill] sm:$0xff] }
 0x42d   : > { %v2753_v8 = vpop.f32.mrf.mxu1  ;;  %3118 = vmatprep.mubr.f32.mxu0 %v8139_v62  ;;  %v8142_v62 = vld [vmem:[#allocation14_spill] sm:$0xff] }
 0x42e   : > { %v2899_v5 = vadd.f32 0.5, %v2867_v58  ;;  %5472 = vtanh.f32 %v2807_v4  ;;  %v2754_v42 = vadd.f32 %v7120_v39, %v2753_v8 }
 0x42f   : > { %v5467_v22 = vpop.eup %5466  ;;  %v2755_v0 = vpop.f32.mrf.mxu1 }
 0x430   : > { %v2868_v24 = vmul.f32 0.5, %v5467_v22  ;;  %v2808_v23 = vmul.f32 0.5, %v2754_v42  ;;  %3119 = vmatmul.mubr.f32.gmra.mxu0 %v2899_v5  ;;  %v1856_v22 = vadd.f32 %v7035_v15, %v7040_v50 }
 0x431   : > { %v2758_v13 = vpop.f32.mrf.mxu1  ;;  %3123 = vmatprep.mubr.f32.mxu0 %v8140_v1 }
 0x432   : > { %v2900_v29 = vadd.f32 0.5, %v2868_v24  ;;  %5474 = vtanh.f32 %v2808_v23  ;;  %v2759_v3 = vadd.f32 %v7120_v39, %v2758_v13  ;;  %v8143_v13 = vld [vmem:[#allocation15_spill] sm:$0xff] }
 0x433   : > { %v5469_v25 = vpop.eup %5468  ;;  %v2760_v46 = vpop.f32.mrf.mxu1 }
 0x434   : > { %v2869_v2 = vmul.f32 0.5, %v5469_v25  ;;  %v2809_v47 = vmul.f32 0.5, %v2759_v3  ;;  %3124 = vmatmul.mubr.f32.gmra.mxu0 %v2900_v29  ;;  %v2014_v3 = vmul.f32 0.5, %v1856_v22 }
 0x435   : > { %v2763_v35 = vpop.f32.mrf.mxu1  ;;  %3128 = vmatprep.mubr.f32.mxu0 %v8141_v60 }
 0x436   : > { %v2901_v7 = vadd.f32 0.5, %v2869_v2  ;;  %5476 = vtanh.f32 %v2809_v47  ;;  %v2764_v40 = vadd.f32 %v7120_v39, %v2763_v35  ;;  %v8144_v35 = vld [vmem:[#allocation16_spill] sm:$0xff] }
 0x437   : > { %v5471_v43 = vpop.eup %5470  ;;  %v2765_v45 = vpop.f32.mrf.mxu1 }
 0x438   : > { %v2870_v58 = vmul.f32 0.5, %v5471_v43  ;;  %v2810_v4 = vmul.f32 0.5, %v2764_v40  ;;  %3129 = vmatmul.mubr.f32.gmra.mxu0 %v2901_v7  ;;  %v8145_v45 = vld [vmem:[#allocation17_spill] sm:$0xff] }
 0x439   : > { %v2768_v8 = vpop.f32.mrf.mxu1  ;;  %3133 = vmatprep.mubr.f32.mxu0 %v8142_v62  ;;  %v8146_v62 = vld [vmem:[#allocation18_spill] sm:$0xff] }
 0x43a   : > { %v2902_v38 = vadd.f32 0.5, %v2870_v58  ;;  %5478 = vtanh.f32 %v2810_v4  ;;  %v2769_v5 = vadd.f32 %v7120_v39, %v2768_v8 }
 0x43b   : > { %v5473_v42 = vpop.eup %5472  ;;  %v2770_v0 = vpop.f32.mrf.mxu1 }
 0x43c   : > { %v2871_v57 = vmul.f32 0.5, %v5473_v42  ;;  %v2811_v24 = vmul.f32 0.5, %v2769_v5  ;;  %3134 = vmatmul.mubr.f32.gmra.mxu0 %v2902_v38 }
 0x43d   : > { %v2773_v23 = vpop.f32.mrf.mxu1  ;;  %3138 = vmatprep.mubr.f32.mxu0 %v8143_v13 }
 0x43e   : > { %v2903_v1 = vadd.f32 0.5, %v2871_v57  ;;  %5480 = vtanh.f32 %v2811_v24  ;;  %v2774_v37 = vadd.f32 %v7120_v39, %v2773_v23  ;;  %v8148_v23 = vld [vmem:[#allocation20_spill] sm:$0xff] }
 0x43f   : > { %v5475_v29 = vpop.eup %5474  ;;  %v2775_v25 = vpop.f32.mrf.mxu1 }
 0x440   : > { %v2872_v46 = vmul.f32 0.5, %v5475_v29  ;;  %v2812_v2 = vmul.f32 0.5, %v2774_v37  ;;  %3139 = vmatmul.mubr.f32.gmra.mxu0 %v2903_v1 }
 0x441   : > { %v2778_v47 = vpop.f32.mrf.mxu1  ;;  %3143 = vmatprep.mubr.f32.mxu0 %v8144_v35 }
 0x442   : > { %v2904_v15 = vadd.f32 0.5, %v2872_v46  ;;  %5482 = vtanh.f32 %v2812_v2  ;;  %v2779_v50 = vadd.f32 %v7120_v39, %v2778_v47  ;;  %v8147_v39 = vld [vmem:[#allocation19_spill] sm:$0xff]  ;;  %v7317_v2 = vld [vmem:[%s8013_s14] ss:$0 sm:$0xff] }
 0x443   : > { %v5477_v60 = vpop.eup %5476  ;;  %5484 = vtanh.f32 %v2014_v3  ;;  %v2780_v7 = vpop.f32.mrf.mxu1  ;;  %v8149_v3 = vld [vmem:[#allocation21_spill] sm:$0xff] }
 0x444   : > { %v2873_v40 = vmul.f32 0.5, %v5477_v60  ;;  %v2813_v43 = vmul.f32 0.5, %v2779_v50  ;;  %3144 = vmatmul.mubr.f32.gmra.mxu0 %v2904_v15  ;;  %v3709_v15 = vld [vmem:[%s8016_s17 + $0x78] sm:$0xff] }
 0x445   : > { %3148 = vmatprep.mubr.f32.mxu0 %v8145_v45  ;;  %3734 = vmatpush1.msra.mxu0 %v3709_v15 }
 0x446   : > { %v2905_v58 = vadd.f32 0.5, %v2873_v40  ;;  %5486 = vtanh.f32 %v2813_v43  ;;  %3735 = vmatprep.subr.mxu0 %v8103_v48  ;;  %v3708_v43 = vld [vmem:[%s8016_s17 + $0x70] sm:$0xff] }
 0x447   : > { %v5479_v4 = vpop.eup %5478  ;;  %3736 = vmatpush1.msra.mxu0 %v3708_v43 }
 0x448   : > { %v2874_v8 = vmul.f32 0.5, %v5479_v4  ;;  %3149 = vmatmul.mubr.f32.gmra.mxu0 %v2905_v58  ;;  %3737 = vmatprep.subr.mxu0 %v8103_v48 }
 0x449   : > { %3153 = vmatprep.mubr.f32.mxu0 %v8146_v62  ;;  %v3707_v62 = vld [vmem:[%s8016_s17 + $0x68] sm:$0xff] }
 0x44a   : > { %v2906_v38 = vadd.f32 0.5, %v2874_v8  ;;  %3738 = vmatpush1.msra.mxu0 %v3707_v62 }
 0x44b   : > { %v5481_v5 = vpop.eup %5480  ;;  %3739 = vmatprep.subr.mxu0 %v8103_v48 }
 0x44c   : > { %v2875_v42 = vmul.f32 0.5, %v5481_v5  ;;  %3154 = vmatmul.mubr.f32.gmra.mxu0 %v2906_v38 }
 0x44d   : > { %3158 = vmatprep.mubr.f32.mxu0 %v8147_v39 }
 0x44e   : > { %v2907_v22 = vadd.f32 0.5, %v2875_v42 }
 0x44f   : > { %v5483_v0 = vpop.eup %5482 }
 0x450   : > { %v5485_v57 = vpop.eup %5484  ;;  %v2876_v24 = vmul.f32 0.5, %v5483_v0  ;;  %3159 = vmatmul.mubr.f32.gmra.mxu0 %v2907_v22  ;;  %v3706_v22 = vld [vmem:[%s8016_s17 + $0x60] sm:$0xff] }
 0x451   : > { %3163 = vmatprep.mubr.f32.mxu0 %v8148_v23  ;;  %v2078_v37 = vmul.f32 0.5, %v5485_v57  ;;  %3740 = vmatpush1.msra.mxu0 %v3706_v22 }
 0x452   : > { %v2908_v13 = vadd.f32 0.5, %v2876_v24  ;;  %3741 = vmatprep.subr.mxu0 %v8103_v48 }
 0x453   : > { %v5487_v1 = vpop.eup %5486  ;;  %v2110_v46 = vadd.f32 0.5, %v2078_v37 }
 0x454   : > { %v2877_v29 = vmul.f32 0.5, %v5487_v1  ;;  %3164 = vmatmul.mubr.f32.gmra.mxu0 %v2908_v13  ;;  %v3705_v13 = vld [vmem:[%s8016_s17 + $0x58] sm:$0xff]  ;;  %v3704_v1 = vld [vmem:[%s8016_s17 + $0x50] sm:$0xff] }
 0x455   : > { %3168 = vmatprep.mubr.f32.mxu0 %v8149_v3  ;;  %3742 = vmatpush1.msra.mxu0 %v3705_v13 }
 0x456   : > { %v2909_v25 = vadd.f32 0.5, %v2877_v29  ;;  %3743 = vmatprep.subr.mxu0 %v8103_v48 }
 0x457   : > { %3744 = vmatpush1.msra.mxu0 %v3704_v1  ;;  %v3698_v1 = vld [vmem:[%s8016_s17 + $0x20] sm:$0xff] }
 0x458   : > { %3169 = vmatmul.mubr.f32.gmra.mxu0 %v2909_v25  ;;  %3745 = vmatprep.subr.mxu0 %v8103_v48 }
 0x459   : > { %3797 = vmatprep.mubr.f32.mxu0 %v2110_v46  ;;  %v3703_v46 = vld [vmem:[%s8016_s17 + $0x48] sm:$0xff] }
 0x45a   : > { %3746 = vmatpush1.msra.mxu0 %v3703_v46  ;;  %v3697_v46 = vld [vmem:[%s8016_s17 + $0x18] sm:$0xff] }
 0x45b   : > { %3747 = vmatprep.subr.mxu0 %v8103_v48 }
 0x49c   : > { %v3015_v47 = vpop.f32.mrf.mxu0 }
 0x49d   : > { %v3016_v35 = vadd.f32 %v7317_v2, %v3015_v47 }
 0x49e   : > { %v3017_v50 = vpop.f32.mrf.mxu0 }
 0x49f   : > { %v3174_v60 = vmul.f32 0.5, %v3016_v35  ;;  %v3702_v50 = vld [vmem:[%s8016_s17 + $0x40] sm:$0xff] }
 0x4a0   : > { %v3020_v7 = vpop.f32.mrf.mxu0  ;;  %3748 = vmatpush1.msra.mxu0 %v3702_v50 }
 0x4a1   : > { %5488 = vtanh.f32 %v3174_v60  ;;  %v3021_v40 = vadd.f32 %v7317_v2, %v3020_v7  ;;  %3749 = vmatprep.subr.mxu0 %v8103_v48 }
 0x4a2   : > { %v3022_v45 = vpop.f32.mrf.mxu0 }
 0x4a3   : > { %v3175_v58 = vmul.f32 0.5, %v3021_v40  ;;  %v3701_v45 = vld [vmem:[%s8016_s17 + $0x38] sm:$0xff] }
 0x4a4   : > { %v3025_v4 = vpop.f32.mrf.mxu0  ;;  %3750 = vmatpush1.msra.mxu0 %v3701_v45 }
 0x4a5   : > { %5490 = vtanh.f32 %v3175_v58  ;;  %v3026_v8 = vadd.f32 %v7317_v2, %v3025_v4  ;;  %v8150_v4 = vld [vmem:[#allocation22_spill] sm:$0xff]  ;;  %3751 = vmatprep.subr.mxu0 %v8103_v48 }
 0x4a6   : > { %v3027_v38 = vpop.f32.mrf.mxu0 }
 0x4a7   : > { %v3176_v5 = vmul.f32 0.5, %v3026_v8  ;;  %v3700_v38 = vld [vmem:[%s8016_s17 + $0x30] sm:$0xff] }
 0x4a8   : > { %v3030_v42 = vpop.f32.mrf.mxu0  ;;  %3752 = vmatpush1.msra.mxu0 %v3700_v38 }
 0x4a9   : > { %5492 = vtanh.f32 %v3176_v5  ;;  %v3031_v39 = vadd.f32 %v7317_v2, %v3030_v42  ;;  %3753 = vmatprep.subr.mxu0 %v8103_v48 }
 0x4aa   : > { %v3032_v0 = vpop.f32.mrf.mxu0 }
 0x4ab   : > { %v3177_v57 = vmul.f32 0.5, %v3031_v39  ;;  %v3699_v0 = vld [vmem:[%s8016_s17 + $0x28] sm:$0xff] }
 0x4ac   : > { %v3035_v24 = vpop.f32.mrf.mxu0  ;;  %3754 = vmatpush1.msra.mxu0 %v3699_v0 }
 0x4ad   : > { %5494 = vtanh.f32 %v3177_v57  ;;  %v3036_v23 = vadd.f32 %v7317_v2, %v3035_v24  ;;  %v8151_v24 = vld [vmem:[#allocation23_spill] sm:$0xff]  ;;  %3755 = vmatprep.subr.mxu0 %v8103_v48 }
 0x4ae   : > { %v5489_v37 = vpop.eup %5488  ;;  %v3037_v29 = vpop.f32.mrf.mxu0  ;;  %3756 = vmatpush1.msra.mxu0 %v3698_v1 }
 0x4af   : > { %v3238_v3 = vmul.f32 0.5, %v5489_v37  ;;  %v3178_v25 = vmul.f32 0.5, %v3036_v23  ;;  %3757 = vmatprep.subr.mxu0 %v8103_v48 }
 0x4b0   : > { %v3040_v47 = vpop.f32.mrf.mxu0  ;;  %3758 = vmatpush1.msra.mxu0 %v3697_v46 }
 0x4b1   : > { %v3270_v35 = vadd.f32 0.5, %v3238_v3  ;;  %5496 = vtanh.f32 %v3178_v25  ;;  %v3041_v15 = vadd.f32 %v7317_v2, %v3040_v47  ;;  %3759 = vmatprep.subr.mxu0 %v8103_v48 }
 0x4b2   : > { %v5491_v60 = vpop.eup %5490  ;;  %v3042_v7 = vpop.f32.mrf.mxu0 }
 0x4b3   : > { %v3239_v40 = vmul.f32 0.5, %v5491_v60  ;;  %v3179_v43 = vmul.f32 0.5, %v3041_v15  ;;  %3406 = vmatmul.mubr.f32.vlgmr.msra.gmra.mxu1 %v3270_v35  ;;  %v8152_v35 = vld [vmem:[#allocation24_spill] sm:$0xff] }
 0x4b4   : > { %v3045_v58 = vpop.f32.mrf.mxu0  ;;  %3410 = vmatprep.mubr.f32.mxu1 %v8150_v4  ;;  %v3696_v60 = vld [vmem:[%s8016_s17 + $0x10] sm:$0xff] }
 0x4b5   : > { %v3271_v8 = vadd.f32 0.5, %v3239_v40  ;;  %5498 = vtanh.f32 %v3179_v43  ;;  %v3046_v62 = vadd.f32 %v7317_v2, %v3045_v58  ;;  %v3695_v58 = vld [vmem:[%s8016_s17 + $0x8] sm:$0xff]  ;;  %3760 = vmatpush1.msra.mxu0 %v3696_v60 }
 0x4b6   : > { %v5493_v5 = vpop.eup %5492  ;;  %v3047_v42 = vpop.f32.mrf.mxu0  ;;  %3761 = vmatprep.subr.mxu0 %v8103_v48 }
 0x4b7   : > { %v3240_v39 = vmul.f32 0.5, %v5493_v5  ;;  %v3180_v22 = vmul.f32 0.5, %v3046_v62  ;;  %3411 = vmatmul.mubr.f32.gmra.mxu1 %v3271_v8  ;;  %v8153_v8 = vld [vmem:[#allocation25_spill] sm:$0xff]  ;;  %v3694_v5 = vld [vmem:[%s8016_s17] sm:$0xff]  ;;  %3762 = vmatpush1.msra.mxu0 %v3695_v58 }
 0x4b8   : > { %v3050_v57 = vpop.f32.mrf.mxu0  ;;  %3415 = vmatprep.mubr.f32.mxu1 %v8151_v24  ;;  %3763 = vmatprep.subr.mxu0 %v8103_v48 }
 0x4b9   : > { %v3272_v23 = vadd.f32 0.5, %v3240_v39  ;;  %5500 = vtanh.f32 %v3180_v22  ;;  %v3051_v13 = vadd.f32 %v7317_v2, %v3050_v57  ;;  %v3725_v57 = vld [vmem:[%s8016_s17 + $0xf8] sm:$0xff]  ;;  %3764 = vmatpush1.msra.mxu0 %v3694_v5 }
 0x4ba   : > { %v5495_v37 = vpop.eup %5494  ;;  %v3052_v29 = vpop.f32.mrf.mxu0  ;;  %3765 = vmatprep.subr.mxu0 %v8103_v48 }
 0x4bb   : > { %v3241_v3 = vmul.f32 0.5, %v5495_v37  ;;  %v3181_v25 = vmul.f32 0.5, %v3051_v13  ;;  %3416 = vmatmul.mubr.f32.gmra.mxu1 %v3272_v23  ;;  %v8154_v23 = vld [vmem:[#allocation26_spill] sm:$0xff]  ;;  %v3724_v37 = vld [vmem:[%s8016_s17 + $0xf0] sm:$0xff]  ;;  %3766 = vmatpush2.msra.mxu0 %v3725_v57 }
 0x4bc   : > { %v3055_v47 = vpop.f32.mrf.mxu0  ;;  %3420 = vmatprep.mubr.f32.mxu1 %v8152_v35  ;;  %3767 = vmatprep.subr.mxu0 %v8103_v48 }
 0x4bd   : > { %v3273_v15 = vadd.f32 0.5, %v3241_v3  ;;  %5502 = vtanh.f32 %v3181_v25  ;;  %v3056_v50 = vadd.f32 %v7317_v2, %v3055_v47  ;;  %v3723_v47 = vld [vmem:[%s8016_s17 + $0xe8] sm:$0xff]  ;;  %3768 = vmatpush2.msra.mxu0 %v3724_v37 }
 0x4be   : > { %v5497_v7 = vpop.eup %5496  ;;  %v3057_v40 = vpop.f32.mrf.mxu0  ;;  %3769 = vmatprep.subr.mxu0 %v8103_v48 }
 0x4bf   : > { %v3242_v43 = vmul.f32 0.5, %v5497_v7  ;;  %v3182_v45 = vmul.f32 0.5, %v3056_v50  ;;  %3421 = vmatmul.mubr.f32.gmra.mxu1 %v3273_v15  ;;  %v8155_v15 = vld [vmem:[#allocation27_spill] sm:$0xff]  ;;  %v3722_v7 = vld [vmem:[%s8016_s17 + $0xe0] sm:$0xff]  ;;  %3770 = vmatpush2.msra.mxu0 %v3723_v47 }
 0x4c0   : > { %v3060_v4 = vpop.f32.mrf.mxu0  ;;  %3425 = vmatprep.mubr.f32.mxu1 %v8153_v8  ;;  %3771 = vmatprep.subr.mxu0 %v8103_v48 }
 0x4c1   : > { %v3274_v62 = vadd.f32 0.5, %v3242_v43  ;;  %5504 = vtanh.f32 %v3182_v45  ;;  %v3061_v38 = vadd.f32 %v7317_v2, %v3060_v4  ;;  %v3721_v4 = vld [vmem:[%s8016_s17 + $0xd8] sm:$0xff]  ;;  %3772 = vmatpush2.msra.mxu0 %v3722_v7 }
 0x4c2   : > { %v5499_v42 = vpop.eup %5498  ;;  %v3062_v39 = vpop.f32.mrf.mxu0  ;;  %3773 = vmatprep.subr.mxu0 %v8103_v48 }
 0x4c3   : > { %v3243_v22 = vmul.f32 0.5, %v5499_v42  ;;  %v3183_v0 = vmul.f32 0.5, %v3061_v38  ;;  %3426 = vmatmul.mubr.f32.gmra.mxu1 %v3274_v62  ;;  %v8156_v62 = vld [vmem:[#allocation28_spill] sm:$0xff]  ;;  %3774 = vmatpush2.msra.mxu0 %v3721_v4 }
 0x4c4   : > { %v3065_v24 = vpop.f32.mrf.mxu0  ;;  %3430 = vmatprep.mubr.f32.mxu1 %v8154_v23  ;;  %v3720_v42 = vld [vmem:[%s8016_s17 + $0xd0] sm:$0xff]  ;;  %3775 = vmatprep.subr.mxu0 %v8103_v48 }
 0x4c5   : > { %v3275_v13 = vadd.f32 0.5, %v3243_v22  ;;  %5506 = vtanh.f32 %v3183_v0  ;;  %v3066_v1 = vadd.f32 %v7317_v2, %v3065_v24  ;;  %v3719_v24 = vld [vmem:[%s8016_s17 + $0xc8] sm:$0xff]  ;;  %3776 = vmatpush2.msra.mxu0 %v3720_v42 }
 0x4c6   : > { %v5501_v29 = vpop.eup %5500  ;;  %v3067_v3 = vpop.f32.mrf.mxu0  ;;  %3777 = vmatprep.subr.mxu0 %v8103_v48 }
 0x4c7   : > { %v3244_v25 = vmul.f32 0.5, %v5501_v29  ;;  %v3184_v46 = vmul.f32 0.5, %v3066_v1  ;;  %3431 = vmatmul.mubr.f32.gmra.mxu1 %v3275_v13  ;;  %v8157_v13 = vld [vmem:[#allocation29_spill] sm:$0xff]  ;;  %v3718_v29 = vld [vmem:[%s8016_s17 + $0xc0] sm:$0xff]  ;;  %3778 = vmatpush2.msra.mxu0 %v3719_v24 }
 0x4c8   : > { %v3070_v35 = vpop.f32.mrf.mxu0  ;;  %3435 = vmatprep.mubr.f32.mxu1 %v8155_v15  ;;  %3779 = vmatprep.subr.mxu0 %v8103_v48 }
 0x4c9   : > { %v3276_v50 = vadd.f32 0.5, %v3244_v25  ;;  %5508 = vtanh.f32 %v3184_v46  ;;  %v3071_v60 = vadd.f32 %v7317_v2, %v3070_v35  ;;  %v3717_v35 = vld [vmem:[%s8016_s17 + $0xb8] sm:$0xff]  ;;  %3780 = vmatpush2.msra.mxu0 %v3718_v29 }
 0x4ca   : > { %v5503_v40 = vpop.eup %5502  ;;  %v3072_v43 = vpop.f32.mrf.mxu0  ;;  %3781 = vmatprep.subr.mxu0 %v8103_v48 }
 0x4cb   : > { %v3245_v45 = vmul.f32 0.5, %v5503_v40  ;;  %v3185_v58 = vmul.f32 0.5, %v3071_v60  ;;  %3436 = vmatmul.mubr.f32.gmra.mxu1 %v3276_v50  ;;  %v8158_v50 = vld [vmem:[#allocation30_spill] sm:$0xff]  ;;  %v3716_v40 = vld [vmem:[%s8016_s17 + $0xb0] sm:$0xff]  ;;  %3782 = vmatpush2.msra.mxu0 %v3717_v35 }
 0x4cc   : > { %v3075_v8 = vpop.f32.mrf.mxu0  ;;  %3440 = vmatprep.mubr.f32.mxu1 %v8156_v62  ;;  %3783 = vmatprep.subr.mxu0 %v8103_v48 }
 0x4cd   : > { %v3277_v38 = vadd.f32 0.5, %v3245_v45  ;;  %5510 = vtanh.f32 %v3185_v58  ;;  %v3076_v5 = vadd.f32 %v7317_v2, %v3075_v8  ;;  %v3715_v8 = vld [vmem:[%s8016_s17 + $0xa8] sm:$0xff]  ;;  %3784 = vmatpush2.msra.mxu0 %v3716_v40 }
 0x4ce   : > { %v5505_v39 = vpop.eup %5504  ;;  %v3077_v22 = vpop.f32.mrf.mxu0  ;;  %3785 = vmatprep.subr.mxu0 %v8103_v48 }
 0x4cf   : > { %v3246_v0 = vmul.f32 0.5, %v5505_v39  ;;  %v3186_v57 = vmul.f32 0.5, %v3076_v5  ;;  %3441 = vmatmul.mubr.f32.gmra.mxu1 %v3277_v38  ;;  %v8159_v38 = vld [vmem:[#allocation31_spill] sm:$0xff]  ;;  %3786 = vmatpush2.msra.mxu0 %v3715_v8 }
 0x4d0   : > { %v3080_v23 = vpop.f32.mrf.mxu0  ;;  %3445 = vmatprep.mubr.f32.mxu1 %v8157_v13  ;;  %3787 = vmatprep.subr.mxu0 %v8103_v48 }
 0x4d1   : > { %v3278_v1 = vadd.f32 0.5, %v3246_v0  ;;  %5512 = vtanh.f32 %v3186_v57  ;;  %v3081_v37 = vadd.f32 %v7317_v2, %v3080_v23  ;;  %v8160_v23 = vld [vmem:[#allocation32_spill] sm:$0xff] }
 0x4d2   : > { %v5507_v3 = vpop.eup %5506  ;;  %v3082_v25 = vpop.f32.mrf.mxu0 }
 0x4d3   : > { %v3247_v46 = vmul.f32 0.5, %v5507_v3  ;;  %v3187_v47 = vmul.f32 0.5, %v3081_v37  ;;  %3446 = vmatmul.mubr.f32.gmra.mxu1 %v3278_v1 }
 0x4d4   : > { %v3085_v15 = vpop.f32.mrf.mxu0  ;;  %3450 = vmatprep.mubr.f32.mxu1 %v8158_v50 }
 0x4d5   : > { %v3279_v60 = vadd.f32 0.5, %v3247_v46  ;;  %5514 = vtanh.f32 %v3187_v47  ;;  %v3086_v7 = vadd.f32 %v7317_v2, %v3085_v15  ;;  %v8161_v47 = vld [vmem:[#allocation33_spill] sm:$0xff] }
 0x4d6   : > { %v5509_v43 = vpop.eup %5508  ;;  %v3087_v45 = vpop.f32.mrf.mxu0 }
 0x4d7   : > { %v3248_v58 = vmul.f32 0.5, %v5509_v43  ;;  %v3188_v4 = vmul.f32 0.5, %v3086_v7  ;;  %3451 = vmatmul.mubr.f32.gmra.mxu1 %v3279_v60  ;;  %v8162_v45 = vld [vmem:[#allocation34_spill] sm:$0xff] }
 0x4d8   : > { %v3090_v62 = vpop.f32.mrf.mxu0  ;;  %3455 = vmatprep.mubr.f32.mxu1 %v8159_v38 }
 0x4d9   : > { %v3280_v5 = vadd.f32 0.5, %v3248_v58  ;;  %5516 = vtanh.f32 %v3188_v4  ;;  %v3091_v42 = vadd.f32 %v7317_v2, %v3090_v62 }
 0x4da   : > { %v5511_v39 = vpop.eup %5510  ;;  %v3092_v22 = vpop.f32.mrf.mxu0 }
 0x4db   : > { %v3249_v0 = vmul.f32 0.5, %v5511_v39  ;;  %v3189_v57 = vmul.f32 0.5, %v3091_v42  ;;  %3456 = vmatmul.mubr.f32.gmra.mxu1 %v3280_v5  ;;  %v8163_v39 = vld [vmem:[#allocation35_spill] sm:$0xff] }
 0x4dc   : > { %v3095_v24 = vpop.f32.mrf.mxu0  ;;  %3460 = vmatprep.mubr.f32.mxu1 %v8160_v23 }
 0x4dd   : > { %v3281_v13 = vadd.f32 0.5, %v3249_v0  ;;  %5518 = vtanh.f32 %v3189_v57  ;;  %v3096_v1 = vadd.f32 %v7317_v2, %v3095_v24 }
 0x4de   : > { %v5513_v37 = vpop.eup %5512  ;;  %v3097_v29 = vpop.f32.mrf.mxu0 }
 0x4df   : > { %v3250_v3 = vmul.f32 0.5, %v5513_v37  ;;  %v3190_v25 = vmul.f32 0.5, %v3096_v1  ;;  %3461 = vmatmul.mubr.f32.gmra.mxu1 %v3281_v13  ;;  %v8164_v37 = vld [vmem:[#allocation36_spill] sm:$0xff] }
 0x4e0   : > { %v3100_v46 = vpop.f32.mrf.mxu0  ;;  %3465 = vmatprep.mubr.f32.mxu1 %v8161_v47 }
 0x4e1   : > { %v3282_v35 = vadd.f32 0.5, %v3250_v3  ;;  %5520 = vtanh.f32 %v3190_v25  ;;  %v3101_v15 = vadd.f32 %v7317_v2, %v3100_v46 }
 0x4e2   : > { %v5515_v50 = vpop.eup %5514  ;;  %v3102_v60 = vpop.f32.mrf.mxu0 }
 0x4e3   : > { %v3251_v7 = vmul.f32 0.5, %v5515_v50  ;;  %v3191_v40 = vmul.f32 0.5, %v3101_v15  ;;  %3466 = vmatmul.mubr.f32.gmra.mxu1 %v3282_v35  ;;  %v8165_v50 = vld [vmem:[#allocation37_spill] sm:$0xff] }
 0x4e4   : > { %v3105_v43 = vpop.f32.mrf.mxu0  ;;  %3470 = vmatprep.mubr.f32.mxu1 %v8162_v45 }
 0x4e5   : > { %v3283_v58 = vadd.f32 0.5, %v3251_v7  ;;  %5522 = vtanh.f32 %v3191_v40  ;;  %v3106_v4 = vadd.f32 %v7317_v2, %v3105_v43 }
 0x4e6   : > { %v5517_v8 = vpop.eup %5516  ;;  %v3107_v62 = vpop.f32.mrf.mxu0 }
 0x4e7   : > { %v3252_v38 = vmul.f32 0.5, %v5517_v8  ;;  %v3192_v5 = vmul.f32 0.5, %v3106_v4  ;;  %3471 = vmatmul.mubr.f32.gmra.mxu1 %v3283_v58  ;;  %v8166_v8 = vld [vmem:[#allocation38_spill] sm:$0xff] }
 0x4e8   : > { %v3110_v42 = vpop.f32.mrf.mxu0  ;;  %3475 = vmatprep.mubr.f32.mxu1 %v8163_v39 }
 0x4e9   : > { %v3284_v22 = vadd.f32 0.5, %v3252_v38  ;;  %5524 = vtanh.f32 %v3192_v5  ;;  %v3111_v0 = vadd.f32 %v7317_v2, %v3110_v42 }
 0x4ea   : > { %v5519_v57 = vpop.eup %5518  ;;  %v3112_v24 = vpop.f32.mrf.mxu0 }
 0x4eb   : > { %v3253_v23 = vmul.f32 0.5, %v5519_v57  ;;  %v3193_v13 = vmul.f32 0.5, %v3111_v0  ;;  %3476 = vmatmul.mubr.f32.gmra.mxu1 %v3284_v22  ;;  %v8167_v57 = vld [vmem:[#allocation39_spill] sm:$0xff] }
 0x4ec   : > { %v3115_v1 = vpop.f32.mrf.mxu0  ;;  %3480 = vmatprep.mubr.f32.mxu1 %v8164_v37 }
 0x4ed   : > { %v3285_v29 = vadd.f32 0.5, %v3253_v23  ;;  %5526 = vtanh.f32 %v3193_v13  ;;  %v3116_v3 = vadd.f32 %v7317_v2, %v3115_v1 }
 0x4ee   : > { %v5521_v25 = vpop.eup %5520  ;;  %v3117_v46 = vpop.f32.mrf.mxu0 }
 0x4ef   : > { %v3254_v47 = vmul.f32 0.5, %v5521_v25  ;;  %v3194_v35 = vmul.f32 0.5, %v3116_v3  ;;  %3481 = vmatmul.mubr.f32.gmra.mxu1 %v3285_v29  ;;  %v8168_v25 = vld [vmem:[#allocation40_spill] sm:$0xff] }
 0x4f0   : > { %v3120_v15 = vpop.f32.mrf.mxu0  ;;  %3485 = vmatprep.mubr.f32.mxu1 %v8165_v50 }
 0x4f1   : > { %v3286_v60 = vadd.f32 0.5, %v3254_v47  ;;  %5528 = vtanh.f32 %v3194_v35  ;;  %v3121_v7 = vadd.f32 %v7317_v2, %v3120_v15 }
 0x4f2   : > { %v5523_v40 = vpop.eup %5522  ;;  %v3122_v43 = vpop.f32.mrf.mxu0 }
 0x4f3   : > { %v3255_v45 = vmul.f32 0.5, %v5523_v40  ;;  %v3195_v58 = vmul.f32 0.5, %v3121_v7  ;;  %3486 = vmatmul.mubr.f32.gmra.mxu1 %v3286_v60  ;;  %v8169_v40 = vld [vmem:[#allocation41_spill] sm:$0xff]  ;;  %v3714_v43 = vld [vmem:[%s8016_s17 + $0xa0] sm:$0xff] }
 0x4f4   : > { %v3125_v4 = vpop.f32.mrf.mxu0  ;;  %3490 = vmatprep.mubr.f32.mxu1 %v8166_v8  ;;  %3788 = vmatpush2.msra.mxu0 %v3714_v43 }
 0x4f5   : > { %v3287_v62 = vadd.f32 0.5, %v3255_v45  ;;  %5530 = vtanh.f32 %v3195_v58  ;;  %v3126_v38 = vadd.f32 %v7317_v2, %v3125_v4  ;;  %3789 = vmatprep.subr.mxu0 %v8103_v48 }
 0x4f6   : > { %v5525_v5 = vpop.eup %5524  ;;  %v3127_v42 = vpop.f32.mrf.mxu0 }
 0x4f7   : > { %v3256_v39 = vmul.f32 0.5, %v5525_v5  ;;  %v3196_v22 = vmul.f32 0.5, %v3126_v38  ;;  %3491 = vmatmul.mubr.f32.gmra.mxu1 %v3287_v62  ;;  %v3713_v62 = vld [vmem:[%s8016_s17 + $0x98] sm:$0xff] }
 0x4f8   : > { %v3130_v0 = vpop.f32.mrf.mxu0  ;;  %3495 = vmatprep.mubr.f32.mxu1 %v8167_v57  ;;  %3790 = vmatpush2.msra.mxu0 %v3713_v62 }
 0x4f9   : > { %v3288_v24 = vadd.f32 0.5, %v3256_v39  ;;  %5532 = vtanh.f32 %v3196_v22  ;;  %v3131_v23 = vadd.f32 %v7317_v2, %v3130_v0  ;;  %v8170_v39 = vld [vmem:[#allocation42_spill] sm:$0xff]  ;;  %3791 = vmatprep.subr.mxu0 %v8103_v48  ;;  %v3712_v22 = vld [vmem:[%s8016_s17 + $0x90] sm:$0xff] }
 0x4fa   : > { %v5527_v13 = vpop.eup %5526  ;;  %v3132_v1 = vpop.f32.mrf.mxu0  ;;  %3792 = vmatpush2.msra.mxu0 %v3712_v22 }
 0x4fb   : > { %v3257_v37 = vmul.f32 0.5, %v5527_v13  ;;  %v3197_v29 = vmul.f32 0.5, %v3131_v23  ;;  %3496 = vmatmul.mubr.f32.gmra.mxu1 %v3288_v24  ;;  %3793 = vmatprep.subr.mxu0 %v8103_v48  ;;  %v3711_v13 = vld [vmem:[%s8016_s17 + $0x88] sm:$0xff] }
 0x4fc   : > { %v3135_v3 = vpop.f32.mrf.mxu0  ;;  %3500 = vmatprep.mubr.f32.mxu1 %v8168_v25  ;;  %3794 = vmatpush2.msra.mxu0 %v3711_v13  ;;  %v3710_v25 = vld [vmem:[%s8016_s17 + $0x80] sm:$0xff] }
 0x4fd   : > { %v3289_v46 = vadd.f32 0.5, %v3257_v37  ;;  %5534 = vtanh.f32 %v3197_v29  ;;  %v3136_v47 = vadd.f32 %v7317_v2, %v3135_v3  ;;  %v8171_v3 = vld [vmem:[#allocation43_spill] sm:$0xff]  ;;  %3795 = vmatprep.subr.mxu0 %v8103_v48 }
 0x4fe   : > { %v5529_v35 = vpop.eup %5528  ;;  %v3137_v15 = vpop.f32.mrf.mxu0  ;;  %3796 = vmatpush2.msra.mxu0 %v3710_v25 }
 0x4ff   : > { %v3258_v50 = vmul.f32 0.5, %v5529_v35  ;;  %v3198_v60 = vmul.f32 0.5, %v3136_v47  ;;  %3501 = vmatmul.mubr.f32.gmra.mxu1 %v3289_v46 }
 0x500   : > { %v3140_v7 = vpop.f32.mrf.mxu0  ;;  %3505 = vmatprep.mubr.f32.mxu1 %v8169_v40  ;;  %v8172_v40 = vld [vmem:[#allocation44_spill] sm:$0xff] }
 0x501   : > { %v3290_v45 = vadd.f32 0.5, %v3258_v50  ;;  %5536 = vtanh.f32 %v3198_v60  ;;  %v3141_v58 = vadd.f32 %v7317_v2, %v3140_v7 }
 0x502   : > { %v5531_v4 = vpop.eup %5530  ;;  %v3142_v8 = vpop.f32.mrf.mxu0 }
 0x503   : > { %v3259_v38 = vmul.f32 0.5, %v5531_v4  ;;  %v3199_v5 = vmul.f32 0.5, %v3141_v58  ;;  %3506 = vmatmul.mubr.f32.gmra.mxu1 %v3290_v45 }
 0x504   : > { %v3145_v42 = vpop.f32.mrf.mxu0  ;;  %3510 = vmatprep.mubr.f32.mxu1 %v8170_v39 }
 0x505   : > { %v3291_v0 = vadd.f32 0.5, %v3259_v38  ;;  %5538 = vtanh.f32 %v3199_v5  ;;  %v3146_v57 = vadd.f32 %v7317_v2, %v3145_v42  ;;  %v8173_v38 = vld [vmem:[#allocation45_spill] sm:$0xff] }
 0x506   : > { %v5533_v24 = vpop.eup %5532  ;;  %v3147_v23 = vpop.f32.mrf.mxu0 }
 0x507   : > { %v3260_v1 = vmul.f32 0.5, %v5533_v24  ;;  %v3200_v37 = vmul.f32 0.5, %v3146_v57  ;;  %3511 = vmatmul.mubr.f32.gmra.mxu1 %v3291_v0  ;;  %v8174_v23 = vld [vmem:[#allocation46_spill] sm:$0xff] }
 0x508   : > { %v3150_v29 = vpop.f32.mrf.mxu0  ;;  %3515 = vmatprep.mubr.f32.mxu1 %v8171_v3 }
 0x509   : > { %v3292_v46 = vadd.f32 0.5, %v3260_v1  ;;  %5540 = vtanh.f32 %v3200_v37  ;;  %v3151_v47 = vadd.f32 %v7317_v2, %v3150_v29 }
 0x50a   : > { %v5535_v35 = vpop.eup %5534  ;;  %v3152_v15 = vpop.f32.mrf.mxu0 }
 0x50b   : > { %v3261_v50 = vmul.f32 0.5, %v5535_v35  ;;  %v3201_v60 = vmul.f32 0.5, %v3151_v47  ;;  %3516 = vmatmul.mubr.f32.gmra.mxu1 %v3292_v46 }
 0x50c   : > { %v3155_v7 = vpop.f32.mrf.mxu0  ;;  %3520 = vmatprep.mubr.f32.mxu1 %v8172_v40  ;;  %v8175_v40 = vld [vmem:[#allocation47_spill] sm:$0xff] }
 0x50d   : > { %v3293_v43 = vadd.f32 0.5, %v3261_v50  ;;  %5542 = vtanh.f32 %v3201_v60  ;;  %v3156_v48 = vadd.f32 %v7317_v2, %v3155_v7 }
 0x50e   : > { %v5537_v45 = vpop.eup %5536  ;;  %v3157_v58 = vpop.f32.mrf.mxu0 }
 0x50f   : > { %v3262_v4 = vmul.f32 0.5, %v5537_v45  ;;  %v3202_v8 = vmul.f32 0.5, %v3156_v48  ;;  %3521 = vmatmul.mubr.f32.gmra.mxu1 %v3293_v43  ;;  %v8176_v58 = vld [vmem:[#allocation48_spill] sm:$0xff] }
 0x510   : > { %v3160_v62 = vpop.f32.mrf.mxu0  ;;  %3525 = vmatprep.mubr.f32.mxu1 %v8173_v38 }
 0x511   : > { %v3294_v5 = vadd.f32 0.5, %v3262_v4  ;;  %5544 = vtanh.f32 %v3202_v8  ;;  %v3161_v42 = vadd.f32 %v7317_v2, %v3160_v62  ;;  %v8177_v62 = vld [vmem:[#allocation49_spill] sm:$0xff] }
 0x512   : > { %v5539_v39 = vpop.eup %5538  ;;  %v3162_v22 = vpop.f32.mrf.mxu0 }
 0x513   : > { %v3263_v0 = vmul.f32 0.5, %v5539_v39  ;;  %v3203_v57 = vmul.f32 0.5, %v3161_v42  ;;  %3526 = vmatmul.mubr.f32.gmra.mxu1 %v3294_v5 }
 0x514   : > { %v3165_v24 = vpop.f32.mrf.mxu0  ;;  %3530 = vmatprep.mubr.f32.mxu1 %v8174_v23  ;;  %v7513_v23 = vld [vmem:[%s8007_s8] ss:$0 sm:$0xff] }
 0x515   : > { %v3295_v13 = vadd.f32 0.5, %v3263_v0  ;;  %5546 = vtanh.f32 %v3203_v57  ;;  %v3166_v1 = vadd.f32 %v7317_v2, %v3165_v24  ;;  %v8178_v0 = vld [vmem:[#allocation50_spill] sm:$0xff]  ;;  %v2015_v24 = vmul.f32 0.5, %v7038_v63 }
 0x516   : > { %v5541_v37 = vpop.eup %5540  ;;  %v3167_v29 = vpop.f32.mrf.mxu0 }
 0x517   : > { %v3264_v3 = vmul.f32 0.5, %v5541_v37  ;;  %v3204_v25 = vmul.f32 0.5, %v3166_v1  ;;  %3531 = vmatmul.mubr.f32.gmra.mxu1 %v3295_v13  ;;  %v1866_v13 = vadd.f32 %v7513_v23, %v7045_v31  ;;  %v1876_v31 = vadd.f32 %v7513_v23, %v7050_v20 }
 0x518   : > { %v3170_v46 = vpop.f32.mrf.mxu0  ;;  %3535 = vmatprep.mubr.f32.mxu1 %v6799_v18  ;;  %v1886_v20 = vadd.f32 %v7513_v23, %v7055_v11 }
 0x519   : > { %v3296_v47 = vadd.f32 0.5, %v3264_v3  ;;  %5548 = vtanh.f32 %v3204_v25  ;;  %v3171_v35 = vadd.f32 %v7317_v2, %v3170_v46  ;;  %v2016_v29 = vmul.f32 0.5, %v1866_v13 }
 0x51a   : > { %v5543_v15 = vpop.eup %5542  ;;  %v3172_v50 = vpop.f32.mrf.mxu0 }
 0x51b   : > { %v3265_v60 = vmul.f32 0.5, %v5543_v15  ;;  %v3205_v7 = vmul.f32 0.5, %v3171_v35  ;;  %3536 = vmatmul.mubr.f32.gmra.mxu1 %v3296_v47  ;;  %v2017_v47 = vmul.f32 0.5, %v7043_v49  ;;  %v2019_v49 = vmul.f32 0.5, %v7048_v41 }
 0x51c   : > { %3540 = vmatprep.mubr.f32.mxu1 %v8175_v40 }
 0x51d   : > { %v3297_v43 = vadd.f32 0.5, %v3265_v60  ;;  %5550 = vtanh.f32 %v3205_v7  ;;  %v2018_v7 = vmul.f32 0.5, %v1876_v31 }
 0x51e   : > { %v5545_v48 = vpop.eup %5544  ;;  %5552 = vtanh.f32 %v2015_v24 }
 0x51f   : > { %v3266_v45 = vmul.f32 0.5, %v5545_v48  ;;  %3541 = vmatmul.mubr.f32.gmra.mxu1 %v3297_v43 }
 0x520   : > { %3545 = vmatprep.mubr.f32.mxu1 %v8176_v58 }
 0x521   : > { %v3298_v4 = vadd.f32 0.5, %v3266_v45 }
 0x522   : > { %v5547_v18 = vpop.eup %5546 }
 0x523   : > { %v3267_v8 = vmul.f32 0.5, %v5547_v18  ;;  %3546 = vmatmul.mubr.f32.gmra.mxu1 %v3298_v4 }
 0x524   : > { %3550 = vmatprep.mubr.f32.mxu1 %v8177_v62 }
 0x525   : > { %v3299_v2 = vadd.f32 0.5, %v3267_v8 }
 0x526   : > { %v5549_v38 = vpop.eup %5548 }
 0x527   : > { %v3268_v5 = vmul.f32 0.5, %v5549_v38  ;;  %3551 = vmatmul.mubr.f32.gmra.mxu1 %v3299_v2  ;;  %v2020_v38 = vmul.f32 0.5, %v1886_v20 }
 0x528   : > { %3555 = vmatprep.mubr.f32.mxu1 %v6829_v53  ;;  %v7520_v53 = vld [vmem:[%s8015_s16] ss:$0 sm:$0xff] }
 0x529   : > { %v3300_v42 = vadd.f32 0.5, %v3268_v5 }
 0x52a   : > { %v5551_v39 = vpop.eup %5550 }
 0x52b   : > { %v3269_v22 = vmul.f32 0.5, %v5551_v39  ;;  %3556 = vmatmul.mubr.f32.gmra.mxu1 %v3300_v42  ;;  %v5553_v4 = vpop.eup %5552 }
 0x52c   : > { %3560 = vmatprep.mubr.f32.mxu1 %v8178_v0  ;;  %v2079_v42 = vmul.f32 0.5, %v5553_v4  ;;  %v1906_v4 = vadd.f32 %v7513_v23, %v7065_v59 }
 0x52d   : > { %v3301_v57 = vadd.f32 0.5, %v3269_v22 }
 0x52f   : > { %3561 = vmatmul.mubr.f32.gmra.mxu1 %v3301_v57  ;;  %v2021_v57 = vmul.f32 0.5, %v7053_v26 }
 0x573   : > { %v3407_v1 = vpop.f32.mrf.mxu1 }
 0x574   : > { %v3408_v37 = vadd.f32 %v7520_v53, %v3407_v1  ;;  %v1896_v1 = vadd.f32 %v7513_v23, %v7060_v55 }
 0x575   : > { %v3409_v3 = vpop.f32.mrf.mxu1 }
 0x576   : > { %v3566_v63 = vmul.f32 0.5, %v3408_v37 }
 0x577   : > { %v3412_v25 = vpop.f32.mrf.mxu1 }
 0x578   : > { %5554 = vtanh.f32 %v3566_v63  ;;  %v3413_v46 = vadd.f32 %v7520_v53, %v3412_v25 }
 0x579   : > { %5556 = vtanh.f32 %v2016_v29  ;;  %v3414_v35 = vpop.f32.mrf.mxu1  ;;  %v2111_v29 = vadd.f32 0.5, %v2079_v42 }
 0x57a   : > { %v3567_v15 = vmul.f32 0.5, %v3413_v46 }
 0x57b   : > { %v3417_v50 = vpop.f32.mrf.mxu1 }
 0x57c   : > { %5558 = vtanh.f32 %v3567_v15  ;;  %v3418_v60 = vadd.f32 %v7520_v53, %v3417_v50  ;;  %v2022_v15 = vmul.f32 0.5, %v1896_v1 }
 0x57d   : > { %5560 = vtanh.f32 %v2017_v47  ;;  %v3419_v40 = vpop.f32.mrf.mxu1 }
 0x57e   : > { %v3568_v43 = vmul.f32 0.5, %v3418_v60 }
 0x57f   : > { %v3422_v48 = vpop.f32.mrf.mxu1 }
 0x580   : > { %5562 = vtanh.f32 %v3568_v43  ;;  %v3423_v45 = vadd.f32 %v7520_v53, %v3422_v48 }
 0x581   : > { %5564 = vtanh.f32 %v2018_v7  ;;  %v3424_v58 = vpop.f32.mrf.mxu1 }
 0x582   : > { %v3569_v18 = vmul.f32 0.5, %v3423_v45  ;;  %v2023_v45 = vmul.f32 0.5, %v7058_v44 }
 0x583   : > { %v3427_v8 = vpop.f32.mrf.mxu1 }
 0x584   : > { %5566 = vtanh.f32 %v3569_v18  ;;  %v3428_v62 = vadd.f32 %v7520_v53, %v3427_v8 }
 0x585   : > { %v5555_v2 = vpop.eup %5554  ;;  %5568 = vtanh.f32 %v2019_v49  ;;  %v3429_v5 = vpop.f32.mrf.mxu1 }
 0x586   : > { %v5557_v39 = vpop.eup %5556  ;;  %v3630_v22 = vmul.f32 0.5, %v5555_v2  ;;  %v3570_v0 = vmul.f32 0.5, %v3428_v62 }
 0x587   : > { %v3432_v41 = vpop.f32.mrf.mxu1  ;;  %v2080_v3 = vmul.f32 0.5, %v5557_v39 }
 0x588   : > { %v3662_v24 = vadd.f32 0.5, %v3630_v22  ;;  %5570 = vtanh.f32 %v3570_v0  ;;  %v3433_v11 = vadd.f32 %v7520_v53, %v3432_v41  ;;  %v2024_v0 = vmul.f32 0.5, %v1906_v4 }
 0x589   : > { %v5559_v13 = vpop.eup %5558  ;;  %5572 = vtanh.f32 %v2020_v38  ;;  %v3434_v37 = vpop.f32.mrf.mxu1  ;;  %v2112_v60 = vadd.f32 0.5, %v2080_v3 }
 0x58a   : > { %v5561_v63 = vpop.eup %5560  ;;  %v3631_v25 = vmul.f32 0.5, %v5559_v13  ;;  %v3571_v46 = vmul.f32 0.5, %v3433_v11  ;;  %3798 = vmatmul.mubr.f32.vlgmr.msra.gmra.mxu0 %v3662_v24  ;;  %v2025_v37 = vmul.f32 0.5, %v7063_v52 }
 0x58b   : > { %v3437_v47 = vpop.f32.mrf.mxu1  ;;  %3802 = vmatprep.mubr.f32.mxu0 %v2111_v29  ;;  %v2081_v7 = vmul.f32 0.5, %v5561_v63 }
 0x58c   : > { %v3663_v31 = vadd.f32 0.5, %v3631_v25  ;;  %5574 = vtanh.f32 %v3571_v46  ;;  %v3438_v26 = vadd.f32 %v7520_v53, %v3437_v47  ;;  %v1916_v25 = vadd.f32 %v7513_v23, %v7070_v19 }
 0x58d   : > { %v5563_v35 = vpop.eup %5562  ;;  %5576 = vtanh.f32 %v2021_v57  ;;  %v3439_v50 = vpop.f32.mrf.mxu1  ;;  %v2113_v8 = vadd.f32 0.5, %v2081_v7 }
 0x58e   : > { %v5565_v55 = vpop.eup %5564  ;;  %v3632_v40 = vmul.f32 0.5, %v5563_v35  ;;  %v3572_v43 = vmul.f32 0.5, %v3438_v26  ;;  %3803 = vmatmul.mubr.f32.gmra.mxu0 %v3663_v31 }
 0x58f   : > { %v3442_v48 = vpop.f32.mrf.mxu1  ;;  %3807 = vmatprep.mubr.f32.mxu0 %v2112_v60  ;;  %v2082_v62 = vmul.f32 0.5, %v5565_v55  ;;  %v2026_v55 = vmul.f32 0.5, %v1916_v25 }
 0x590   : > { %v3664_v49 = vadd.f32 0.5, %v3632_v40  ;;  %5578 = vtanh.f32 %v3572_v43  ;;  %v3443_v20 = vadd.f32 %v7520_v53, %v3442_v48 }
 0x591   : > { %v5567_v58 = vpop.eup %5566  ;;  %5580 = vtanh.f32 %v2022_v15  ;;  %v3444_v18 = vpop.f32.mrf.mxu1  ;;  %v2114_v57 = vadd.f32 0.5, %v2082_v62  ;;  %v1926_v62 = vadd.f32 %v7513_v23, %v7075_v36 }
 0x592   : > { %v5569_v2 = vpop.eup %5568  ;;  %v3633_v38 = vmul.f32 0.5, %v5567_v58  ;;  %v3573_v5 = vmul.f32 0.5, %v3443_v20  ;;  %3808 = vmatmul.mubr.f32.gmra.mxu0 %v3664_v49  ;;  %v2027_v58 = vmul.f32 0.5, %v7068_v27 }
 0x593   : > { %v3447_v42 = vpop.f32.mrf.mxu1  ;;  %3812 = vmatprep.mubr.f32.mxu0 %v2113_v8  ;;  %v2083_v24 = vmul.f32 0.5, %v5569_v2 }
 0x594   : > { %v3665_v39 = vadd.f32 0.5, %v3633_v38  ;;  %5582 = vtanh.f32 %v3573_v5  ;;  %v3448_v44 = vadd.f32 %v7520_v53, %v3447_v42 }
 0x595   : > { %v5571_v22 = vpop.eup %5570  ;;  %5584 = vtanh.f32 %v2023_v45  ;;  %v3449_v41 = vpop.f32.mrf.mxu1  ;;  %v2115_v47 = vadd.f32 0.5, %v2083_v24 }
 0x596   : > { %v5573_v59 = vpop.eup %5572  ;;  %v3634_v11 = vmul.f32 0.5, %v5571_v22  ;;  %v3574_v13 = vmul.f32 0.5, %v3448_v44  ;;  %3813 = vmatmul.mubr.f32.gmra.mxu0 %v3665_v39 }
 0x597   : > { %v3452_v1 = vpop.f32.mrf.mxu1  ;;  %3817 = vmatprep.mubr.f32.mxu0 %v2114_v57  ;;  %v2084_v31 = vmul.f32 0.5, %v5573_v59  ;;  %v2028_v57 = vmul.f32 0.5, %v1926_v62 }
 0x598   : > { %v3666_v29 = vadd.f32 0.5, %v3634_v11  ;;  %5586 = vtanh.f32 %v3574_v13  ;;  %v3453_v3 = vadd.f32 %v7520_v53, %v3452_v1 }
 0x599   : > { %v5575_v63 = vpop.eup %5574  ;;  %5588 = vtanh.f32 %v2024_v0  ;;  %v3454_v46 = vpop.f32.mrf.mxu1  ;;  %v2116_v43 = vadd.f32 0.5, %v2084_v31 }
 0x59a   : > { %v5577_v26 = vpop.eup %5576  ;;  %v3635_v35 = vmul.f32 0.5, %v5575_v63  ;;  %v3575_v15 = vmul.f32 0.5, %v3453_v3  ;;  %3818 = vmatmul.mubr.f32.gmra.mxu0 %v3666_v29  ;;  %v2029_v29 = vmul.f32 0.5, %v7073_v56  ;;  %v1936_v46 = vadd.f32 %v7513_v23, %v7080_v6 }
 0x59b   : > { %v3457_v50 = vpop.f32.mrf.mxu1  ;;  %3822 = vmatprep.mubr.f32.mxu0 %v2115_v47  ;;  %v2085_v48 = vmul.f32 0.5, %v5577_v26 }
 0x59c   : > { %v3667_v60 = vadd.f32 0.5, %v3635_v35  ;;  %5590 = vtanh.f32 %v3575_v15  ;;  %v3458_v52 = vadd.f32 %v7520_v53, %v3457_v50 }
 0x59d   : > { %v5579_v7 = vpop.eup %5578  ;;  %5592 = vtanh.f32 %v2025_v37  ;;  %v3459_v40 = vpop.f32.mrf.mxu1  ;;  %v2117_v38 = vadd.f32 0.5, %v2085_v48 }
 0x59e   : > { %v5581_v19 = vpop.eup %5580  ;;  %v3636_v45 = vmul.f32 0.5, %v5579_v7  ;;  %v3576_v49 = vmul.f32 0.5, %v3458_v52  ;;  %3823 = vmatmul.mubr.f32.gmra.mxu0 %v3667_v60 }
 0x59f   : > { %v3462_v20 = vpop.f32.mrf.mxu1  ;;  %3827 = vmatprep.mubr.f32.mxu0 %v2116_v43  ;;  %v2086_v5 = vmul.f32 0.5, %v5581_v19 }
 0x5a0   : > { %v3668_v4 = vadd.f32 0.5, %v3636_v45  ;;  %5594 = vtanh.f32 %v3576_v49  ;;  %v3463_v18 = vadd.f32 %v7520_v53, %v3462_v20  ;;  %v2031_v20 = vmul.f32 0.5, %v7078_v30 }
 0x5a1   : > { %v5583_v8 = vpop.eup %5582  ;;  %5596 = vtanh.f32 %v2026_v55  ;;  %v3464_v2 = vpop.f32.mrf.mxu1  ;;  %v2118_v59 = vadd.f32 0.5, %v2086_v5  ;;  %v2030_v55 = vmul.f32 0.5, %v1936_v46 }
 0x5a2   : > { %v5585_v42 = vpop.eup %5584  ;;  %v3637_v39 = vmul.f32 0.5, %v5583_v8  ;;  %v3577_v44 = vmul.f32 0.5, %v3463_v18  ;;  %3828 = vmatmul.mubr.f32.gmra.mxu0 %v3668_v4  ;;  %v1946_v8 = vadd.f32 %v7513_v23, %v7085_v32 }
 0x5a3   : > { %v3467_v22 = vpop.f32.mrf.mxu1  ;;  %3832 = vmatprep.mubr.f32.mxu0 %v2117_v38  ;;  %v2087_v11 = vmul.f32 0.5, %v5585_v42 }
 0x5a4   : > { %v3669_v0 = vadd.f32 0.5, %v3637_v39  ;;  %5598 = vtanh.f32 %v3577_v44  ;;  %v3468_v27 = vadd.f32 %v7520_v53, %v3467_v22 }
 0x5a5   : > { %v5587_v41 = vpop.eup %5586  ;;  %5600 = vtanh.f32 %v2027_v58  ;;  %v3469_v24 = vpop.f32.mrf.mxu1  ;;  %v2119_v31 = vadd.f32 0.5, %v2087_v11 }
 0x5a6   : > { %v5589_v36 = vpop.eup %5588  ;;  %v3638_v13 = vmul.f32 0.5, %v5587_v41  ;;  %v3578_v1 = vmul.f32 0.5, %v3468_v27  ;;  %3833 = vmatmul.mubr.f32.gmra.mxu0 %v3669_v0  ;;  %v2032_v27 = vmul.f32 0.5, %v1946_v8 }
 0x5a7   : > { %v3472_v37 = vpop.f32.mrf.mxu1  ;;  %3837 = vmatprep.mubr.f32.mxu0 %v2118_v59  ;;  %v2088_v26 = vmul.f32 0.5, %v5589_v36 }
 0x5a8   : > { %v3670_v3 = vadd.f32 0.5, %v3638_v13  ;;  %5602 = vtanh.f32 %v3578_v1  ;;  %v3473_v63 = vadd.f32 %v7520_v53, %v3472_v37  ;;  %v2033_v13 = vmul.f32 0.5, %v7083_v28 }
 0x5a9   : > { %v5591_v25 = vpop.eup %5590  ;;  %5604 = vtanh.f32 %v2028_v57  ;;  %v3474_v47 = vpop.f32.mrf.mxu1  ;;  %v2120_v43 = vadd.f32 0.5, %v2088_v26 }
 0x5aa   : > { %v5593_v35 = vpop.eup %5592  ;;  %v3639_v15 = vmul.f32 0.5, %v5591_v25  ;;  %v3579_v50 = vmul.f32 0.5, %v3473_v63  ;;  %3838 = vmatmul.mubr.f32.gmra.mxu0 %v3670_v3  ;;  %v1956_v3 = vadd.f32 %v7513_v23, %v7090_v17 }
 0x5ab   : > { %v3477_v60 = vpop.f32.mrf.mxu1  ;;  %3842 = vmatprep.mubr.f32.mxu0 %v2119_v31  ;;  %v2089_v48 = vmul.f32 0.5, %v5593_v35 }
 0x5ac   : > { %v3671_v52 = vadd.f32 0.5, %v3639_v15  ;;  %5606 = vtanh.f32 %v3579_v50  ;;  %v3478_v56 = vadd.f32 %v7520_v53, %v3477_v60  ;;  %v2034_v60 = vmul.f32 0.5, %v1956_v3 }
 0x5ad   : > { %v5595_v7 = vpop.eup %5594  ;;  %5608 = vtanh.f32 %v2029_v29  ;;  %v3479_v40 = vpop.f32.mrf.mxu1  ;;  %v2121_v2 = vadd.f32 0.5, %v2089_v48  ;;  %v2035_v48 = vmul.f32 0.5, %v7088_v51 }
 0x5ae   : > { %v5597_v6 = vpop.eup %5596  ;;  %v3640_v19 = vmul.f32 0.5, %v5595_v7  ;;  %v3580_v45 = vmul.f32 0.5, %v3478_v56  ;;  %3843 = vmatmul.mubr.f32.gmra.mxu0 %v3671_v52 }
 0x5af   : > { %v3482_v49 = vpop.f32.mrf.mxu1  ;;  %3847 = vmatprep.mubr.f32.mxu0 %v2120_v43  ;;  %v2090_v38 = vmul.f32 0.5, %v5597_v6 }
 0x5b0   : > { %v3672_v58 = vadd.f32 0.5, %v3640_v19  ;;  %5610 = vtanh.f32 %v3580_v45  ;;  %v3483_v4 = vadd.f32 %v7520_v53, %v3482_v49  ;;  %v1966_v49 = vadd.f32 %v7513_v23, %v7095_v33 }
 0x5b1   : > { %v5599_v18 = vpop.eup %5598  ;;  %5612 = vtanh.f32 %v2030_v55  ;;  %v3484_v62 = vpop.f32.mrf.mxu1  ;;  %v2122_v57 = vadd.f32 0.5, %v2090_v38 }
 0x5b2   : > { %v5601_v5 = vpop.eup %5600  ;;  %v3641_v42 = vmul.f32 0.5, %v5599_v18  ;;  %v3581_v39 = vmul.f32 0.5, %v3483_v4  ;;  %3848 = vmatmul.mubr.f32.gmra.mxu0 %v3672_v58 }
 0x5b3   : > { %v3487_v44 = vpop.f32.mrf.mxu1  ;;  %3852 = vmatprep.mubr.f32.mxu0 %v2121_v2  ;;  %v2091_v24 = vmul.f32 0.5, %v5601_v5 }
 0x5b4   : > { %v3673_v22 = vadd.f32 0.5, %v3641_v42  ;;  %5614 = vtanh.f32 %v3581_v39  ;;  %v3488_v30 = vadd.f32 %v7520_v53, %v3487_v44  ;;  %v2036_v42 = vmul.f32 0.5, %v1966_v49 }
 0x5b5   : > { %v5603_v0 = vpop.eup %5602  ;;  %5616 = vtanh.f32 %v2031_v20  ;;  %v3489_v41 = vpop.f32.mrf.mxu1  ;;  %v2123_v25 = vadd.f32 0.5, %v2091_v24 }
 0x5b6   : > { %v5605_v32 = vpop.eup %5604  ;;  %v3642_v59 = vmul.f32 0.5, %v5603_v0  ;;  %v3582_v11 = vmul.f32 0.5, %v3488_v30  ;;  %3853 = vmatmul.mubr.f32.gmra.mxu0 %v3673_v22  ;;  %v2037_v41 = vmul.f32 0.5, %v7093_v61 }
 0x5b7   : > { %v3492_v36 = vpop.f32.mrf.mxu1  ;;  %3857 = vmatprep.mubr.f32.mxu0 %v2122_v57  ;;  %v2092_v46 = vmul.f32 0.5, %v5605_v32 }
 0x5b8   : > { %v3674_v1 = vadd.f32 0.5, %v3642_v59  ;;  %5618 = vtanh.f32 %v3582_v11  ;;  %v3493_v37 = vadd.f32 %v7520_v53, %v3492_v36  ;;  %v1976_v59 = vadd.f32 %v7513_v23, %v7100_v54 }
 0x5b9   : > { %v5607_v29 = vpop.eup %5606  ;;  %5620 = vtanh.f32 %v2032_v27  ;;  %v3494_v63 = vpop.f32.mrf.mxu1  ;;  %v2124_v56 = vadd.f32 0.5, %v2092_v46 }
 0x5ba   : > { %v5609_v47 = vpop.eup %5608  ;;  %v3643_v31 = vmul.f32 0.5, %v5607_v29  ;;  %v3583_v26 = vmul.f32 0.5, %v3493_v37  ;;  %3858 = vmatmul.mubr.f32.gmra.mxu0 %v3674_v1  ;;  %v2038_v46 = vmul.f32 0.5, %v1976_v59 }
 0x5bb   : > { %v3497_v35 = vpop.f32.mrf.mxu1  ;;  %3862 = vmatprep.mubr.f32.mxu0 %v2123_v25  ;;  %v2093_v7 = vmul.f32 0.5, %v5609_v47 }
 0x5bc   : > { %v3675_v15 = vadd.f32 0.5, %v3643_v31  ;;  %5622 = vtanh.f32 %v3583_v26  ;;  %v3498_v28 = vadd.f32 %v7520_v53, %v3497_v35 }
 0x5bd   : > { %v5611_v50 = vpop.eup %5610  ;;  %5624 = vtanh.f32 %v2033_v13  ;;  %v3499_v52 = vpop.f32.mrf.mxu1  ;;  %v2125_v58 = vadd.f32 0.5, %v2093_v7  ;;  %v1986_v7 = vadd.f32 %v7513_v23, %v7105_v10 }
 0x5be   : > { %v5613_v17 = vpop.eup %5612  ;;  %v3644_v55 = vmul.f32 0.5, %v5611_v50  ;;  %v3584_v40 = vmul.f32 0.5, %v3498_v28  ;;  %3863 = vmatmul.mubr.f32.gmra.mxu0 %v3675_v15  ;;  %v2039_v50 = vmul.f32 0.5, %v7098_v16 }
 0x5bf   : > { %v3502_v43 = vpop.f32.mrf.mxu1  ;;  %3867 = vmatprep.mubr.f32.mxu0 %v2124_v56  ;;  %v2094_v4 = vmul.f32 0.5, %v5613_v17 }
 0x5c0   : > { %v3676_v6 = vadd.f32 0.5, %v3644_v55  ;;  %5626 = vtanh.f32 %v3584_v40  ;;  %v3503_v19 = vadd.f32 %v7520_v53, %v3502_v43 }
 0x5c1   : > { %v5615_v45 = vpop.eup %5614  ;;  %5628 = vtanh.f32 %v2034_v60  ;;  %v3504_v20 = vpop.f32.mrf.mxu1  ;;  %v2126_v44 = vadd.f32 0.5, %v2094_v4 }
 0x5c2   : > { %v5617_v18 = vpop.eup %5616  ;;  %v3645_v8 = vmul.f32 0.5, %v5615_v45  ;;  %v3585_v62 = vmul.f32 0.5, %v3503_v19  ;;  %3868 = vmatmul.mubr.f32.gmra.mxu0 %v3676_v6  ;;  %v2040_v20 = vmul.f32 0.5, %v1986_v7 }
 0x5c3   : > { %v3507_v2 = vpop.f32.mrf.mxu1  ;;  %3872 = vmatprep.mubr.f32.mxu0 %v2125_v58  ;;  %v2095_v22 = vmul.f32 0.5, %v5617_v18 }
 0x5c4   : > { %v3677_v38 = vadd.f32 0.5, %v3645_v8  ;;  %5630 = vtanh.f32 %v3585_v62  ;;  %v3508_v51 = vadd.f32 %v7520_v53, %v3507_v2 }
 0x5c5   : > { %v5619_v5 = vpop.eup %5618  ;;  %5632 = vtanh.f32 %v2035_v48  ;;  %v3509_v39 = vpop.f32.mrf.mxu1  ;;  %v2127_v36 = vadd.f32 0.5, %v2095_v22 }
 0x5c6   : > { %v5621_v33 = vpop.eup %5620  ;;  %v3646_v30 = vmul.f32 0.5, %v5619_v5  ;;  %v3586_v0 = vmul.f32 0.5, %v3508_v51  ;;  %3873 = vmatmul.mubr.f32.gmra.mxu0 %v3677_v38  ;;  %v2041_v38 = vmul.f32 0.5, %v7103_v14  ;;  %v1996_v39 = vadd.f32 %v7513_v23, %v7110_v34 }
 0x5c7   : > { %v3512_v27 = vpop.f32.mrf.mxu1  ;;  %3877 = vmatprep.mubr.f32.mxu0 %v2126_v44  ;;  %v2096_v13 = vmul.f32 0.5, %v5621_v33 }
 0x5c8   : > { %v3678_v57 = vadd.f32 0.5, %v3646_v30  ;;  %5634 = vtanh.f32 %v3586_v0  ;;  %v3513_v24 = vadd.f32 %v7520_v53, %v3512_v27 }
 0x5c9   : > { %v5623_v32 = vpop.eup %5622  ;;  %5636 = vtanh.f32 %v2036_v42  ;;  %v3514_v11 = vpop.f32.mrf.mxu1  ;;  %v2128_v31 = vadd.f32 0.5, %v2096_v13 }
 0x5ca   : > { %v5625_v1 = vpop.eup %5624  ;;  %v3647_v37 = vmul.f32 0.5, %v5623_v32  ;;  %v3587_v29 = vmul.f32 0.5, %v3513_v24  ;;  %3878 = vmatmul.mubr.f32.gmra.mxu0 %v3678_v57  ;;  %v2042_v32 = vmul.f32 0.5, %v1996_v39 }
 0x5cb   : > { %v3517_v3 = vpop.f32.mrf.mxu1  ;;  %3882 = vmatprep.mubr.f32.mxu0 %v2127_v36  ;;  %v2097_v26 = vmul.f32 0.5, %v5625_v1 }
 0x5cc   : > { %v3679_v63 = vadd.f32 0.5, %v3647_v37  ;;  %5638 = vtanh.f32 %v3587_v29  ;;  %v3518_v61 = vadd.f32 %v7520_v53, %v3517_v3  ;;  %v2043_v29 = vmul.f32 0.5, %v7108_v9 }
 0x5cd   : > { %v5627_v25 = vpop.eup %5626  ;;  %5640 = vtanh.f32 %v2037_v41  ;;  %v3519_v47 = vpop.f32.mrf.mxu1  ;;  %v2129_v55 = vadd.f32 0.5, %v2097_v26 }
 0x5ce   : > { %v5629_v54 = vpop.eup %5628  ;;  %v3648_v35 = vmul.f32 0.5, %v5627_v25  ;;  %v3588_v15 = vmul.f32 0.5, %v3518_v61  ;;  %3883 = vmatmul.mubr.f32.gmra.mxu0 %v3679_v63  ;;  %v2006_v25 = vadd.f32 %v7513_v23, %v7115_v21 }
 0x5cf   : > { %v3522_v28 = vpop.f32.mrf.mxu1  ;;  %3887 = vmatprep.mubr.f32.mxu0 %v2128_v31  ;;  %v2098_v40 = vmul.f32 0.5, %v5629_v54 }
 0x5d0   : > { %v3680_v60 = vadd.f32 0.5, %v3648_v35  ;;  %5642 = vtanh.f32 %v3588_v15  ;;  %v3523_v52 = vadd.f32 %v7520_v53, %v3522_v28 }
 0x5d1   : > { %v5631_v56 = vpop.eup %5630  ;;  %5644 = vtanh.f32 %v2038_v46  ;;  %v3524_v17 = vpop.f32.mrf.mxu1  ;;  %v2130_v4 = vadd.f32 0.5, %v2098_v40 }
 0x5d2   : > { %v5633_v43 = vpop.eup %5632  ;;  %v3649_v48 = vmul.f32 0.5, %v5631_v56  ;;  %v3589_v6 = vmul.f32 0.5, %v3523_v52  ;;  %3888 = vmatmul.mubr.f32.gmra.mxu0 %v3680_v60  ;;  %v2044_v60 = vmul.f32 0.5, %v2006_v25 }
 0x5d3   : > { %v3527_v19 = vpop.f32.mrf.mxu1  ;;  %3892 = vmatprep.mubr.f32.mxu0 %v2129_v55  ;;  %v2099_v18 = vmul.f32 0.5, %v5633_v43 }
 0x5d4   : > { %v3681_v45 = vadd.f32 0.5, %v3649_v48  ;;  %5646 = vtanh.f32 %v3589_v6  ;;  %v3528_v16 = vadd.f32 %v7520_v53, %v3527_v19  ;;  %v2045_v6 = vmul.f32 0.5, %v7113_v12 }
 0x5d5   : > { %v5635_v49 = vpop.eup %5634  ;;  %5648 = vtanh.f32 %v2039_v50  ;;  %v3529_v58 = vpop.f32.mrf.mxu1  ;;  %v2131_v22 = vadd.f32 0.5, %v2099_v18 }
 0x5d6   : > { %v5637_v10 = vpop.eup %5636  ;;  %v3650_v8 = vmul.f32 0.5, %v5635_v49  ;;  %v3590_v62 = vmul.f32 0.5, %v3528_v16  ;;  %3893 = vmatmul.mubr.f32.gmra.mxu0 %v3681_v45 }
 0x5d7   : > { %v3532_v2 = vpop.f32.mrf.mxu1  ;;  %3897 = vmatprep.mubr.f32.mxu0 %v2130_v4  ;;  %v2100_v33 = vmul.f32 0.5, %v5637_v10 }
 0x5d8   : > { %v3682_v51 = vadd.f32 0.5, %v3650_v8  ;;  %5650 = vtanh.f32 %v3590_v62  ;;  %v3533_v5 = vadd.f32 %v7520_v53, %v3532_v2 }
 0x5d9   : > { %v5639_v42 = vpop.eup %5638  ;;  %5652 = vtanh.f32 %v2040_v20  ;;  %v3534_v44 = vpop.f32.mrf.mxu1  ;;  %v2132_v11 = vadd.f32 0.5, %v2100_v33 }
 0x5da   : > { %v5641_v30 = vpop.eup %5640  ;;  %v3651_v0 = vmul.f32 0.5, %v5639_v42  ;;  %v3591_v27 = vmul.f32 0.5, %v3533_v5  ;;  %3898 = vmatmul.mubr.f32.gmra.mxu0 %v3682_v51 }
 0x5db   : > { %v3537_v41 = vpop.f32.mrf.mxu1  ;;  %3902 = vmatprep.mubr.f32.mxu0 %v2131_v22  ;;  %v2101_v36 = vmul.f32 0.5, %v5641_v30 }
 0x5dc   : > { %v3683_v57 = vadd.f32 0.5, %v3651_v0  ;;  %5654 = vtanh.f32 %v3591_v27  ;;  %v3538_v14 = vadd.f32 %v7520_v53, %v3537_v41 }
 0x5dd   : > { %v5643_v24 = vpop.eup %5642  ;;  %5656 = vtanh.f32 %v2041_v38  ;;  %v3539_v59 = vpop.f32.mrf.mxu1  ;;  %v2133_v47 = vadd.f32 0.5, %v2101_v36 }
 0x5de   : > { %v5645_v34 = vpop.eup %5644  ;;  %v3652_v13 = vmul.f32 0.5, %v5643_v24  ;;  %v3592_v1 = vmul.f32 0.5, %v3538_v14  ;;  %3903 = vmatmul.mubr.f32.gmra.mxu0 %v3683_v57 }
 0x5df   : > { %v3542_v37 = vpop.f32.mrf.mxu1  ;;  %3907 = vmatprep.mubr.f32.mxu0 %v2132_v11  ;;  %v2102_v31 = vmul.f32 0.5, %v5645_v34 }
 0x5e0   : > { %v3684_v3 = vadd.f32 0.5, %v3652_v13  ;;  %5658 = vtanh.f32 %v3592_v1  ;;  %v3543_v63 = vadd.f32 %v7520_v53, %v3542_v37 }
 0x5e1   : > { %v5647_v61 = vpop.eup %5646  ;;  %5660 = vtanh.f32 %v2042_v32  ;;  %v3544_v46 = vpop.f32.mrf.mxu1  ;;  %v2134_v56 = vadd.f32 0.5, %v2102_v31 }
 0x5e2   : > { %v5649_v26 = vpop.eup %5648  ;;  %v3653_v54 = vmul.f32 0.5, %v5647_v61  ;;  %v3593_v35 = vmul.f32 0.5, %v3543_v63  ;;  %3908 = vmatmul.mubr.f32.gmra.mxu0 %v3684_v3 }
 0x5e3   : > { %v3547_v15 = vpop.f32.mrf.mxu1  ;;  %3912 = vmatprep.mubr.f32.mxu0 %v2133_v47  ;;  %v2103_v7 = vmul.f32 0.5, %v5649_v26 }
 0x5e4   : > { %v3685_v28 = vadd.f32 0.5, %v3653_v54  ;;  %5662 = vtanh.f32 %v3593_v35  ;;  %v3548_v9 = vadd.f32 %v7520_v53, %v3547_v15  ;;  %v3958_v15 = vlaneseq }
 0x5e5   : > { %v5651_v50 = vpop.eup %5650  ;;  %5664 = vtanh.f32 %v2043_v29  ;;  %v3549_v52 = vpop.f32.mrf.mxu1  ;;  %v2135_v45 = vadd.f32 0.5, %v2103_v7 }
 0x5e6   : > { %v5653_v21 = vpop.eup %5652  ;;  %v3654_v23 = vmul.f32 0.5, %v5651_v50  ;;  %v3594_v17 = vmul.f32 0.5, %v3548_v9  ;;  %3913 = vmatmul.mubr.f32.gmra.mxu0 %v3685_v28  ;;  %v7597_v28 = vand.u32 127, %v3958_v15  ;;  %v7602_v9 = vld [vmem:[%s8017_s18] ss:$0 sm:$0xff] }
 0x5e7   : > { %v3552_v55 = vpop.f32.mrf.mxu1  ;;  %3917 = vmatprep.mubr.f32.mxu0 %v2134_v56  ;;  %v2104_v16 = vmul.f32 0.5, %v5653_v21 }
 0x5e8   : > { %v3686_v40 = vadd.f32 0.5, %v3654_v23  ;;  %5666 = vtanh.f32 %v3594_v17  ;;  %v3553_v43 = vadd.f32 %v7520_v53, %v3552_v55  ;;  %vm3960_vm0 = vcmp.lt.s32.totalorder %v7597_v28, 8 }
 0x5e9   : > { %v5655_v48 = vpop.eup %5654  ;;  %5668 = vtanh.f32 %v2044_v60  ;;  %v3554_v19 = vpop.f32.mrf.mxu1  ;;  %v2136_v2 = vadd.f32 0.5, %v2104_v16 }
 0x5ea   : > { %v5657_v49 = vpop.eup %5656  ;;  %v3655_v20 = vmul.f32 0.5, %v5655_v48  ;;  %v3595_v58 = vmul.f32 0.5, %v3553_v43  ;;  %3918 = vmatmul.mubr.f32.gmra.mxu0 %v3686_v40 }
 0x5eb   : > { %v3557_v4 = vpop.f32.mrf.mxu1  ;;  %3922 = vmatprep.mubr.f32.mxu0 %v2135_v45  ;;  %v2105_v38 = vmul.f32 0.5, %v5657_v49 }
 0x5ec   : > { %v3687_v18 = vadd.f32 0.5, %v3655_v20  ;;  %5670 = vtanh.f32 %v3595_v58  ;;  %v3558_v10 = vadd.f32 %v7520_v53, %v3557_v4 }
 0x5ed   : > { %v5659_v8 = vpop.eup %5658  ;;  %5672 = vtanh.f32 %v2045_v6  ;;  %v3559_v62 = vpop.f32.mrf.mxu1  ;;  %v2137_v30 = vadd.f32 0.5, %v2105_v38 }
 0x5ee   : > { %v5661_v12 = vpop.eup %5660  ;;  %v3656_v51 = vmul.f32 0.5, %v5659_v8  ;;  %v3596_v5 = vmul.f32 0.5, %v3558_v10  ;;  %3923 = vmatmul.mubr.f32.gmra.mxu0 %v3687_v18 }
 0x5ef   : > { %v3562_v42 = vpop.f32.mrf.mxu1  ;;  %3927 = vmatprep.mubr.f32.mxu0 %v2136_v2  ;;  %v2106_v0 = vmul.f32 0.5, %v5661_v12 }
 0x5f0   : > { %v3688_v39 = vadd.f32 0.5, %v3656_v51  ;;  %5674 = vtanh.f32 %v3596_v5  ;;  %v3563_v44 = vadd.f32 %v7520_v53, %v3562_v42 }
 0x5f1   : > { %v5663_v22 = vpop.eup %5662  ;;  %v3564_v33 = vpop.f32.mrf.mxu1  ;;  %v2138_v32 = vadd.f32 0.5, %v2106_v0 }
 0x5f2   : > { %v5665_v27 = vpop.eup %5664  ;;  %v3657_v41 = vmul.f32 0.5, %v5663_v22  ;;  %v3597_v57 = vmul.f32 0.5, %v3563_v44  ;;  %3928 = vmatmul.mubr.f32.gmra.mxu0 %v3688_v39 }
 0x5f3   : > { %3932 = vmatprep.mubr.f32.mxu0 %v2137_v30  ;;  %v2107_v59 = vmul.f32 0.5, %v5665_v27 }
 0x5f4   : > { %v3689_v14 = vadd.f32 0.5, %v3657_v41  ;;  %5676 = vtanh.f32 %v3597_v57 }
 0x5f5   : > { %v5667_v24 = vpop.eup %5666  ;;  %v2139_v13 = vadd.f32 0.5, %v2107_v59 }
 0x5f6   : > { %v5669_v11 = vpop.eup %5668  ;;  %v3658_v36 = vmul.f32 0.5, %v5667_v24  ;;  %3933 = vmatmul.mubr.f32.gmra.mxu0 %v3689_v14 }
 0x5f7   : > { %3937 = vmatprep.mubr.f32.mxu0 %v2138_v32  ;;  %v2108_v1 = vmul.f32 0.5, %v5669_v11 }
 0x5f8   : > { %v3690_v34 = vadd.f32 0.5, %v3658_v36 }
 0x5f9   : > { %v5671_v53 = vpop.eup %5670  ;;  %v2140_v61 = vadd.f32 0.5, %v2108_v1 }
 0x5fa   : > { %v5673_v37 = vpop.eup %5672  ;;  %v3659_v29 = vmul.f32 0.5, %v5671_v53  ;;  %3938 = vmatmul.mubr.f32.gmra.mxu0 %v3690_v34 }
 0x5fb   : > { %3942 = vmatprep.mubr.f32.mxu0 %v2139_v13  ;;  %v2109_v25 = vmul.f32 0.5, %v5673_v37 }
 0x5fc   : > { %v3691_v3 = vadd.f32 0.5, %v3659_v29 }
 0x5fd   : > { %v5675_v63 = vpop.eup %5674  ;;  %v2141_v26 = vadd.f32 0.5, %v2109_v25 }
 0x5fe   : > { %v3660_v46 = vmul.f32 0.5, %v5675_v63  ;;  %3943 = vmatmul.mubr.f32.gmra.mxu0 %v3691_v3 }
 0x5ff   : > { %3947 = vmatprep.mubr.f32.mxu0 %v2140_v61 }
 0x600   : > { %v3692_v47 = vadd.f32 0.5, %v3660_v46 }
 0x601   : > { %v5677_v31 = vpop.eup %5676 }
 0x602   : > { %v3661_v54 = vmul.f32 0.5, %v5677_v31  ;;  %3948 = vmatmul.mubr.f32.gmra.mxu0 %v3692_v47 }
 0x603   : > { %3952 = vmatprep.mubr.f32.mxu0 %v2141_v26 }
 0x604   : > { %v3693_v35 = vadd.f32 0.5, %v3661_v54 }
 0x606   : > { %3953 = vmatmul.mubr.f32.gmra.mxu0 %v3693_v35 }
 0x64a   : > { %v3799_v50 = vpop.f32.mrf.mxu0 }
 0x64b   : > { %v3800_v60 = vadd.f32 %v7602_v9, %v3799_v50 }
 0x64c   : > { %v3801_v52 = vpop.f32.mrf.mxu0 }
 0x64d   : > { %v7608_v56 = vsel %vm3960_vm0, %v3800_v60, -1e+30 }
 0x64e   : > { %v3804_v7 = vpop.f32.mrf.mxu0  ;;  %3993 = vmax.xlane.f32.xlu0 %v7608_v56 }
 0x64f   : > { %v3805_v21 = vadd.f32 %v7602_v9, %v3804_v7 }
 0x650   : > { %v3806_v23 = vpop.f32.mrf.mxu0 }
 0x651   : > { %v7614_v17 = vsel %vm3960_vm0, %v3805_v21, -1e+30 }
 0x652   : > { %v3809_v55 = vpop.f32.mrf.mxu0  ;;  %3995 = vmax.xlane.f32.xlu0 %v7614_v17 }
 0x653   : > { %v3810_v40 = vadd.f32 %v7602_v9, %v3809_v55 }
 0x654   : > { %v3811_v43 = vpop.f32.mrf.mxu0 }
 0x655   : > { %v7620_v48 = vsel %vm3960_vm0, %v3810_v40, -1e+30 }
 0x656   : > { %v3814_v6 = vpop.f32.mrf.mxu0  ;;  %3997 = vmax.xlane.f32.xlu1 %v7620_v48 }
 0x657   : > { %v3815_v19 = vadd.f32 %v7602_v9, %v3814_v6 }
 0x658   : > { %v3816_v45 = vpop.f32.mrf.mxu0 }
 0x659   : > { %v7626_v16 = vsel %vm3960_vm0, %v3815_v19, -1e+30 }
 0x65a   : > { %v3819_v49 = vpop.f32.mrf.mxu0  ;;  %3999 = vmax.xlane.f32.xlu1 %v7626_v16 }
 0x65b   : > { %v3820_v20 = vadd.f32 %v7602_v9, %v3819_v49 }
 0x65c   : > { %v3821_v58 = vpop.f32.mrf.mxu0 }
 0x65d   : > { %v7632_v4 = vsel %vm3960_vm0, %v3820_v20, -1e+30 }
 0x65e   : > { %v3824_v18 = vpop.f32.mrf.mxu0  ;;  %4001 = vmax.xlane.f32.xlu0 %v7632_v4 }
 0x65f   : > { %v3825_v10 = vadd.f32 %v7602_v9, %v3824_v18 }
 0x660   : > { %v3826_v8 = vpop.f32.mrf.mxu0 }
 0x661   : > { %v7638_v62 = vsel %vm3960_vm0, %v3825_v10, -1e+30 }
 0x662   : > { %v3829_v2 = vpop.f32.mrf.mxu0  ;;  %4003 = vmax.xlane.f32.xlu1 %v7638_v62 }
 0x663   : > { %v3830_v38 = vadd.f32 %v7602_v9, %v3829_v2 }
 0x664   : > { %v3831_v12 = vpop.f32.mrf.mxu0 }
 0x665   : > { %v7644_v51 = vsel %vm3960_vm0, %v3830_v38, -1e+30 }
 0x666   : > { %v3834_v5 = vpop.f32.mrf.mxu0  ;;  %4005 = vmax.xlane.f32.xlu0 %v7644_v51 }
 0x667   : > { %v3835_v42 = vadd.f32 %v7602_v9, %v3834_v5 }
 0x668   : > { %v3836_v39 = vpop.f32.mrf.mxu0 }
 0x669   : > { %v7650_v44 = vsel %vm3960_vm0, %v3835_v42, -1e+30 }
 0x66a   : > { %v3839_v22 = vpop.f32.mrf.mxu0  ;;  %4007 = vmax.xlane.f32.xlu1 %v7650_v44 }
 0x66b   : > { %v3840_v33 = vadd.f32 %v7602_v9, %v3839_v22 }
 0x66c   : > { %v3841_v30 = vpop.f32.mrf.mxu0 }
 0x66d   : > { %v7656_v0 = vsel %vm3960_vm0, %v3840_v33, -1e+30 }
 0x66e   : > { %v3844_v27 = vpop.f32.mrf.mxu0  ;;  %4009 = vmax.xlane.f32.xlu0 %v7656_v0 }
 0x66f   : > { %v3845_v41 = vadd.f32 %v7602_v9, %v3844_v27 }
 0x670   : > { %v3846_v57 = vpop.f32.mrf.mxu0 }
 0x671   : > { %v7662_v14 = vsel %vm3960_vm0, %v3845_v41, -1e+30 }
 0x672   : > { %v3849_v24 = vpop.f32.mrf.mxu0  ;;  %4011 = vmax.xlane.f32.xlu1 %v7662_v14 }
 0x673   : > { %v3850_v32 = vadd.f32 %v7602_v9, %v3849_v24 }
 0x674   : > { %v3851_v59 = vpop.f32.mrf.mxu0 }
 0x675   : > { %v7668_v11 = vsel %vm3960_vm0, %v3850_v32, -1e+30 }
 0x676   : > { %v3854_v36 = vpop.f32.mrf.mxu0  ;;  %4013 = vmax.xlane.f32.xlu0 %v7668_v11 }
 0x677   : > { %v3855_v34 = vadd.f32 %v7602_v9, %v3854_v36 }
 0x678   : > { %v3856_v53 = vpop.f32.mrf.mxu0 }
 0x679   : > { %v7674_v13 = vsel %vm3960_vm0, %v3855_v34, -1e+30 }
 0x67a   : > { %v3859_v1 = vpop.f32.mrf.mxu0  ;;  %4015 = vmax.xlane.f32.xlu1 %v7674_v13 }
 0x67b   : > { %v3860_v37 = vadd.f32 %v7602_v9, %v3859_v1 }
 0x67c   : > { %v3861_v29 = vpop.f32.mrf.mxu0 }
 0x67d   : > { %v7680_v3 = vsel %vm3960_vm0, %v3860_v37, -1e+30 }
 0x67e   : > { %v3864_v63 = vpop.f32.mrf.mxu0  ;;  %4017 = vmax.xlane.f32.xlu0 %v7680_v3 }
 0x67f   : > { %v3865_v61 = vadd.f32 %v7602_v9, %v3864_v63 }
 0x680   : > { %v3866_v25 = vpop.f32.mrf.mxu0 }
 0x681   : > { %v7686_v46 = vsel %vm3960_vm0, %v3865_v61, -1e+30 }
 0x682   : > { %v3869_v47 = vpop.f32.mrf.mxu0  ;;  %4019 = vmax.xlane.f32.xlu1 %v7686_v46 }
 0x683   : > { %v3870_v31 = vadd.f32 %v7602_v9, %v3869_v47 }
 0x684   : > { %v3871_v26 = vpop.f32.mrf.mxu0 }
 0x685   : > { %v7692_v54 = vsel %vm3960_vm0, %v3870_v31, -1e+30 }
 0x686   : > { %v3874_v35 = vpop.f32.mrf.mxu0  ;;  %4021 = vmax.xlane.f32.xlu0 %v7692_v54 }
 0x687   : > { %v3875_v15 = vadd.f32 %v7602_v9, %v3874_v35 }
 0x688   : > { %v3876_v50 = vpop.f32.mrf.mxu0 }
 0x689   : > { %v7698_v60 = vsel %vm3960_vm0, %v3875_v15, -1e+30 }
 0x68a   : > { %v3879_v52 = vpop.f32.mrf.mxu0  ;;  %4023 = vmax.xlane.f32.xlu1 %v7698_v60 }
 0x68b   : > { %v3880_v7 = vadd.f32 %v7602_v9, %v3879_v52 }
 0x68c   : > { %v3881_v21 = vpop.f32.mrf.mxu0 }
 0x68d   : > { %v7704_v23 = vsel %vm3960_vm0, %v3880_v7, -1e+30 }
 0x68e   : > { %v3884_v55 = vpop.f32.mrf.mxu0  ;;  %4025 = vmax.xlane.f32.xlu0 %v7704_v23 }
 0x68f   : > { %v3885_v40 = vadd.f32 %v7602_v9, %v3884_v55 }
 0x690   : > { %v3886_v43 = vpop.f32.mrf.mxu0 }
 0x691   : > { %v7710_v6 = vsel %vm3960_vm0, %v3885_v40, -1e+30 }
 0x692   : > { %v3889_v19 = vpop.f32.mrf.mxu0  ;;  %4027 = vmax.xlane.f32.xlu1 %v7710_v6 }
 0x693   : > { %v3890_v45 = vadd.f32 %v7602_v9, %v3889_v19 }
 0x694   : > { %v3891_v49 = vpop.f32.mrf.mxu0 }
 0x695   : > { %v7716_v20 = vsel %vm3960_vm0, %v3890_v45, -1e+30 }
 0x696   : > { %v3894_v58 = vpop.f32.mrf.mxu0  ;;  %4029 = vmax.xlane.f32.xlu0 %v7716_v20 }
 0x697   : > { %v3895_v18 = vadd.f32 %v7602_v9, %v3894_v58 }
 0x698   : > { %v3896_v10 = vpop.f32.mrf.mxu0 }
 0x699   : > { %v7722_v8 = vsel %vm3960_vm0, %v3895_v18, -1e+30 }
 0x69a   : > { %v3899_v2 = vpop.f32.mrf.mxu0  ;;  %4031 = vmax.xlane.f32.xlu1 %v7722_v8 }
 0x69b   : > { %v3900_v38 = vadd.f32 %v7602_v9, %v3899_v2 }
 0x69c   : > { %v3901_v12 = vpop.f32.mrf.mxu0 }
 0x69d   : > { %v7728_v5 = vsel %vm3960_vm0, %v3900_v38, -1e+30 }
 0x69e   : > { %v3904_v42 = vpop.f32.mrf.mxu0  ;;  %4033 = vmax.xlane.f32.xlu0 %v7728_v5 }
 0x69f   : > { %v3905_v39 = vadd.f32 %v7602_v9, %v3904_v42 }
 0x6a0   : > { %v3906_v22 = vpop.f32.mrf.mxu0 }
 0x6a1   : > { %v7734_v33 = vsel %vm3960_vm0, %v3905_v39, -1e+30 }
 0x6a2   : > { %v3909_v30 = vpop.f32.mrf.mxu0  ;;  %4035 = vmax.xlane.f32.xlu1 %v7734_v33 }
 0x6a3   : > { %v3910_v27 = vadd.f32 %v7602_v9, %v3909_v30 }
 0x6a4   : > { %v3911_v41 = vpop.f32.mrf.mxu0 }
 0x6a5   : > { %v7740_v57 = vsel %vm3960_vm0, %v3910_v27, -1e+30 }
 0x6a6   : > { %v3914_v24 = vpop.f32.mrf.mxu0  ;;  %4037 = vmax.xlane.f32.xlu0 %v7740_v57 }
 0x6a7   : > { %v3915_v32 = vadd.f32 %v7602_v9, %v3914_v24 }
 0x6a8   : > { %v3916_v59 = vpop.f32.mrf.mxu0 }
 0x6a9   : > { %v7746_v36 = vsel %vm3960_vm0, %v3915_v32, -1e+30 }
 0x6aa   : > { %v3919_v34 = vpop.f32.mrf.mxu0  ;;  %4039 = vmax.xlane.f32.xlu1 %v7746_v36 }
 0x6ab   : > { %v3920_v53 = vadd.f32 %v7602_v9, %v3919_v34 }
 0x6ac   : > { %v3921_v1 = vpop.f32.mrf.mxu0 }
 0x6ad   : > { %v7752_v37 = vsel %vm3960_vm0, %v3920_v53, -1e+30 }
 0x6ae   : > { %v3924_v29 = vpop.f32.mrf.mxu0  ;;  %4041 = vmax.xlane.f32.xlu0 %v7752_v37 }
 0x6af   : > { %v3925_v63 = vadd.f32 %v7602_v9, %v3924_v29 }
 0x6b0   : > { %v3926_v61 = vpop.f32.mrf.mxu0 }
 0x6b1   : > { %v7758_v25 = vsel %vm3960_vm0, %v3925_v63, -1e+30 }
 0x6b2   : > { %v3929_v47 = vpop.f32.mrf.mxu0  ;;  %4043 = vmax.xlane.f32.xlu1 %v7758_v25 }
 0x6b3   : > { %v3930_v31 = vadd.f32 %v7602_v9, %v3929_v47 }
 0x6b4   : > { %v3931_v26 = vpop.f32.mrf.mxu0 }
 0x6b5   : > { %v7764_v35 = vsel %vm3960_vm0, %v3930_v31, -1e+30 }
 0x6b6   : > { %v3934_v15 = vpop.f32.mrf.mxu0  ;;  %4045 = vmax.xlane.f32.xlu0 %v7764_v35 }
 0x6b7   : > { %v3935_v50 = vadd.f32 %v7602_v9, %v3934_v15 }
 0x6b8   : > { %v3936_v52 = vpop.f32.mrf.mxu0 }
 0x6b9   : > { %v7770_v7 = vsel %vm3960_vm0, %v3935_v50, -1e+30 }
 0x6ba   : > { %v3939_v21 = vpop.f32.mrf.mxu0  ;;  %4047 = vmax.xlane.f32.xlu1 %v7770_v7 }
 0x6bb   : > { %v3940_v55 = vadd.f32 %v7602_v9, %v3939_v21 }
 0x6bc   : > { %v3941_v40 = vpop.f32.mrf.mxu0 }
 0x6bd   : > { %v7776_v43 = vsel %vm3960_vm0, %v3940_v55, -1e+30 }
 0x6be   : > { %v3944_v19 = vpop.f32.mrf.mxu0  ;;  %4049 = vmax.xlane.f32.xlu0 %v7776_v43 }
 0x6bf   : > { %v3945_v45 = vadd.f32 %v7602_v9, %v3944_v19 }
 0x6c0   : > { %v3946_v49 = vpop.f32.mrf.mxu0 }
 0x6c1   : > { %v7782_v58 = vsel %vm3960_vm0, %v3945_v45, -1e+30 }
 0x6c2   : > { %v3949_v18 = vpop.f32.mrf.mxu0  ;;  %4051 = vmax.xlane.f32.xlu1 %v7782_v58 }
 0x6c3   : > { %v3950_v10 = vadd.f32 %v7602_v9, %v3949_v18 }
 0x6c4   : > { %v3951_v2 = vpop.f32.mrf.mxu0 }
 0x6c5   : > { %v7788_v38 = vsel %vm3960_vm0, %v3950_v10, -1e+30 }
 0x6c6   : > { %v3954_v12 = vpop.f32.mrf.mxu0  ;;  %4053 = vmax.xlane.f32.xlu0 %v7788_v38 }
 0x6c7   : > { %v3955_v42 = vadd.f32 %v7602_v9, %v3954_v12 }
 0x6c8   : > { %v3956_v39 = vpop.f32.mrf.mxu0 }
 0x6c9   : > { %v7794_v22 = vsel %vm3960_vm0, %v3955_v42, -1e+30 }
 0x6ca   : > { %4055 = vmax.xlane.f32.xlu1 %v7794_v22 }
 0x6d7   : > { %v3994_v30 = vpop.xlane.xlu0 %3993 }
 0x6d8   : > { %v4057_v27 = vsub.f32 %v7608_v56, %v3994_v30 }
 0x6da   : > { %v4089_v41 = vmul.f32 1.442695, %v4057_v27 }
 0x6db   : > { %v3996_v24 = vpop.xlane.xlu0 %3995 }
 0x6dc   : > { %5678 = vpow2.f32 %v4089_v41  ;;  %v4058_v32 = vsub.f32 %v7614_v17, %v3996_v24 }
 0x6de   : > { %v4091_v59 = vmul.f32 1.442695, %v4058_v32 }
 0x6df   : > { %v3998_v34 = vpop.xlane.xlu1 %3997 }
 0x6e0   : > { %5680 = vpow2.f32 %v4091_v59  ;;  %v4059_v9 = vsub.f32 %v7620_v48, %v3998_v34 }
 0x6e2   : > { %v4093_v53 = vmul.f32 1.442695, %v4059_v9 }
 0x6e3   : > { %v4000_v1 = vpop.xlane.xlu1 %3999 }
 0x6e4   : > { %5682 = vpow2.f32 %v4093_v53  ;;  %v4060_v28 = vsub.f32 %v7626_v16, %v4000_v1 }
 0x6e6   : > { %v4095_v29 = vmul.f32 1.442695, %v4060_v28 }
 0x6e7   : > { %v4002_v63 = vpop.xlane.xlu0 %4001 }
 0x6e8   : > { %5684 = vpow2.f32 %v4095_v29  ;;  %v4061_v56 = vsub.f32 %v7632_v4, %v4002_v63 }
 0x6e9   : > { %v7802_v61 = vpop.eup %5678 }
 0x6ea   : > { %v4097_v47 = vmul.f32 1.442695, %v4061_v56  ;;  %4153 = vadd.xlane.f32.xlu0 %v7802_v61 }
 0x6eb   : > { %v4004_v17 = vpop.xlane.xlu1 %4003 }
 0x6ec   : > { %5686 = vpow2.f32 %v4097_v47  ;;  %v4062_v31 = vsub.f32 %v7638_v62, %v4004_v17 }
 0x6ed   : > { %v7806_v48 = vpop.eup %5680 }
 0x6ee   : > { %v4099_v26 = vmul.f32 1.442695, %v4062_v31  ;;  %4155 = vadd.xlane.f32.xlu1 %v7806_v48 }
 0x6ef   : > { %v4006_v16 = vpop.xlane.xlu0 %4005 }
 0x6f0   : > { %5688 = vpow2.f32 %v4099_v26  ;;  %v4063_v15 = vsub.f32 %v7644_v51, %v4006_v16 }
 0x6f1   : > { %v7810_v50 = vpop.eup %5682 }
 0x6f2   : > { %v4101_v4 = vmul.f32 1.442695, %v4063_v15  ;;  %4157 = vadd.xlane.f32.xlu0 %v7810_v50 }
 0x6f3   : > { %v4008_v52 = vpop.xlane.xlu1 %4007 }
 0x6f4   : > { %5690 = vpow2.f32 %v4101_v4  ;;  %v4064_v21 = vsub.f32 %v7650_v44, %v4008_v52 }
 0x6f5   : > { %v7814_v55 = vpop.eup %5684 }
 0x6f6   : > { %v4103_v62 = vmul.f32 1.442695, %v4064_v21  ;;  %4159 = vadd.xlane.f32.xlu1 %v7814_v55 }
 0x6f7   : > { %v4010_v40 = vpop.xlane.xlu0 %4009 }
 0x6f8   : > { %5692 = vpow2.f32 %v4103_v62  ;;  %v4065_v19 = vsub.f32 %v7656_v0, %v4010_v40 }
 0x6f9   : > { %v7818_v45 = vpop.eup %5686 }
 0x6fa   : > { %v4105_v51 = vmul.f32 1.442695, %v4065_v19  ;;  %4161 = vadd.xlane.f32.xlu0 %v7818_v45 }
 0x6fb   : > { %v4012_v49 = vpop.xlane.xlu1 %4011 }
 0x6fc   : > { %5694 = vpow2.f32 %v4105_v51  ;;  %v4066_v18 = vsub.f32 %v7662_v14, %v4012_v49 }
 0x6fd   : > { %v7822_v10 = vpop.eup %5688 }
 0x6fe   : > { %v4107_v44 = vmul.f32 1.442695, %v4066_v18  ;;  %4163 = vadd.xlane.f32.xlu1 %v7822_v10 }
 0x6ff   : > { %v4014_v2 = vpop.xlane.xlu0 %4013 }
 0x700   : > { %5696 = vpow2.f32 %v4107_v44  ;;  %v4067_v12 = vsub.f32 %v7668_v11, %v4014_v2 }
 0x701   : > { %v7826_v42 = vpop.eup %5690 }
 0x702   : > { %v4109_v0 = vmul.f32 1.442695, %v4067_v12  ;;  %4165 = vadd.xlane.f32.xlu0 %v7826_v42 }
 0x703   : > { %v4016_v39 = vpop.xlane.xlu1 %4015 }
 0x704   : > { %5698 = vpow2.f32 %v4109_v0  ;;  %v4068_v30 = vsub.f32 %v7674_v13, %v4016_v39 }
 0x705   : > { %v7830_v27 = vpop.eup %5692 }
 0x706   : > { %v4111_v14 = vmul.f32 1.442695, %v4068_v30  ;;  %4167 = vadd.xlane.f32.xlu1 %v7830_v27 }
 0x707   : > { %v4018_v41 = vpop.xlane.xlu0 %4017 }
 0x708   : > { %5700 = vpow2.f32 %v4111_v14  ;;  %v4069_v24 = vsub.f32 %v7680_v3, %v4018_v41 }
 0x709   : > { %v7834_v32 = vpop.eup %5694 }
 0x70a   : > { %v4113_v11 = vmul.f32 1.442695, %v4069_v24  ;;  %4169 = vadd.xlane.f32.xlu0 %v7834_v32 }
 0x70b   : > { %v4020_v59 = vpop.xlane.xlu1 %4019 }
 0x70c   : > { %5702 = vpow2.f32 %v4113_v11  ;;  %v4070_v34 = vsub.f32 %v7686_v46, %v4020_v59 }
 0x70d   : > { %v7838_v9 = vpop.eup %5696 }
 0x70e   : > { %v4115_v13 = vmul.f32 1.442695, %v4070_v34  ;;  %4171 = vadd.xlane.f32.xlu1 %v7838_v9 }
 0x70f   : > { %v4022_v53 = vpop.xlane.xlu0 %4021 }
 0x710   : > { %5704 = vpow2.f32 %v4115_v13  ;;  %v4071_v1 = vsub.f32 %v7692_v54, %v4022_v53 }
 0x711   : > { %v7842_v28 = vpop.eup %5698 }
 0x712   : > { %v4117_v3 = vmul.f32 1.442695, %v4071_v1  ;;  %4173 = vadd.xlane.f32.xlu0 %v7842_v28 }
 0x713   : > { %v4024_v29 = vpop.xlane.xlu1 %4023 }
 0x714   : > { %5706 = vpow2.f32 %v4117_v3  ;;  %v4072_v63 = vsub.f32 %v7698_v60, %v4024_v29 }
 0x715   : > { %v7846_v56 = vpop.eup %5700 }
 0x716   : > { %v4119_v46 = vmul.f32 1.442695, %v4072_v63  ;;  %4175 = vadd.xlane.f32.xlu1 %v7846_v56 }
 0x717   : > { %v4026_v47 = vpop.xlane.xlu0 %4025 }
 0x718   : > { %5708 = vpow2.f32 %v4119_v46  ;;  %v4073_v17 = vsub.f32 %v7704_v23, %v4026_v47 }
 0x719   : > { %v7850_v31 = vpop.eup %5702 }
 0x71a   : > { %v4121_v54 = vmul.f32 1.442695, %v4073_v17  ;;  %4177 = vadd.xlane.f32.xlu0 %v7850_v31 }
 0x71b   : > { %v4028_v26 = vpop.xlane.xlu1 %4027 }
 0x71c   : > { %5710 = vpow2.f32 %v4121_v54  ;;  %v4074_v16 = vsub.f32 %v7710_v6, %v4028_v26 }
 0x71d   : > { %v7854_v15 = vpop.eup %5704 }
 0x71e   : > { %v4123_v60 = vmul.f32 1.442695, %v4074_v16  ;;  %4179 = vadd.xlane.f32.xlu1 %v7854_v15 }
 0x71f   : > { %v4030_v4 = vpop.xlane.xlu0 %4029 }
 0x720   : > { %5712 = vpow2.f32 %v4123_v60  ;;  %v4075_v52 = vsub.f32 %v7716_v20, %v4030_v4 }
 0x721   : > { %v7858_v21 = vpop.eup %5706 }
 0x722   : > { %v4125_v23 = vmul.f32 1.442695, %v4075_v52  ;;  %4181 = vadd.xlane.f32.xlu0 %v7858_v21 }
 0x723   : > { %v4032_v62 = vpop.xlane.xlu1 %4031 }
 0x724   : > { %5714 = vpow2.f32 %v4125_v23  ;;  %v4076_v40 = vsub.f32 %v7722_v8, %v4032_v62 }
 0x725   : > { %v7862_v19 = vpop.eup %5708 }
 0x726   : > { %v4127_v6 = vmul.f32 1.442695, %v4076_v40  ;;  %4183 = vadd.xlane.f32.xlu1 %v7862_v19 }
 0x727   : > { %v4034_v51 = vpop.xlane.xlu0 %4033 }
 0x728   : > { %5716 = vpow2.f32 %v4127_v6  ;;  %v4077_v49 = vsub.f32 %v7728_v5, %v4034_v51 }
 0x729   : > { %v7866_v18 = vpop.eup %5710 }
 0x72a   : > { %v4129_v20 = vmul.f32 1.442695, %v4077_v49  ;;  %4185 = vadd.xlane.f32.xlu0 %v7866_v18 }
 0x72b   : > { %v4036_v44 = vpop.xlane.xlu1 %4035 }
 0x72c   : > { %5718 = vpow2.f32 %v4129_v20  ;;  %v4078_v2 = vsub.f32 %v7734_v33, %v4036_v44 }
 0x72d   : > { %v7870_v12 = vpop.eup %5712 }
 0x72e   : > { %v4131_v8 = vmul.f32 1.442695, %v4078_v2  ;;  %4187 = vadd.xlane.f32.xlu1 %v7870_v12 }
 0x72f   : > { %v4038_v0 = vpop.xlane.xlu0 %4037 }
 0x730   : > { %5720 = vpow2.f32 %v4131_v8  ;;  %v4079_v39 = vsub.f32 %v7740_v57, %v4038_v0 }
 0x731   : > { %v7874_v30 = vpop.eup %5714 }
 0x732   : > { %v4133_v5 = vmul.f32 1.442695, %v4079_v39  ;;  %4189 = vadd.xlane.f32.xlu0 %v7874_v30 }
 0x733   : > { %v4040_v14 = vpop.xlane.xlu1 %4039 }
 0x734   : > { %5722 = vpow2.f32 %v4133_v5  ;;  %v4080_v41 = vsub.f32 %v7746_v36, %v4040_v14 }
 0x735   : > { %v7878_v24 = vpop.eup %5716 }
 0x736   : > { %v4135_v33 = vmul.f32 1.442695, %v4080_v41  ;;  %4191 = vadd.xlane.f32.xlu1 %v7878_v24 }
 0x737   : > { %v4042_v11 = vpop.xlane.xlu0 %4041 }
 0x738   : > { %5724 = vpow2.f32 %v4135_v33  ;;  %v4081_v59 = vsub.f32 %v7752_v37, %v4042_v11 }
 0x739   : > { %v7882_v34 = vpop.eup %5718 }
 0x73a   : > { %v4137_v57 = vmul.f32 1.442695, %v4081_v59  ;;  %4193 = vadd.xlane.f32.xlu0 %v7882_v34 }
 0x73b   : > { %v4044_v13 = vpop.xlane.xlu1 %4043 }
 0x73c   : > { %5726 = vpow2.f32 %v4137_v57  ;;  %v4082_v53 = vsub.f32 %v7758_v25, %v4044_v13 }
 0x73d   : > { %v7886_v1 = vpop.eup %5720 }
 0x73e   : > { %v4139_v36 = vmul.f32 1.442695, %v4082_v53  ;;  %4195 = vadd.xlane.f32.xlu1 %v7886_v1 }
 0x73f   : > { %v4046_v3 = vpop.xlane.xlu0 %4045 }
 0x740   : > { %5728 = vpow2.f32 %v4139_v36  ;;  %v4083_v29 = vsub.f32 %v7764_v35, %v4046_v3 }
 0x741   : > { %v7890_v63 = vpop.eup %5722 }
 0x742   : > { %v4141_v37 = vmul.f32 1.442695, %v4083_v29  ;;  %4197 = vadd.xlane.f32.xlu0 %v7890_v63 }
 0x743   : > { %v4048_v46 = vpop.xlane.xlu1 %4047 }
 0x744   : > { %5730 = vpow2.f32 %v4141_v37  ;;  %v4084_v47 = vsub.f32 %v7770_v7, %v4048_v46 }
 0x745   : > { %v7894_v17 = vpop.eup %5724 }
 0x746   : > { %v4143_v25 = vmul.f32 1.442695, %v4084_v47  ;;  %4199 = vadd.xlane.f32.xlu1 %v7894_v17 }
 0x747   : > { %v4050_v54 = vpop.xlane.xlu0 %4049 }
 0x748   : > { %5732 = vpow2.f32 %v4143_v25  ;;  %v4085_v26 = vsub.f32 %v7776_v43, %v4050_v54 }
 0x749   : > { %v7898_v16 = vpop.eup %5726 }
 0x74a   : > { %v4145_v35 = vmul.f32 1.442695, %v4085_v26  ;;  %4201 = vadd.xlane.f32.xlu0 %v7898_v16 }
 0x74b   : > { %v4052_v60 = vpop.xlane.xlu1 %4051 }
 0x74c   : > { %5734 = vpow2.f32 %v4145_v35  ;;  %v4086_v4 = vsub.f32 %v7782_v58, %v4052_v60 }
 0x74d   : > { %v7902_v52 = vpop.eup %5728 }
 0x74e   : > { %v4147_v7 = vmul.f32 1.442695, %v4086_v4  ;;  %4203 = vadd.xlane.f32.xlu1 %v7902_v52 }
 0x74f   : > { %v4054_v23 = vpop.xlane.xlu0 %4053 }
 0x750   : > { %5736 = vpow2.f32 %v4147_v7  ;;  %v4087_v62 = vsub.f32 %v7788_v38, %v4054_v23 }
 0x751   : > { %v7906_v40 = vpop.eup %5730 }
 0x752   : > { %v4149_v43 = vmul.f32 1.442695, %v4087_v62  ;;  %4205 = vadd.xlane.f32.xlu0 %v7906_v40 }
 0x753   : > { %v4056_v6 = vpop.xlane.xlu1 %4055 }
 0x754   : > { %5738 = vpow2.f32 %v4149_v43  ;;  %v4088_v51 = vsub.f32 %v7794_v22, %v4056_v6 }
 0x755   : > { %v7910_v49 = vpop.eup %5732 }
 0x756   : > { %v4151_v58 = vmul.f32 1.442695, %v4088_v51  ;;  %4207 = vadd.xlane.f32.xlu1 %v7910_v49 }
 0x758   : > { %5740 = vpow2.f32 %v4151_v58 }
 0x759   : > { %v7913_v20 = vpop.eup %5734 }
 0x75a   : > { %4209 = vadd.xlane.f32.xlu0 %v7913_v20 }
 0x75d   : > { %v7916_v38 = vpop.eup %5736 }
 0x75e   : > { %4211 = vadd.xlane.f32.xlu1 %v7916_v38 }
 0x761   : > { %v7919_v44 = vpop.eup %5738 }
 0x762   : > { %4213 = vadd.xlane.f32.xlu0 %v7919_v44 }
 0x765   : > { %v7922_v2 = vpop.eup %5740 }
 0x766   : > { %4215 = vadd.xlane.f32.xlu1 %v7922_v2 }
 0x773   : > { %v4154_v22 = vpop.xlane.xlu0 %4153 }
 0x774   : > { %5742 = vrcp.f32 %v4154_v22 }
 0x777   : > { %v4156_v8 = vpop.xlane.xlu1 %4155 }
 0x778   : > { %5744 = vrcp.f32 %v4156_v8 }
 0x77b   : > { %v4158_v0 = vpop.xlane.xlu0 %4157 }
 0x77c   : > { %5746 = vrcp.f32 %v4158_v0 }
 0x77f   : > { %v4160_v39 = vpop.xlane.xlu1 %4159 }
 0x780   : > { %5748 = vrcp.f32 %v4160_v39 }
 0x781   : > { %v5743_v5 = vpop.eup %5742 }
 0x782   : > { %v4249_v14 = vmul.f32 %v5743_v5, %v4154_v22 }
 0x783   : > { %v4162_v41 = vpop.xlane.xlu0 %4161 }
 0x784   : > { %v4281_v33 = vsub.f32 2.0, %v4249_v14  ;;  %5750 = vrcp.f32 %v4162_v41 }
 0x785   : > { %v5745_v11 = vpop.eup %5744 }
 0x786   : > { %v4313_v59 = vmul.f32 %v5743_v5, %v4281_v33  ;;  %v4250_v57 = vmul.f32 %v5745_v11, %v4156_v8 }
 0x787   : > { %v4164_v13 = vpop.xlane.xlu1 %4163 }
 0x788   : > { %v4345_v53 = vmul.f32 %v7802_v61, %v4313_v59  ;;  %v4282_v36 = vsub.f32 2.0, %v4250_v57  ;;  %5752 = vrcp.f32 %v4164_v13 }
 0x789   : > { %v5747_v3 = vpop.eup %5746 }
 0x78a   : > { %4377 = vst [vmem:[%s7930_s3] sm:$0xff] %v4345_v53  ;;  %v4314_v29 = vmul.f32 %v5745_v11, %v4282_v36  ;;  %v4251_v37 = vmul.f32 %v5747_v3, %v4158_v0 }
 0x78b   : > { %v4166_v46 = vpop.xlane.xlu0 %4165 }
 0x78c   : > { %v4346_v47 = vmul.f32 %v7806_v48, %v4314_v29  ;;  %v4283_v25 = vsub.f32 2.0, %v4251_v37  ;;  %5754 = vrcp.f32 %v4166_v46 }
 0x78d   : > { %v5749_v54 = vpop.eup %5748 }
 0x78e   : > { %4378 = vst [vmem:[%s7930_s3 + $0x8] sm:$0xff] %v4346_v47  ;;  %v4315_v26 = vmul.f32 %v5747_v3, %v4283_v25  ;;  %v4252_v35 = vmul.f32 %v5749_v54, %v4160_v39 }
 0x78f   : > { %v4168_v60 = vpop.xlane.xlu1 %4167 }
 0x790   : > { %v4347_v61 = vmul.f32 %v7810_v50, %v4315_v26  ;;  %v4284_v4 = vsub.f32 2.0, %v4252_v35  ;;  %5756 = vrcp.f32 %v4168_v60 }
 0x791   : > { %v5751_v7 = vpop.eup %5750 }
 0x792   : > { %4379 = vst [vmem:[%s7930_s3 + $0x10] sm:$0xff] %v4347_v61  ;;  %v4316_v23 = vmul.f32 %v5749_v54, %v4284_v4  ;;  %v4253_v62 = vmul.f32 %v5751_v7, %v4162_v41 }
 0x793   : > { %v4170_v43 = vpop.xlane.xlu0 %4169 }
 0x794   : > { %v4348_v48 = vmul.f32 %v7814_v55, %v4316_v23  ;;  %v4285_v6 = vsub.f32 2.0, %v4253_v62  ;;  %5758 = vrcp.f32 %v4170_v43 }
 0x795   : > { %v5753_v51 = vpop.eup %5752 }
 0x796   : > { %4380 = vst [vmem:[%s7930_s3 + $0x18] sm:$0xff] %v4348_v48  ;;  %v4317_v58 = vmul.f32 %v5751_v7, %v4285_v6  ;;  %v4254_v22 = vmul.f32 %v5753_v51, %v4164_v13 }
 0x797   : > { %v4172_v8 = vpop.xlane.xlu1 %4171 }
 0x798   : > { %v4349_v50 = vmul.f32 %v7818_v45, %v4317_v58  ;;  %v4286_v0 = vsub.f32 2.0, %v4254_v22  ;;  %5760 = vrcp.f32 %v4172_v8 }
 0x799   : > { %v5755_v39 = vpop.eup %5754 }
 0x79a   : > { %4381 = vst [vmem:[%s7930_s3 + $0x20] sm:$0xff] %v4349_v50  ;;  %v4318_v5 = vmul.f32 %v5753_v51, %v4286_v0  ;;  %v4255_v14 = vmul.f32 %v5755_v39, %v4166_v46 }
 0x79b   : > { %v4174_v41 = vpop.xlane.xlu0 %4173 }
 0x79c   : > { %v4350_v55 = vmul.f32 %v7822_v10, %v4318_v5  ;;  %v4287_v33 = vsub.f32 2.0, %v4255_v14  ;;  %5762 = vrcp.f32 %v4174_v41 }
 0x79d   : > { %v5757_v11 = vpop.eup %5756 }
 0x79e   : > { %4382 = vst [vmem:[%s7930_s3 + $0x28] sm:$0xff] %v4350_v55  ;;  %v4319_v59 = vmul.f32 %v5755_v39, %v4287_v33  ;;  %v4256_v57 = vmul.f32 %v5757_v11, %v4168_v60 }
 0x79f   : > { %v4176_v13 = vpop.xlane.xlu1 %4175 }
 0x7a0   : > { %v4351_v45 = vmul.f32 %v7826_v42, %v4319_v59  ;;  %v4288_v53 = vsub.f32 2.0, %v4256_v57  ;;  %5764 = vrcp.f32 %v4176_v13 }
 0x7a1   : > { %v5759_v36 = vpop.eup %5758 }
 0x7a2   : > { %4383 = vst [vmem:[%s7930_s3 + $0x30] sm:$0xff] %v4351_v45  ;;  %v4320_v3 = vmul.f32 %v5757_v11, %v4288_v53  ;;  %v4257_v29 = vmul.f32 %v5759_v36, %v4170_v43 }
 0x7a3   : > { %v4178_v37 = vpop.xlane.xlu0 %4177 }
 0x7a4   : > { %v4352_v10 = vmul.f32 %v7830_v27, %v4320_v3  ;;  %v4289_v46 = vsub.f32 2.0, %v4257_v29  ;;  %5766 = vrcp.f32 %v4178_v37 }
 0x7a5   : > { %v5761_v47 = vpop.eup %5760 }
 0x7a6   : > { %4384 = vst [vmem:[%s7930_s3 + $0x38] sm:$0xff] %v4352_v10  ;;  %v4321_v25 = vmul.f32 %v5759_v36, %v4289_v46  ;;  %v4258_v54 = vmul.f32 %v5761_v47, %v4172_v8 }
 0x7a7   : > { %v4180_v26 = vpop.xlane.xlu1 %4179 }
 0x7a8   : > { %v4353_v42 = vmul.f32 %v7834_v32, %v4321_v25  ;;  %v4290_v35 = vsub.f32 2.0, %v4258_v54  ;;  %5768 = vrcp.f32 %v4180_v26 }
 0x7a9   : > { %v5763_v60 = vpop.eup %5762 }
 0x7aa   : > { %4385 = vst [vmem:[%s7930_s3 + $0x40] sm:$0xff] %v4353_v42  ;;  %v4322_v61 = vmul.f32 %v5761_v47, %v4290_v35  ;;  %v4259_v4 = vmul.f32 %v5763_v60, %v4174_v41 }
 0x7ab   : > { %v4182_v7 = vpop.xlane.xlu0 %4181 }
 0x7ac   : > { %v4354_v27 = vmul.f32 %v7838_v9, %v4322_v61  ;;  %v4291_v23 = vsub.f32 2.0, %v4259_v4  ;;  %5770 = vrcp.f32 %v4182_v7 }
 0x7ad   : > { %v5765_v62 = vpop.eup %5764 }
 0x7ae   : > { %4386 = vst [vmem:[%s7930_s3 + $0x48] sm:$0xff] %v4354_v27  ;;  %v4323_v43 = vmul.f32 %v5763_v60, %v4291_v23  ;;  %v4260_v48 = vmul.f32 %v5765_v62, %v4176_v13 }
 0x7af   : > { %v4184_v6 = vpop.xlane.xlu1 %4183 }
 0x7b0   : > { %v4355_v32 = vmul.f32 %v7842_v28, %v4323_v43  ;;  %v4292_v51 = vsub.f32 2.0, %v4260_v48  ;;  %5772 = vrcp.f32 %v4184_v6 }
 0x7b1   : > { %v5767_v58 = vpop.eup %5766 }
 0x7b2   : > { %4387 = vst [vmem:[%s7930_s3 + $0x50] sm:$0xff] %v4355_v32  ;;  %v4324_v22 = vmul.f32 %v5765_v62, %v4292_v51  ;;  %v4261_v8 = vmul.f32 %v5767_v58, %v4178_v37 }
 0x7b3   : > { %v4186_v50 = vpop.xlane.xlu0 %4185 }
 0x7b4   : > { %v4356_v9 = vmul.f32 %v7846_v56, %v4324_v22  ;;  %v4293_v0 = vsub.f32 2.0, %v4261_v8  ;;  %5774 = vrcp.f32 %v4186_v50 }
 0x7b5   : > { %v5769_v39 = vpop.eup %5768 }
 0x7b6   : > { %4388 = vst [vmem:[%s7930_s3 + $0x58] sm:$0xff] %v4356_v9  ;;  %v4325_v5 = vmul.f32 %v5767_v58, %v4293_v0  ;;  %v4262_v14 = vmul.f32 %v5769_v39, %v4180_v26 }
 0x7b7   : > { %v4188_v41 = vpop.xlane.xlu1 %4187 }
 0x7b8   : > { %v4357_v28 = vmul.f32 %v7850_v31, %v4325_v5  ;;  %v4294_v55 = vsub.f32 2.0, %v4262_v14  ;;  %5776 = vrcp.f32 %v4188_v41 }
 0x7b9   : > { %v5771_v33 = vpop.eup %5770 }
 0x7ba   : > { %4389 = vst [vmem:[%s7930_s3 + $0x60] sm:$0xff] %v4357_v28  ;;  %v4326_v11 = vmul.f32 %v5769_v39, %v4294_v55  ;;  %v4263_v59 = vmul.f32 %v5771_v33, %v4182_v7 }
 0x7bb   : > { %v4190_v57 = vpop.xlane.xlu0 %4189 }
 0x7bc   : > { %v4358_v56 = vmul.f32 %v7854_v15, %v4326_v11  ;;  %v4295_v13 = vsub.f32 2.0, %v4263_v59  ;;  %5778 = vrcp.f32 %v4190_v57 }
 0x7bd   : > { %v5773_v45 = vpop.eup %5772 }
 0x7be   : > { %4390 = vst [vmem:[%s7930_s3 + $0x68] sm:$0xff] %v4358_v56  ;;  %v4327_v53 = vmul.f32 %v5771_v33, %v4295_v13  ;;  %v4264_v36 = vmul.f32 %v5773_v45, %v4184_v6 }
 0x7bf   : > { %v4192_v3 = vpop.xlane.xlu1 %4191 }
 0x7c0   : > { %v4359_v31 = vmul.f32 %v7858_v21, %v4327_v53  ;;  %v4296_v29 = vsub.f32 2.0, %v4264_v36  ;;  %5780 = vrcp.f32 %v4192_v3 }
 0x7c1   : > { %v5775_v37 = vpop.eup %5774 }
 0x7c2   : > { %4391 = vst [vmem:[%s7930_s3 + $0x70] sm:$0xff] %v4359_v31  ;;  %v4328_v10 = vmul.f32 %v5773_v45, %v4296_v29  ;;  %v4265_v46 = vmul.f32 %v5775_v37, %v4186_v50 }
 0x7c3   : > { %v4194_v47 = vpop.xlane.xlu0 %4193 }
 0x7c4   : > { %v4360_v15 = vmul.f32 %v7862_v19, %v4328_v10  ;;  %v4297_v25 = vsub.f32 2.0, %v4265_v46  ;;  %5782 = vrcp.f32 %v4194_v47 }
 0x7c5   : > { %v5777_v54 = vpop.eup %5776 }
 0x7c6   : > { %4392 = vst [vmem:[%s7930_s3 + $0x78] sm:$0xff] %v4360_v15  ;;  %v4329_v26 = vmul.f32 %v5775_v37, %v4297_v25  ;;  %v4266_v42 = vmul.f32 %v5777_v54, %v4188_v41 }
 0x7c7   : > { %v4196_v35 = vpop.xlane.xlu1 %4195 }
 0x7c8   : > { %v4361_v21 = vmul.f32 %v7866_v18, %v4329_v26  ;;  %v4298_v60 = vsub.f32 2.0, %v4266_v42  ;;  %5784 = vrcp.f32 %v4196_v35 }
 0x7c9   : > { %v5779_v61 = vpop.eup %5778 }
 0x7ca   : > { %4393 = vst [vmem:[%s7930_s3 + $0x80] sm:$0xff] %v4361_v21  ;;  %v4330_v4 = vmul.f32 %v5777_v54, %v4298_v60  ;;  %v4267_v7 = vmul.f32 %v5779_v61, %v4190_v57 }
 0x7cb   : > { %v4198_v27 = vpop.xlane.xlu0 %4197 }
 0x7cc   : > { %v4362_v19 = vmul.f32 %v7870_v12, %v4330_v4  ;;  %v4299_v23 = vsub.f32 2.0, %v4267_v7  ;;  %5786 = vrcp.f32 %v4198_v27 }
 0x7cd   : > { %v5781_v62 = vpop.eup %5780 }
 0x7ce   : > { %4394 = vst [vmem:[%s7930_s3 + $0x88] sm:$0xff] %v4362_v19  ;;  %v4331_v43 = vmul.f32 %v5779_v61, %v4299_v23  ;;  %v4268_v48 = vmul.f32 %v5781_v62, %v4192_v3 }
 0x7cf   : > { %v4200_v6 = vpop.xlane.xlu1 %4199 }
 0x7d0   : > { %v4363_v18 = vmul.f32 %v7874_v30, %v4331_v43  ;;  %v4300_v32 = vsub.f32 2.0, %v4268_v48  ;;  %5788 = vrcp.f32 %v4200_v6 }
 0x7d1   : > { %v5783_v51 = vpop.eup %5782 }
 0x7d2   : > { %4395 = vst [vmem:[%s7930_s3 + $0x90] sm:$0xff] %v4363_v18  ;;  %v4332_v58 = vmul.f32 %v5781_v62, %v4300_v32  ;;  %v4269_v22 = vmul.f32 %v5783_v51, %v4194_v47 }
 0x7d3   : > { %v4202_v8 = vpop.xlane.xlu0 %4201 }
 0x7d4   : > { %v4364_v12 = vmul.f32 %v7878_v24, %v4332_v58  ;;  %v4301_v50 = vsub.f32 2.0, %v4269_v22  ;;  %5790 = vrcp.f32 %v4202_v8 }
 0x7d5   : > { %v5785_v9 = vpop.eup %5784 }
 0x7d6   : > { %4396 = vst [vmem:[%s7930_s3 + $0x98] sm:$0xff] %v4364_v12  ;;  %v4333_v0 = vmul.f32 %v5783_v51, %v4301_v50  ;;  %v4270_v39 = vmul.f32 %v5785_v9, %v4196_v35 }
 0x7d7   : > { %v4204_v5 = vpop.xlane.xlu1 %4203 }
 0x7d8   : > { %v4365_v30 = vmul.f32 %v7882_v34, %v4333_v0  ;;  %v4302_v14 = vsub.f32 2.0, %v4270_v39  ;;  %5792 = vrcp.f32 %v4204_v5 }
 0x7d9   : > { %v5787_v41 = vpop.eup %5786 }
 0x7da   : > { %4397 = vst [vmem:[%s7930_s3 + $0xa0] sm:$0xff] %v4365_v30  ;;  %v4334_v28 = vmul.f32 %v5785_v9, %v4302_v14  ;;  %v4271_v55 = vmul.f32 %v5787_v41, %v4198_v27 }
 0x7db   : > { %v4206_v33 = vpop.xlane.xlu0 %4205 }
 0x7dc   : > { %v4366_v24 = vmul.f32 %v7886_v1, %v4334_v28  ;;  %v4303_v11 = vsub.f32 2.0, %v4271_v55  ;;  %5794 = vrcp.f32 %v4206_v33 }
 0x7dd   : > { %v5789_v59 = vpop.eup %5788 }
 0x7de   : > { %4398 = vst [vmem:[%s7930_s3 + $0xa8] sm:$0xff] %v4366_v24  ;;  %v4335_v57 = vmul.f32 %v5787_v41, %v4303_v11  ;;  %v4272_v56 = vmul.f32 %v5789_v59, %v4200_v6 }
 0x7df   : > { %v4208_v13 = vpop.xlane.xlu1 %4207 }
 0x7e0   : > { %v4367_v34 = vmul.f32 %v7890_v63, %v4335_v57  ;;  %v4304_v45 = vsub.f32 2.0, %v4272_v56  ;;  %5796 = vrcp.f32 %v4208_v13 }
 0x7e1   : > { %v5791_v53 = vpop.eup %5790 }
 0x7e2   : > { %4399 = vst [vmem:[%s7930_s3 + $0xb0] sm:$0xff] %v4367_v34  ;;  %v4336_v36 = vmul.f32 %v5789_v59, %v4304_v45  ;;  %v4273_v3 = vmul.f32 %v5791_v53, %v4202_v8 }
 0x7e3   : > { %v4210_v31 = vpop.xlane.xlu0 %4209 }
 0x7e4   : > { %v4368_v1 = vmul.f32 %v7894_v17, %v4336_v36  ;;  %v4305_v29 = vsub.f32 2.0, %v4273_v3  ;;  %5798 = vrcp.f32 %v4210_v31 }
 0x7e5   : > { %v5793_v37 = vpop.eup %5792 }
 0x7e6   : > { %4400 = vst [vmem:[%s7930_s3 + $0xb8] sm:$0xff] %v4368_v1  ;;  %v4337_v10 = vmul.f32 %v5791_v53, %v4305_v29  ;;  %v4274_v46 = vmul.f32 %v5793_v37, %v4204_v5 }
 0x7e7   : > { %v4212_v47 = vpop.xlane.xlu1 %4211 }
 0x7e8   : > { %v4369_v63 = vmul.f32 %v7898_v16, %v4337_v10  ;;  %v4306_v15 = vsub.f32 2.0, %v4274_v46  ;;  %5800 = vrcp.f32 %v4212_v47 }
 0x7e9   : > { %v5795_v25 = vpop.eup %5794 }
 0x7ea   : > { %4401 = vst [vmem:[%s7930_s3 + $0xc0] sm:$0xff] %v4369_v63  ;;  %v4338_v54 = vmul.f32 %v5793_v37, %v4306_v15  ;;  %v4275_v26 = vmul.f32 %v5795_v25, %v4206_v33 }
 0x7eb   : > { %v4214_v42 = vpop.xlane.xlu0 %4213 }
 0x7ec   : > { %v4370_v17 = vmul.f32 %v7902_v52, %v4338_v54  ;;  %v4307_v35 = vsub.f32 2.0, %v4275_v26  ;;  %5802 = vrcp.f32 %v4214_v42 }
 0x7ed   : > { %v5797_v21 = vpop.eup %5796 }
 0x7ee   : > { %4402 = vst [vmem:[%s7930_s3 + $0xc8] sm:$0xff] %v4370_v17  ;;  %v4339_v60 = vmul.f32 %v5795_v25, %v4307_v35  ;;  %v4276_v61 = vmul.f32 %v5797_v21, %v4208_v13 }
 0x7ef   : > { %v4216_v4 = vpop.xlane.xlu1 %4215 }
 0x7f0   : > { %v4371_v16 = vmul.f32 %v7906_v40, %v4339_v60  ;;  %v4308_v7 = vsub.f32 2.0, %v4276_v61  ;;  %5804 = vrcp.f32 %v4216_v4 }
 0x7f1   : > { %v5799_v27 = vpop.eup %5798 }
 0x7f2   : > { %4403 = vst [vmem:[%s7930_s3 + $0xd0] sm:$0xff] %v4371_v16  ;;  %v4340_v19 = vmul.f32 %v5797_v21, %v4308_v7  ;;  %v4277_v23 = vmul.f32 %v5799_v27, %v4210_v31 }
 0x7f4   : > { %v4372_v52 = vmul.f32 %v7910_v49, %v4340_v19  ;;  %v4309_v62 = vsub.f32 2.0, %v4277_v23 }
 0x7f5   : > { %v5801_v43 = vpop.eup %5800 }
 0x7f6   : > { %4404 = vst [vmem:[%s7930_s3 + $0xd8] sm:$0xff] %v4372_v52  ;;  %v4341_v48 = vmul.f32 %v5799_v27, %v4309_v62  ;;  %v4278_v6 = vmul.f32 %v5801_v43, %v4212_v47 }
 0x7f8   : > { %v4373_v18 = vmul.f32 %v7913_v20, %v4341_v48  ;;  %v4310_v32 = vsub.f32 2.0, %v4278_v6 }
 0x7f9   : > { %v5803_v40 = vpop.eup %5802 }
 0x7fa   : > { %4405 = vst [vmem:[%s7930_s3 + $0xe0] sm:$0xff] %v4373_v18  ;;  %v4342_v51 = vmul.f32 %v5801_v43, %v4310_v32  ;;  %v4279_v58 = vmul.f32 %v5803_v40, %v4214_v42 }
 0x7fc   : > { %v4374_v22 = vmul.f32 %v7916_v38, %v4342_v51  ;;  %v4311_v8 = vsub.f32 2.0, %v4279_v58 }
 0x7fd   : > { %v5805_v12 = vpop.eup %5804 }
 0x7fe   : > { %4406 = vst [vmem:[%s7930_s3 + $0xe8] sm:$0xff] %v4374_v22  ;;  %v4343_v49 = vmul.f32 %v5803_v40, %v4311_v8  ;;  %v4280_v50 = vmul.f32 %v5805_v12, %v4216_v4 }
 0x800   : > { %v4375_v9 = vmul.f32 %v7919_v44, %v4343_v49  ;;  %v4312_v0 = vsub.f32 2.0, %v4280_v50 }
 0x802   : > { %4407 = vst [vmem:[%s7930_s3 + $0xf0] sm:$0xff] %v4375_v9  ;;  %v4344_v39 = vmul.f32 %v5805_v12, %v4312_v0 }
 0x804   : > { %v4376_v20 = vmul.f32 %v7922_v2, %v4344_v39 }
 0x806   : > { %4408 = vst [vmem:[%s7930_s3 + $0xf8] sm:$0xff] %v4376_v20 }
 0x807 PF: > { %s29_s0 = sadd.s32 1, %s5845_s0  }
 0x808   : > { %p26_p4 = scmp.ge.s32.totalorder %s29_s0, 4  }
 0x80a   :  { %28 = sbr.rel (!%p26_p4) target bundleno = 5 (0x5), region = 126 }

</bundles_post_ra>
